<compile_context>
chip_gen: v5e
topology: v5e:2x2
jax: 0.10.0
libtpu: 0.0.40
codegen_flags: <defaults>
</compile_context>

<pallas_src>
import jax
import jax.numpy as jnp
from jax.experimental import pallas as pl
from jax.experimental.pallas import tpu as pltpu


def _ceil_div(a, b):
    return -(-a // b)


def _round_up(a, b):
    return _ceil_div(a, b) * b


def _make_vq_kernel(tm, D, K, Kc):
    """Build the per-tile kernel; tm/D/K/Kc are static Python ints."""
    nk = K // Kc
    small_k = nk == 1

    def kernel(z_ref, w_ref, w2_ref, zq_ref, ind_ref, err_ref):
        z = z_ref[...].astype(jnp.float32)                         # (tm, D)
        zn = -2.0 * z                                              # fold -2 into matmul LHS
        w = w_ref[...].astype(jnp.float32)                         # (K, D), resident

        if small_k:
            # Straight-line path: one full-K dist + reduce (K <= 512).
            dist = w2_ref[...] + jnp.dot(zn, w.T,
                                         preferred_element_type=jnp.float32)  # (tm, K)
            iota_k = jax.lax.broadcasted_iota(jnp.int32, (tm, K), 1)
            best_min = jnp.min(dist, axis=1, keepdims=True)        # (tm, 1)
            # first-occurrence tie-break
            best_ind = jnp.min(jnp.where(dist <= best_min, iota_k, K),
                               axis=1, keepdims=True)              # (tm, 1)
        else:
            # Chunked path: carry only (min, argmin); gather deferred to after loop.
            iota_c = jax.lax.broadcasted_iota(jnp.int32, (tm, Kc), 1)  # hoisted

            def chunk_body(c, carry):
                best_min, best_ind = carry
                off = pl.multiple_of(c * Kc, Kc)
                wc = w_ref[pl.ds(off, Kc), :].astype(jnp.float32)  # (Kc, D)
                w2c = w2_ref[pl.ds(c, 1), :]                       # (1, Kc)
                # ||z||^2 is a per-row constant -> omitted for argmin
                dist = w2c + jnp.dot(zn, wc.T,
                                     preferred_element_type=jnp.float32)  # (tm, Kc)
                local_min = jnp.min(dist, axis=1, keepdims=True)
                local_ind = jnp.min(jnp.where(dist <= local_min, iota_c, Kc),
                                    axis=1, keepdims=True)
                # strict '<' so earlier chunks win ties (global first occurrence)
                better = local_min < best_min
                best_min = jnp.where(better, local_min, best_min)
                best_ind = jnp.where(better, local_ind + c * Kc, best_ind)
                return best_min, best_ind

            init = (jnp.full((tm, 1), jnp.inf, dtype=jnp.float32),
                    jnp.zeros((tm, 1), dtype=jnp.int32))
            _, best_ind = jax.lax.fori_loop(0, nk, chunk_body, init,
                                            unroll=min(nk, 4))
            iota_k = jax.lax.broadcasted_iota(jnp.int32, (tm, K), 1)

        # One one-hot gather matmul contracting over full K (MXU).
        onehot = (iota_k == best_ind).astype(jnp.float32)          # (tm, K)
        best_zq = jnp.dot(onehot, w, preferred_element_type=jnp.float32)  # (tm, D)

        ind_ref[...] = best_ind
        zq_ref[...] = best_zq.astype(zq_ref.dtype)
        # per-row squared error (exact); summed / normalized in the wrapper
        err_ref[...] = jnp.sum((best_zq - z) ** 2, axis=1, keepdims=True)

    return kernel


def quantizer_forward(z_e, embed_weight, *, tm=1024, commitment_cost=0.25):
    """Pallas equivalent of Quantizer.forward.

    z_e:          (..., D) float32, channels-last
    embed_weight: (K, D)   float32 codebook
    returns (z_q, diff, embed_ind) with the same forward-pass values.
    """
    D = z_e.shape[-1]
    K = embed_weight.shape[0]
    assert embed_weight.shape[1] == D
    lead_shape = z_e.shape[:-1]

    flatten = z_e.reshape(-1, D).astype(jnp.float32)
    N = flatten.shape[0]

    # ---- tile size selection ----
    # Keep the (tm, K) intermediates (dist / one-hot) under ~8 MiB for huge K.
    tm = int(min(tm, max(256, _round_up((8 << 20) // (4 * K), 8))))
    # Shrink only for small inputs; keep a multiple of 8 (sublanes).
    tm = max(8, min(tm, _round_up(N, 8)))
    n_tiles = _ceil_div(N, tm)
    if n_tiles > 1 and n_tiles % 2 == 1:
        # v7x megacore balance: prefer an even tile count, keep tm large.
        n_even = n_tiles + 1
        tm = max(8, _round_up(_ceil_div(N, n_even), 8))
        n_tiles = _ceil_div(N, tm)
    n_pad = n_tiles * tm
    if n_pad != N:
        # TODO(synk): ragged tail could be masked in-kernel (scalar-prefetched N)
        # to avoid this HBM pad copy; secondary, kept simple here.
        flatten = jnp.pad(flatten, ((0, n_pad - N), (0, 0)))

    # ---- codebook chunking ----
    if K <= 512:
        Kc = K                      # straight-line path, no chunk loop
    elif K % 256 == 0:
        Kc = 256                    # full-width MXU output on v6e/v7x
    elif K % 128 == 0:
        Kc = 128
    else:
        Kc = K
    nk = K // Kc

    w = embed_weight.astype(jnp.float32)
    # hoisted ||W||^2, pre-chunked to (nk, Kc)
    w2 = jnp.sum(w * w, axis=1).reshape(nk, Kc)

    kernel = _make_vq_kernel(tm, D, K, Kc)

    cost = pl.CostEstimate(
        flops=4 * n_pad * K * D,             # dist matmul + one-hot gather matmul
        transcendentals=0,
        bytes_accessed=(2 * n_pad * D + K * D + K + 2 * n_pad) * 4,
    )

    zq_flat, ind_flat, err_rows = pl.pallas_call(
        kernel,
        out_shape=(
            jax.ShapeDtypeStruct((n_pad, D), z_e.dtype),
            jax.ShapeDtypeStruct((n_pad, 1), jnp.int32),
            jax.ShapeDtypeStruct((n_pad, 1), jnp.float32),
        ),
        grid_spec=pltpu.PrefetchScalarGridSpec(
            num_scalar_prefetch=0,
            grid=(n_tiles,),
            in_specs=[
                pl.BlockSpec((tm, D), lambda i: (i, 0)),      # z tile
                pl.BlockSpec((K, D), lambda i: (0, 0)),       # full codebook (resident)
                pl.BlockSpec((nk, Kc), lambda i: (0, 0)),     # hoisted ||W||^2
            ],
            out_specs=[
                pl.BlockSpec((tm, D), lambda i: (i, 0)),      # z_q
                pl.BlockSpec((tm, 1), lambda i: (i, 0)),      # indices
                pl.BlockSpec((tm, 1), lambda i: (i, 0)),      # per-row sq error
            ],
        ),
        compiler_params=pltpu.CompilerParams(
            dimension_semantics=("parallel",),   # no cross-step state -> megacore-safe
        ),
        cost_estimate=cost,
    )(flatten, w, w2)

    z_q = zq_flat[:N].reshape(z_e.shape)
    embed_ind = ind_flat[:N, 0].reshape(lead_shape)

    mse = jnp.sum(err_rows[:N, 0]) / jnp.float32(N * D)
    # NOTE: forward value only — PyTorch's two detached loss terms collapse to
    # the same value in the forward pass; gradients through `diff` differ.
    diff = commitment_cost * mse + mse

    # straight-through estimator (same forward value as z_q)
    z_q = z_e + jax.lax.stop_gradient(z_q - z_e)
    return z_q, diff, embed_ind


if __name__ == "__main__":
    key = jax.random.PRNGKey(0)
    k1, k2 = jax.random.split(key)

    B, H, W, D = 2, 16, 16, 32     # embedding_dim = 32
    K = 256                        # codebook size

    z_e = jax.random.normal(k1, (B, H, W, D), dtype=jnp.float32)
    embed_weight = jax.random.normal(k2, (K, D), dtype=jnp.float32)

    z_q, diff, embed_ind = quantizer_forward(z_e, embed_weight)
    jax.block_until_ready((z_q, diff, embed_ind))

    # ---- correctness cross-check against the PyTorch math in plain JAX ----
    flat = z_e.reshape(-1, D)
    dist_ref = (jnp.sum(flat ** 2, axis=1, keepdims=True)
                - 2.0 * flat @ embed_weight.T
                + jnp.sum(embed_weight ** 2, axis=1, keepdims=True).T)
    ind_ref = jnp.argmin(dist_ref, axis=1)
    ind_k = embed_ind.reshape(-1)

    # 1) kernel-selected codes are (numerically) optimal nearest codes
    d_sel = jnp.take_along_axis(dist_ref, ind_k[:, None], axis=1)[:, 0]
    d_min = jnp.min(dist_ref, axis=1)
    assert float(jnp.max(d_sel - d_min)) <= 1e-3, "kernel picked a non-optimal code"

    # 2) z_q forward value equals codebook rows gathered at the kernel indices
    zq_expected = embed_weight[ind_k].reshape(z_e.shape)
    assert jnp.allclose(z_q, zq_expected, atol=1e-5, rtol=1e-5)

    # 3) loss matches the reference forward value
    zq_ref = embed_weight[ind_ref].reshape(z_e.shape)
    diff_ref = 1.25 * jnp.mean((zq_ref - z_e) ** 2)
    assert jnp.allclose(diff, diff_ref, atol=1e-4, rtol=1e-4)
    assert embed_ind.shape == (B, H, W)

    print("KERNEL_OK")
</pallas_src>

<mosaic_0001>
module attributes {stable_mosaic.version = 11 : i64} {
  func.func @kernel(%arg0: i32, %arg1: memref<512x32xf32, #tpu.memory_space<vmem>>, %arg2: memref<256x32xf32, #tpu.memory_space<vmem>>, %arg3: memref<1x256xf32, #tpu.memory_space<vmem>>, %arg4: memref<512x32xf32, #tpu.memory_space<vmem>>, %arg5: memref<512x1xi32, #tpu.memory_space<vmem>>, %arg6: memref<512x1xf32, #tpu.memory_space<vmem>>) attributes {dimension_semantics = [#tpu.dimension_semantics<parallel>], iteration_bounds = array<i64: 1>, scalar_prefetch = 0 : i64, scratch_operands = 0 : i64, tpu.core_type = #tpu.core_type<tc>, window_params = [{transform_indices = @transform_0, window_bounds = array<i64: 512, 32>}, {pipeline_mode = #tpu.pipeline_mode<synchronous>, transform_indices = @transform_1, window_bounds = array<i64: 256, 32>}, {pipeline_mode = #tpu.pipeline_mode<synchronous>, transform_indices = @transform_2, window_bounds = array<i64: 1, 256>}, {transform_indices = @transform_3, window_bounds = array<i64: 512, 32>}, {transform_indices = @transform_4, window_bounds = array<i64: 512, 1>}, {transform_indices = @transform_5, window_bounds = array<i64: 512, 1>}]} {
    %c0 = arith.constant 0 : index
    %c0_0 = arith.constant 0 : index
    %0 = vector.load %arg1[%c0, %c0_0] : memref<512x32xf32, #tpu.memory_space<vmem>>, vector<512x32xf32>
    %cst = arith.constant -2.000000e+00 : f32
    %1 = vector.broadcast %cst : f32 to vector<512x32xf32>
    %2 = arith.mulf %1, %0 : vector<512x32xf32>
    %c0_1 = arith.constant 0 : index
    %c0_2 = arith.constant 0 : index
    %3 = vector.load %arg2[%c0_1, %c0_2] : memref<256x32xf32, #tpu.memory_space<vmem>>, vector<256x32xf32>
    %c0_3 = arith.constant 0 : index
    %c0_4 = arith.constant 0 : index
    %4 = vector.load %arg3[%c0_3, %c0_4] : memref<1x256xf32, #tpu.memory_space<vmem>>, vector<1x256xf32>
    %5 = tpu.transpose %3, [1, 0] : vector<256x32xf32> -> vector<32x256xf32>
    %cst_5 = arith.constant dense<0.000000e+00> : vector<512x256xf32>
    %6 = tpu.matmul %2, %5, %cst_5 {dimension_numbers = #tpu.dot_dimension_numbers<[1], [0], [0], [1], [0, 0, 1, 1], [], []>} : vector<512x32xf32>, vector<32x256xf32>, vector<512x256xf32> -> vector<512x256xf32>
    %7 = vector.broadcast %4 : vector<1x256xf32> to vector<512x256xf32>
    %8 = arith.addf %7, %6 : vector<512x256xf32>
    %9 = tpu.iota {dimensions = array<i32: 1>} : vector<512x256xi32>
    %cst_6 = arith.constant dense<0x7F800000> : vector<512xf32>
    %10 = vector.multi_reduction <minimumf>, %8, %cst_6 [1] : vector<512x256xf32> to vector<512xf32>
    %11 = vector.shape_cast %10 : vector<512xf32> to vector<512x1xf32>
    %12 = vector.broadcast %11 : vector<512x1xf32> to vector<512x256xf32>
    %13 = arith.cmpf ole, %8, %12 : vector<512x256xf32>
    %c256_i32 = arith.constant 256 : i32
    %14 = vector.broadcast %c256_i32 : i32 to vector<512x256xi32>
    %15 = arith.select %13, %9, %14 : vector<512x256xi1>, vector<512x256xi32>
    %cst_7 = arith.constant dense<2147483647> : vector<512xi32>
    %16 = vector.multi_reduction <minsi>, %15, %cst_7 [1] : vector<512x256xi32> to vector<512xi32>
    %17 = vector.shape_cast %16 : vector<512xi32> to vector<512x1xi32>
    %18 = vector.broadcast %17 : vector<512x1xi32> to vector<512x256xi32>
    %19 = arith.cmpi eq, %9, %18 : vector<512x256xi32>
    %20 = arith.extui %19 : vector<512x256xi1> to vector<512x256xi32>
    %21 = arith.sitofp %20 : vector<512x256xi32> to vector<512x256xf32>
    %cst_8 = arith.constant dense<0.000000e+00> : vector<512x32xf32>
    %22 = tpu.matmul %21, %3, %cst_8 {dimension_numbers = #tpu.dot_dimension_numbers<[1], [0], [0], [1], [0, 0, 1, 1], [], []>} : vector<512x256xf32>, vector<256x32xf32>, vector<512x32xf32> -> vector<512x32xf32>
    %c0_9 = arith.constant 0 : index
    %c0_10 = arith.constant 0 : index
    %23 = vector.load %arg5[%c0_9, %c0_10] : memref<512x1xi32, #tpu.memory_space<vmem>>, vector<512x1xi32>
    tpu.vector_store %arg5[%c0_9, %c0_10], %17 {strides = array<i32>} : memref<512x1xi32, #tpu.memory_space<vmem>>, vector<512x1xi32>,
    %c0_11 = arith.constant 0 : index
    %c0_12 = arith.constant 0 : index
    %24 = vector.load %arg4[%c0_11, %c0_12] : memref<512x32xf32, #tpu.memory_space<vmem>>, vector<512x32xf32>
    tpu.vector_store %arg4[%c0_11, %c0_12], %22 {strides = array<i32>} : memref<512x32xf32, #tpu.memory_space<vmem>>, vector<512x32xf32>,
    %25 = arith.subf %22, %0 : vector<512x32xf32>
    %26 = arith.mulf %25, %25 : vector<512x32xf32>
    %cst_13 = arith.constant dense<0.000000e+00> : vector<512xf32>
    %27 = vector.multi_reduction <add>, %26, %cst_13 [1] : vector<512x32xf32> to vector<512xf32>
    %28 = vector.shape_cast %27 : vector<512xf32> to vector<512x1xf32>
    %c0_14 = arith.constant 0 : index
    %c0_15 = arith.constant 0 : index
    %29 = vector.load %arg6[%c0_14, %c0_15] : memref<512x1xf32, #tpu.memory_space<vmem>>, vector<512x1xf32>
    tpu.vector_store %arg6[%c0_14, %c0_15], %28 {strides = array<i32>} : memref<512x1xf32, #tpu.memory_space<vmem>>, vector<512x1xf32>,
    return
  }
  func.func @transform_0(%arg0: i32) -> (i32, i32) {
    %c0_i32 = arith.constant 0 : i32
    %c0_i32_0 = arith.constant 0 : i32
    return %arg0, %c0_i32 : i32, i32
  }
  func.func @transform_1(%arg0: i32) -> (i32, i32) {
    %c0_i32 = arith.constant 0 : i32
    %c0_i32_0 = arith.constant 0 : i32
    %c0_i32_1 = arith.constant 0 : i32
    return %c0_i32, %c0_i32_0 : i32, i32
  }
  func.func @transform_2(%arg0: i32) -> (i32, i32) {
    %c0_i32 = arith.constant 0 : i32
    %c0_i32_0 = arith.constant 0 : i32
    %c0_i32_1 = arith.constant 0 : i32
    return %c0_i32, %c0_i32_0 : i32, i32
  }
  func.func @transform_3(%arg0: i32) -> (i32, i32) {
    %c0_i32 = arith.constant 0 : i32
    %c0_i32_0 = arith.constant 0 : i32
    return %arg0, %c0_i32 : i32, i32
  }
  func.func @transform_4(%arg0: i32) -> (i32, i32) {
    %c0_i32 = arith.constant 0 : i32
    %c0_i32_0 = arith.constant 0 : i32
    return %arg0, %c0_i32 : i32, i32
  }
  func.func @transform_5(%arg0: i32) -> (i32, i32) {
    %c0_i32 = arith.constant 0 : i32
    %c0_i32_0 = arith.constant 0 : i32
    return %arg0, %c0_i32 : i32, i32
  }
}

</mosaic_0001>

<bundles_post_ra>
// kernel: tpu_custom_call.1
= control target key start
LH: loop header
LB: loop body
LE: loop exit
PB: predicated region body
PF: predicated region fallthrough
CT: control target
= control target key end

     0   :  { %vm178_vm0 = vcmask 261120   ;;  %s8056_s1 = inlined_call_operand.vmem [shape: f32[256,32], index: 1, kind: input, shape index: {}]   ;;  %s8057_s0 = inlined_call_operand.vmem [shape: f32[512,32], index: 0, kind: input, shape index: {}]   ;;  %s8058_s2 = inlined_call_operand.vmem [shape: f32[1,256], index: 2, kind: input, shape index: {}]   ;;  %s8059_s4 = inlined_call_operand.vmem [shape: s32[512,1], index: 4, kind: output, shape index: {1}]   ;;  %s8060_s3 = inlined_call_operand.vmem [shape: f32[512,32], index: 3, kind: output, shape index: {0}]   ;;  %s8061_s5 = inlined_call_operand.vmem [shape: f32[512,1], index: 5, kind: output, shape index: {2}]  }
   0x1   :  { %v160_v0 = vld [vmem:[%s8056_s1 + $0x78] sm:$0xff]  ;;  %v159_v2 = vld [vmem:[%s8056_s1 + $0x70] sm:$0xff]  ;;  %v158_v4 = vld [vmem:[%s8056_s1 + $0x68] sm:$0xff] }
   0x2   :  { %v176_v1 = vld [vmem:[%s8056_s1 + $0xf8] sm:$0xff]  ;;  %3820 = vmatpush.xpose.msk.msra.mxu0 %vm178_vm0, %v160_v0  ;;  %v175_v3 = vld [vmem:[%s8056_s1 + $0xf0] sm:$0xff]  ;;  %2877 = vmatpush.msra.mxu2 %v160_v0  ;;  %v174_v5 = vld [vmem:[%s8056_s1 + $0xe8] sm:$0xff] }
   0x3   :  { %3900 = vmatpush.xpose.msk.msra.mxu1 %vm178_vm0, %v176_v1  ;;  %3086 = vmatpush.msra.mxu3 %v176_v1  ;;  %v157_v6 = vld [vmem:[%s8056_s1 + $0x60] sm:$0xff]  ;;  %v156_v8 = vld [vmem:[%s8056_s1 + $0x58] sm:$0xff]  ;;  %v155_v10 = vld [vmem:[%s8056_s1 + $0x50] sm:$0xff] }
   0x4   :  { %2878 = vmatpush.msra.mxu2 %v159_v2  ;;  %v173_v7 = vld [vmem:[%s8056_s1 + $0xe0] sm:$0xff]  ;;  %v172_v9 = vld [vmem:[%s8056_s1 + $0xd8] sm:$0xff]  ;;  %v171_v11 = vld [vmem:[%s8056_s1 + $0xd0] sm:$0xff] }
   0x5   :  { %3087 = vmatpush.msra.mxu3 %v175_v3  ;;  %v154_v12 = vld [vmem:[%s8056_s1 + $0x48] sm:$0xff]  ;;  %v153_v14 = vld [vmem:[%s8056_s1 + $0x40] sm:$0xff]  ;;  %v152_v16 = vld [vmem:[%s8056_s1 + $0x38] sm:$0xff] }
   0x6   :  { %3821 = vmatpush.xpose.msk.msra.mxu0 %vm178_vm0, %v159_v2  ;;  %2879 = vmatpush.msra.mxu2 %v158_v4  ;;  %v170_v13 = vld [vmem:[%s8056_s1 + $0xc8] sm:$0xff]  ;;  %v169_v15 = vld [vmem:[%s8056_s1 + $0xc0] sm:$0xff]  ;;  %v168_v17 = vld [vmem:[%s8056_s1 + $0xb8] sm:$0xff] }
   0x7   :  { %3901 = vmatpush.xpose.msk.msra.mxu1 %vm178_vm0, %v175_v3  ;;  %3088 = vmatpush.msra.mxu3 %v174_v5  ;;  %v151_v18 = vld [vmem:[%s8056_s1 + $0x30] sm:$0xff]  ;;  %v150_v20 = vld [vmem:[%s8056_s1 + $0x28] sm:$0xff]  ;;  %v149_v22 = vld [vmem:[%s8056_s1 + $0x20] sm:$0xff] }
   0x8   :  { %2880 = vmatpush.msra.mxu2 %v157_v6  ;;  %v167_v19 = vld [vmem:[%s8056_s1 + $0xb0] sm:$0xff]  ;;  %v166_v21 = vld [vmem:[%s8056_s1 + $0xa8] sm:$0xff]  ;;  %v165_v23 = vld [vmem:[%s8056_s1 + $0xa0] sm:$0xff] }
   0x9   :  { %3089 = vmatpush.msra.mxu3 %v173_v7  ;;  %v148_v24 = vld [vmem:[%s8056_s1 + $0x18] sm:$0xff]  ;;  %v147_v26 = vld [vmem:[%s8056_s1 + $0x10] sm:$0xff]  ;;  %v146_v28 = vld [vmem:[%s8056_s1 + $0x8] sm:$0xff] }
   0xa   :  { %3822 = vmatpush.xpose.msk.msra.mxu0 %vm178_vm0, %v158_v4  ;;  %2881 = vmatpush.msra.mxu2 %v156_v8  ;;  %v164_v25 = vld [vmem:[%s8056_s1 + $0x98] sm:$0xff]  ;;  %v163_v27 = vld [vmem:[%s8056_s1 + $0x90] sm:$0xff]  ;;  %v162_v29 = vld [vmem:[%s8056_s1 + $0x88] sm:$0xff] }
   0xb   :  { %3902 = vmatpush.xpose.msk.msra.mxu1 %vm178_vm0, %v174_v5  ;;  %3090 = vmatpush.msra.mxu3 %v172_v9  ;;  %v145_v30 = vld [vmem:[%s8056_s1] sm:$0xff]  ;;  %v18_v34 = vld [vmem:[%s8057_s0 + $0x8] sm:$0xff]  ;;  %v19_v36 = vld [vmem:[%s8057_s0 + $0x10] sm:$0xff] }
   0xc   :  { %2882 = vmatpush.msra.mxu2 %v155_v10  ;;  %v161_v31 = vld [vmem:[%s8056_s1 + $0x80] sm:$0xff]  ;;  %v82_v35 = vmul.f32 -2.0, %v18_v34  ;;  %v83_v37 = vmul.f32 -2.0, %v19_v36  ;;  %v20_v38 = vld [vmem:[%s8057_s0 + $0x18] sm:$0xff]  ;;  %v22_v42 = vld [vmem:[%s8057_s0 + $0x28] sm:$0xff] }
   0xd   :  { %3091 = vmatpush.msra.mxu3 %v171_v11  ;;  %v17_v32 = vld [vmem:[%s8057_s0] sm:$0xff]  ;;  %v84_v39 = vmul.f32 -2.0, %v20_v38  ;;  %v86_v43 = vmul.f32 -2.0, %v22_v42  ;;  %v23_v44 = vld [vmem:[%s8057_s0 + $0x30] sm:$0xff]  ;;  %v24_v46 = vld [vmem:[%s8057_s0 + $0x38] sm:$0xff] }
   0xe   :  { %3823 = vmatpush.xpose.msk.msra.mxu0 %vm178_vm0, %v157_v6  ;;  %2883 = vmatpush.msra.mxu2 %v154_v12  ;;  %v81_v33 = vmul.f32 -2.0, %v17_v32  ;;  %v21_v40 = vld [vmem:[%s8057_s0 + $0x20] sm:$0xff]  ;;  %v87_v45 = vmul.f32 -2.0, %v23_v44  ;;  %v88_v47 = vmul.f32 -2.0, %v24_v46  ;;  %v26_v50 = vld [vmem:[%s8057_s0 + $0x48] sm:$0xff]  ;;  %v27_v52 = vld [vmem:[%s8057_s0 + $0x50] sm:$0xff] }
   0xf   :  { %3903 = vmatpush.xpose.msk.msra.mxu1 %vm178_vm0, %v173_v7  ;;  %3092 = vmatpush.msra.mxu3 %v170_v13  ;;  %v85_v41 = vmul.f32 -2.0, %v21_v40  ;;  %v25_v48 = vld [vmem:[%s8057_s0 + $0x40] sm:$0xff]  ;;  %v90_v51 = vmul.f32 -2.0, %v26_v50  ;;  %v91_v53 = vmul.f32 -2.0, %v27_v52  ;;  %v28_v55 = vld [vmem:[%s8057_s0 + $0x58] sm:$0xff]  ;;  %v30_v7 = vld [vmem:[%s8057_s0 + $0x68] sm:$0xff] }
  0x10   :  { %2884 = vmatpush.msra.mxu2 %v153_v14  ;;  %v89_v49 = vmul.f32 -2.0, %v25_v48  ;;  %v177_v54 = vld [vmem:[%s8058_s2] sm:$0x3]  ;;  %v92_v58 = vmul.f32 -2.0, %v28_v55  ;;  %v34_v32 = vld [vmem:[%s8057_s0 + $0x88] sm:$0xff]  ;;  %v36_v46 = vld [vmem:[%s8057_s0 + $0x98] sm:$0xff] }
  0x11   :  { %3093 = vmatpush.msra.mxu3 %v169_v15  ;;  %v4521_v56 = vperm.slane %v177_v54, 0  ;;  %v4523_v57 = vperm.slane %v177_v54, 1  ;;  %v29_v0 = vld [vmem:[%s8057_s0 + $0x60] sm:$0xff]  ;;  %v98_v36 = vmul.f32 -2.0, %v34_v32  ;;  %v100_v50 = vmul.f32 -2.0, %v36_v46  ;;  %v39_v55 = vld [vmem:[%s8057_s0 + $0xb0] sm:$0xff] }
  0x12   :  { %3824 = vmatpush.xpose.msk.msra.mxu0 %vm178_vm0, %v156_v8  ;;  %2885 = vmatpush.msra.mxu2 %v152_v16  ;;  %v93_v1 = vmul.f32 -2.0, %v29_v0  ;;  %v94_v8 = vmul.f32 -2.0, %v30_v7 }
  0x13   :  { %3904 = vmatpush.xpose.msk.msra.mxu1 %vm178_vm0, %v172_v9  ;;  %3094 = vmatpush.msra.mxu3 %v168_v17 }
  0x14   :  { %2886 = vmatpush.msra.mxu2 %v151_v18 }
  0x15   :  { %3095 = vmatpush.msra.mxu3 %v167_v19 }
  0x16   :  { %3825 = vmatpush.xpose.msk.msra.mxu0 %vm178_vm0, %v155_v10  ;;  %2887 = vmatpush.msra.mxu2 %v150_v20 }
  0x17   :  { %3905 = vmatpush.xpose.msk.msra.mxu1 %vm178_vm0, %v171_v11  ;;  %3096 = vmatpush.msra.mxu3 %v166_v21 }
  0x18   :  { %2888 = vmatpush.msra.mxu2 %v149_v22 }
  0x19   :  { %3097 = vmatpush.msra.mxu3 %v165_v23 }
  0x1a   :  { %3826 = vmatpush.xpose.msk.msra.mxu0 %vm178_vm0, %v154_v12  ;;  %2889 = vmatpush.msra.mxu2 %v148_v24 }
  0x1b   :  { %3906 = vmatpush.xpose.msk.msra.mxu1 %vm178_vm0, %v170_v13  ;;  %3098 = vmatpush.msra.mxu3 %v164_v25 }
  0x1c   :  { %2890 = vmatpush.msra.mxu2 %v147_v26 }
  0x1d   :  { %3099 = vmatpush.msra.mxu3 %v163_v27 }
  0x1e   :  { %3827 = vmatpush.xpose.msk.msra.mxu0 %vm178_vm0, %v153_v14  ;;  %2891 = vmatpush.msra.mxu2 %v146_v28  ;;  %v31_v14 = vld [vmem:[%s8057_s0 + $0x70] sm:$0xff] }
  0x1f   :  { %3907 = vmatpush.xpose.msk.msra.mxu1 %vm178_vm0, %v169_v15  ;;  %3100 = vmatpush.msra.mxu3 %v162_v29  ;;  %v95_v15 = vmul.f32 -2.0, %v31_v14 }
  0x20   :  { %2892 = vmatpush.msra.mxu2 %v145_v30 }
  0x21   :  { %3101 = vmatpush.msra.mxu3 %v161_v31 }
  0x22   :  { %3828 = vmatpush.xpose.msk.msra.mxu0 %vm178_vm0, %v152_v16 }
  0x23   :  { %3908 = vmatpush.xpose.msk.msra.mxu1 %vm178_vm0, %v168_v17 }
  0x26   :  { %3829 = vmatpush.xpose.msk.msra.mxu0 %vm178_vm0, %v151_v18 }
  0x27   :  { %3909 = vmatpush.xpose.msk.msra.mxu1 %vm178_vm0, %v167_v19 }
  0x2a   :  { %3830 = vmatpush.xpose.msk.msra.mxu0 %vm178_vm0, %v150_v20 }
  0x2b   :  { %3910 = vmatpush.xpose.msk.msra.mxu1 %vm178_vm0, %v166_v21  ;;  %v32_v21 = vld [vmem:[%s8057_s0 + $0x78] sm:$0xff] }
  0x2e   :  { %3831 = vmatpush.xpose.msk.msra.mxu0 %vm178_vm0, %v149_v22  ;;  %v96_v22 = vmul.f32 -2.0, %v32_v21 }
  0x2f   :  { %3911 = vmatpush.xpose.msk.msra.mxu1 %vm178_vm0, %v165_v23 }
  0x32   :  { %3832 = vmatpush.xpose.msk.msra.mxu0 %vm178_vm0, %v148_v24 }
  0x33   :  { %3912 = vmatpush.xpose.msk.msra.mxu1 %vm178_vm0, %v164_v25  ;;  %v33_v25 = vld [vmem:[%s8057_s0 + $0x80] sm:$0xff] }
  0x36   :  { %3833 = vmatpush.xpose.msk.msra.mxu0 %vm178_vm0, %v147_v26 }
  0x37   :  { %3913 = vmatpush.xpose.msk.msra.mxu1 %vm178_vm0, %v163_v27 }
  0x3a   :  { %3834 = vmatpush.xpose.msk.msra.mxu0 %vm178_vm0, %v146_v28 }
  0x3b   :  { %3914 = vmatpush.xpose.msk.msra.mxu1 %vm178_vm0, %v162_v29  ;;  %v97_v29 = vmul.f32 -2.0, %v33_v25 }
  0x3e   :  { %3835 = vmatpush.xpose.msk.msra.mxu0 %vm178_vm0, %v145_v30 }
  0x3f   :  { %3915 = vmatpush.xpose.msk.msra.mxu1 %vm178_vm0, %v161_v31 }
  0x41   :  { %3836 = vmatmul.msk.f32.vlgmr.msra.gmra.mxu0 %vm178_vm0, %v81_v33 }
  0x42   :  { %3916 = vmatmul.msk.f32.vlgmr.msra.gmra.mxu1 %vm178_vm0, %v81_v33 }
  0x49   :  { %3837 = vmatmul.msk.f32.gmra.mxu0 %vm178_vm0, %v82_v35 }
  0x4a   :  { %3917 = vmatmul.msk.f32.gmra.mxu1 %vm178_vm0, %v82_v35 }
  0x51   :  { %3838 = vmatmul.msk.f32.gmra.mxu0 %vm178_vm0, %v83_v37 }
  0x52   :  { %3918 = vmatmul.msk.f32.gmra.mxu1 %vm178_vm0, %v83_v37 }
  0x59   :  { %3839 = vmatmul.msk.f32.gmra.mxu0 %vm178_vm0, %v84_v39 }
  0x5a   :  { %3919 = vmatmul.msk.f32.gmra.mxu1 %vm178_vm0, %v84_v39  ;;  %v35_v39 = vld [vmem:[%s8057_s0 + $0x90] sm:$0xff] }
  0x61   :  { %3840 = vmatmul.msk.f32.gmra.mxu0 %vm178_vm0, %v85_v41 }
  0x62   :  { %3920 = vmatmul.msk.f32.gmra.mxu1 %vm178_vm0, %v85_v41 }
  0x69   :  { %3841 = vmatmul.msk.f32.gmra.mxu0 %vm178_vm0, %v86_v43 }
  0x6a   :  { %3921 = vmatmul.msk.f32.gmra.mxu1 %vm178_vm0, %v86_v43  ;;  %v99_v43 = vmul.f32 -2.0, %v35_v39 }
  0x71   :  { %3842 = vmatmul.msk.f32.gmra.mxu0 %vm178_vm0, %v87_v45 }
  0x72   :  { %3922 = vmatmul.msk.f32.gmra.mxu1 %vm178_vm0, %v87_v45 }
  0x79   :  { %3843 = vmatmul.msk.f32.gmra.mxu0 %vm178_vm0, %v88_v47 }
  0x7a   :  { %3923 = vmatmul.msk.f32.gmra.mxu1 %vm178_vm0, %v88_v47 }
  0x81   :  { %3844 = vmatmul.msk.f32.gmra.mxu0 %vm178_vm0, %v89_v49 }
  0x82   :  { %3924 = vmatmul.msk.f32.gmra.mxu1 %vm178_vm0, %v89_v49 }
  0x89   :  { %3845 = vmatmul.msk.f32.gmra.mxu0 %vm178_vm0, %v90_v51 }
  0x8a   :  { %3925 = vmatmul.msk.f32.gmra.mxu1 %vm178_vm0, %v90_v51  ;;  %v37_v51 = vld [vmem:[%s8057_s0 + $0xa0] sm:$0xff] }
  0x8b   :  { %v101_v52 = vmul.f32 -2.0, %v37_v51 }
  0x91   :  { %3846 = vmatmul.msk.f32.gmra.mxu0 %vm178_vm0, %v91_v53 }
  0x92   :  { %3926 = vmatmul.msk.f32.gmra.mxu1 %vm178_vm0, %v91_v53  ;;  %v38_v53 = vld [vmem:[%s8057_s0 + $0xa8] sm:$0xff] }
  0x93   :  { %v102_v54 = vmul.f32 -2.0, %v38_v53 }
  0x99   :  { %3847 = vmatmul.msk.f32.gmra.mxu0 %vm178_vm0, %v92_v58 }
  0x9a   :  { %3927 = vmatmul.msk.f32.gmra.mxu1 %vm178_vm0, %v92_v58  ;;  %v103_v58 = vmul.f32 -2.0, %v39_v55 }
  0xa1   :  { %3848 = vmatmul.msk.f32.gmra.mxu0 %vm178_vm0, %v93_v1 }
  0xa2   :  { %3928 = vmatmul.msk.f32.gmra.mxu1 %vm178_vm0, %v93_v1 }
  0xa9   :  { %3849 = vmatmul.msk.f32.gmra.mxu0 %vm178_vm0, %v94_v8 }
  0xaa   :  { %3929 = vmatmul.msk.f32.gmra.mxu1 %vm178_vm0, %v94_v8 }
  0xb1   :  { %3850 = vmatmul.msk.f32.gmra.mxu0 %vm178_vm0, %v95_v15 }
  0xb2   :  { %3930 = vmatmul.msk.f32.gmra.mxu1 %vm178_vm0, %v95_v15 }
  0xb9   :  { %3851 = vmatmul.msk.f32.gmra.mxu0 %vm178_vm0, %v96_v22 }
  0xba   :  { %3931 = vmatmul.msk.f32.gmra.mxu1 %vm178_vm0, %v96_v22 }
  0xbe   :  { %v484_v59 = vpop.f32.mrf.mxu0 }
  0xbf   :  { %v693_v60 = vpop.f32.mrf.mxu1  ;;  %v4528_v61 = vadd.f32 %v4521_v56, %v484_v59  ;;  %v40_v59 = vld [vmem:[%s8057_s0 + $0xb8] sm:$0xff] }
  0xc0   :  { %v4531_v62 = vadd.f32 %v4523_v57, %v693_v60  ;;  %v104_v60 = vmul.f32 -2.0, %v40_v59 }
  0xc1   :  { %3852 = vmatmul.msk.f32.gmra.mxu0 %vm178_vm0, %v97_v29 }
  0xc2   :  { %v1021_v63 = vmin.f32 %v4528_v61, %v4531_v62  ;;  %3932 = vmatmul.msk.f32.gmra.mxu1 %vm178_vm0, %v97_v29 }
  0xc4   :  { %1022 = vmin.xlane.f32.xlu0 %v1021_v63  ;;  %v41_v63 = vld [vmem:[%s8057_s0 + $0xc0] sm:$0xff] }
  0xc5   :  { %v105_v0 = vmul.f32 -2.0, %v41_v63 }
  0xc6   :  { %v487_v2 = vpop.f32.mrf.mxu0 }
  0xc7   :  { %v696_v3 = vpop.f32.mrf.mxu1  ;;  %v4541_v4 = vadd.f32 %v4521_v56, %v487_v2 }
  0xc8   :  { %v4544_v5 = vadd.f32 %v4523_v57, %v696_v3  ;;  %v42_v3 = vld [vmem:[%s8057_s0 + $0xc8] sm:$0xff] }
  0xc9   :  { %3853 = vmatmul.msk.f32.gmra.mxu0 %vm178_vm0, %v98_v36 }
  0xca   :  { %v1024_v6 = vmin.f32 %v4541_v4, %v4544_v5  ;;  %3933 = vmatmul.msk.f32.gmra.mxu1 %vm178_vm0, %v98_v36 }
  0xcc   :  { %1025 = vmin.xlane.f32.xlu0 %v1024_v6  ;;  %v106_v6 = vmul.f32 -2.0, %v42_v3  ;;  %v47_v3 = vld [vmem:[%s8057_s0 + $0xf0] sm:$0xff] }
  0xce   :  { %v490_v9 = vpop.f32.mrf.mxu0 }
  0xcf   :  { %v699_v10 = vpop.f32.mrf.mxu1  ;;  %v4554_v11 = vadd.f32 %v4521_v56, %v490_v9  ;;  %v1018_v9 = vlaneseq }
  0xd0   :  { %v4557_v12 = vadd.f32 %v4523_v57, %v699_v10 }
  0xd1   :  { %3854 = vmatmul.msk.f32.gmra.mxu0 %vm178_vm0, %v99_v43  ;;  %v4661_v10 = vand.u32 127, %v1018_v9 }
  0xd2   :  { %v1027_v13 = vmin.f32 %v4554_v11, %v4557_v12  ;;  %3934 = vmatmul.msk.f32.gmra.mxu1 %vm178_vm0, %v99_v43 }
  0xd4   :  { %1028 = vmin.xlane.f32.xlu1 %v1027_v13  ;;  %v43_v13 = vld [vmem:[%s8057_s0 + $0xd0] sm:$0xff] }
  0xd5   :  { %v107_v14 = vmul.f32 -2.0, %v43_v13 }
  0xd6   :  { %v493_v16 = vpop.f32.mrf.mxu0 }
  0xd7   :  { %v702_v17 = vpop.f32.mrf.mxu1  ;;  %v4567_v18 = vadd.f32 %v4521_v56, %v493_v16 }
  0xd8   :  { %v4570_v19 = vadd.f32 %v4523_v57, %v702_v17  ;;  %v4669_v17 = vadd.s32 128, %v4661_v10 }
  0xd9   :  { %3855 = vmatmul.msk.f32.gmra.mxu0 %vm178_vm0, %v100_v50 }
  0xda   :  { %v1030_v20 = vmin.f32 %v4567_v18, %v4570_v19  ;;  %3935 = vmatmul.msk.f32.gmra.mxu1 %vm178_vm0, %v100_v50 }
  0xdc   :  { %1031 = vmin.xlane.f32.xlu1 %v1030_v20 }
  0xde   :  { %v496_v23 = vpop.f32.mrf.mxu0 }
  0xdf   :  { %v705_v24 = vpop.f32.mrf.mxu1  ;;  %v4583_v26 = vadd.f32 %v4521_v56, %v496_v23  ;;  %v44_v23 = vld [vmem:[%s8057_s0 + $0xd8] sm:$0xff] }
  0xe0   :  { %v4586_v27 = vadd.f32 %v4523_v57, %v705_v24  ;;  %v108_v24 = vmul.f32 -2.0, %v44_v23 }
  0xe1   :  { %3856 = vmatmul.msk.f32.gmra.mxu0 %vm178_vm0, %v101_v52 }
  0xe2   :  { %v1033_v28 = vmin.f32 %v4583_v26, %v4586_v27  ;;  %3936 = vmatmul.msk.f32.gmra.mxu1 %vm178_vm0, %v101_v52  ;;  %v46_v52 = vld [vmem:[%s8057_s0 + $0xe8] sm:$0xff] }
  0xe3   :  { %v110_v53 = vmul.f32 -2.0, %v46_v52 }
  0xe4   :  { %1034 = vmin.xlane.f32.xlu2 %v1033_v28 }
  0xe6   :  { %v499_v30 = vpop.f32.mrf.mxu0 }
  0xe7   :  { %v708_v31 = vpop.f32.mrf.mxu1  ;;  %v4596_v33 = vadd.f32 %v4521_v56, %v499_v30 }
  0xe8   :  { %v4599_v34 = vadd.f32 %v4523_v57, %v708_v31 }
  0xe9   :  { %3857 = vmatmul.msk.f32.gmra.mxu0 %vm178_vm0, %v102_v54 }
  0xea   :  { %v1036_v35 = vmin.f32 %v4596_v33, %v4599_v34  ;;  %3937 = vmatmul.msk.f32.gmra.mxu1 %vm178_vm0, %v102_v54 }
  0xec   :  { %1037 = vmin.xlane.f32.xlu2 %v1036_v35 }
  0xee   :  { %v502_v37 = vpop.f32.mrf.mxu0 }
  0xef   :  { %v711_v38 = vpop.f32.mrf.mxu1  ;;  %v4609_v40 = vadd.f32 %v4521_v56, %v502_v37  ;;  %v45_v37 = vld [vmem:[%s8057_s0 + $0xe0] sm:$0xff] }
  0xf0   :  { %v4612_v41 = vadd.f32 %v4523_v57, %v711_v38 }
  0xf1   :  { %3858 = vmatmul.msk.f32.gmra.mxu0 %vm178_vm0, %v103_v58 }
  0xf2   :  { %v1039_v42 = vmin.f32 %v4609_v40, %v4612_v41  ;;  %3938 = vmatmul.msk.f32.gmra.mxu1 %vm178_vm0, %v103_v58 }
  0xf4   :  { %1040 = vmin.xlane.f32.xlu0 %v1039_v42 }
  0xf6   :  { %v505_v44 = vpop.f32.mrf.mxu0 }
  0xf7   :  { %v714_v45 = vpop.f32.mrf.mxu1  ;;  %v4622_v47 = vadd.f32 %v4521_v56, %v505_v44 }
  0xf8   :  { %v4625_v48 = vadd.f32 %v4523_v57, %v714_v45 }
  0xf9   :  { %3859 = vmatmul.msk.f32.gmra.mxu0 %vm178_vm0, %v104_v60 }
  0xfa   :  { %v1042_v49 = vmin.f32 %v4622_v47, %v4625_v48  ;;  %3939 = vmatmul.msk.f32.gmra.mxu1 %vm178_vm0, %v104_v60 }
  0xfc   :  { %1043 = vmin.xlane.f32.xlu2 %v1042_v49 }
  0xfe   :  { %v508_v1 = vpop.f32.mrf.mxu0 }
  0xff   :  { %v717_v2 = vpop.f32.mrf.mxu1  ;;  %v4695_v31 = vadd.f32 %v4521_v56, %v508_v1 }
 0x100   :  { %v4698_v32 = vadd.f32 %v4523_v57, %v717_v2 }
 0x101   :  { %3860 = vmatmul.msk.f32.gmra.mxu0 %vm178_vm0, %v105_v0 }
 0x102   :  { %3940 = vmatmul.msk.f32.gmra.mxu1 %vm178_vm0, %v105_v0  ;;  %v1045_v43 = vmin.f32 %v4695_v31, %v4698_v32 }
 0x106   :  { %v511_v7 = vpop.f32.mrf.mxu0 }
 0x107   :  { %v720_v8 = vpop.f32.mrf.mxu1  ;;  %v4719_v46 = vadd.f32 %v4521_v56, %v511_v7 }
 0x108   :  { %v4725_v49 = vadd.f32 %v4523_v57, %v720_v8 }
 0x109   :  { %3861 = vmatmul.msk.f32.gmra.mxu0 %vm178_vm0, %v106_v6 }
 0x10a   :  { %3941 = vmatmul.msk.f32.gmra.mxu1 %vm178_vm0, %v106_v6  ;;  %v1048_v58 = vmin.f32 %v4719_v46, %v4725_v49  ;;  %v111_v6 = vmul.f32 -2.0, %v47_v3 }
 0x10e   :  { %v514_v15 = vpop.f32.mrf.mxu0 }
 0x10f   :  { %v4666_v16 = vpop.f32.mrf.mxu1  ;;  %v4746_v63 = vadd.f32 %v4521_v56, %v514_v15 }
 0x110   :  { %v4753_v0 = vadd.f32 %v4523_v57, %v4666_v16 }
 0x111   :  { %3862 = vmatmul.msk.f32.gmra.mxu0 %vm178_vm0, %v107_v14 }
 0x112   :  { %3942 = vmatmul.msk.f32.gmra.mxu1 %vm178_vm0, %v107_v14  ;;  %v1051_v9 = vmin.f32 %v4746_v63, %v4753_v0 }
 0x116   :  { %v4682_v28 = vpop.f32.mrf.mxu0 }
 0x117   :  { %v4684_v29 = vpop.f32.mrf.mxu1  ;;  %v4775_v15 = vadd.f32 %v4521_v56, %v4682_v28 }
 0x118   :  { %v4782_v16 = vadd.f32 %v4523_v57, %v4684_v29 }
 0x119   :  { %3863 = vmatmul.msk.f32.gmra.mxu0 %vm178_vm0, %v108_v24 }
 0x11a   :  { %3943 = vmatmul.msk.f32.gmra.mxu1 %vm178_vm0, %v108_v24  ;;  %v1054_v29 = vmin.f32 %v4775_v15, %v4782_v16 }
 0x11f   :  { %v4709_v39 = vpop.f32.mrf.mxu1 }
 0x137   :  { %v1023_v20 = vpop.xlane.xlu0 %1022 }
 0x138   :  { %vm1213_vm1 = vcmp.le.f32.partialorder %v4528_v61, %v1023_v20  ;;  %vm1214_vm2 = vcmp.le.f32.partialorder %v4531_v62, %v1023_v20  ;;  %v48_v20 = vld [vmem:[%s8057_s0 + $0xf8] sm:$0xff] }
 0x139   :  { %v1341_v21 = vsel %vm1213_vm1, %v4661_v10, 256  ;;  %v1342_v22 = vsel %vm1214_vm2, %v4669_v17, 256  ;;  %v112_v23 = vmul.f32 -2.0, %v48_v20 }
 0x13a   :  { %vm1469_vm3 = vcmp.lt.s32.totalorder %v1341_v21, %v1342_v22 }
 0x13b   :  { %v4680_v25 = vsel %vm1469_vm3, %v1341_v21, %v1342_v22 }
 0x13c   :  { %v1472_v61 = vshra.s32 %v4680_v25, 16 }
 0x13e   :  { %v4687_v30 = vcvt.s32.f32 %v1472_v61 }
 0x13f   :  { %v1026_v62 = vpop.xlane.xlu0 %1025 }
 0x140   :  { %vm1215_vm4 = vcmp.le.f32.partialorder %v4541_v4, %v1026_v62  ;;  %vm1216_vm5 = vcmp.le.f32.partialorder %v4544_v5, %v1026_v62  ;;  %1475 = vmin.xlane.f32.xlu1 %v4687_v30  ;;  %v109_v4 = vmul.f32 -2.0, %v45_v37  ;;  %v4707_v5 = vpop.f32.mrf.mxu0  ;;  %v49_v37 = vld [vmem:[%s8057_s0 + $0x100] sm:$0xff] }
 0x141   :  { %v1343_v35 = vsel %vm1215_vm4, %v4661_v10, 256  ;;  %v1344_v36 = vsel %vm1216_vm5, %v4669_v17, 256 }
 0x142   :  { %vm1485_vm6 = vcmp.lt.s32.totalorder %v1343_v35, %v1344_v36  ;;  %3864 = vmatmul.msk.f32.gmra.mxu0 %vm178_vm0, %v109_v4  ;;  %3944 = vmatmul.msk.f32.gmra.mxu1 %vm178_vm0, %v109_v4 }
 0x143   :  { %v4705_v38 = vsel %vm1485_vm6, %v1343_v35, %v1344_v36  ;;  %v4804_v35 = vadd.f32 %v4521_v56, %v4707_v5  ;;  %v4811_v36 = vadd.f32 %v4523_v57, %v4709_v39 }
 0x144   :  { %v1488_v42 = vshra.s32 %v4705_v38, 16 }
 0x145   :  { %v1057_v39 = vmin.f32 %v4804_v35, %v4811_v36 }
 0x146   :  { %v4714_v44 = vcvt.s32.f32 %v1488_v42  ;;  %v113_v42 = vmul.f32 -2.0, %v49_v37  ;;  %v52_v37 = vld [vmem:[%s8057_s0 + $0x118] sm:$0xff] }
 0x147   :  { %v1029_v45 = vpop.xlane.xlu1 %1028 }
 0x148   :  { %vm1217_vm7 = vcmp.le.f32.partialorder %v4554_v11, %v1029_v45  ;;  %vm1218_vm8 = vcmp.le.f32.partialorder %v4557_v12, %v1029_v45  ;;  %1491 = vmin.xlane.f32.xlu0 %v4714_v44  ;;  %1046 = vmin.xlane.f32.xlu1 %v1045_v43  ;;  %v4734_v11 = vpop.f32.mrf.mxu0  ;;  %v4736_v12 = vpop.f32.mrf.mxu1 }
 0x149   :  { %v1345_v50 = vsel %vm1217_vm7, %v4661_v10, 256  ;;  %v1346_v51 = vsel %vm1218_vm8, %v4669_v17, 256  ;;  %v4829_v52 = vadd.f32 %v4521_v56, %v4734_v11 }
 0x14a   :  { %vm1501_vm9 = vcmp.lt.s32.totalorder %v1345_v50, %v1346_v51  ;;  %3865 = vmatmul.msk.f32.gmra.mxu0 %vm178_vm0, %v110_v53  ;;  %3945 = vmatmul.msk.f32.gmra.mxu1 %vm178_vm0, %v110_v53  ;;  %v4836_v53 = vadd.f32 %v4523_v57, %v4736_v12 }
 0x14b   :  { %v4732_v54 = vsel %vm1501_vm9, %v1345_v50, %v1346_v51 }
 0x14c   :  { %v1504_v55 = vshra.s32 %v4732_v54, 16  ;;  %v1060_v12 = vmin.f32 %v4829_v52, %v4836_v53 }
 0x14e   :  { %v4741_v59 = vcvt.s32.f32 %v1504_v55  ;;  %v50_v55 = vld [vmem:[%s8057_s0 + $0x108] sm:$0xff] }
 0x14f   :  { %v1032_v60 = vpop.xlane.xlu1 %1031 }
 0x150   :  { %vm1219_vm10 = vcmp.le.f32.partialorder %v4567_v18, %v1032_v60  ;;  %vm1220_vm11 = vcmp.le.f32.partialorder %v4570_v19, %v1032_v60  ;;  %1507 = vmin.xlane.f32.xlu2 %v4741_v59  ;;  %1049 = vmin.xlane.f32.xlu0 %v1048_v58  ;;  %v4762_v19 = vpop.f32.mrf.mxu0  ;;  %v4764_v7 = vpop.f32.mrf.mxu1  ;;  %v114_v60 = vmul.f32 -2.0, %v50_v55 }
 0x151   :  { %v1347_v1 = vsel %vm1219_vm10, %v4661_v10, 256  ;;  %v1348_v2 = vsel %vm1220_vm11, %v4669_v17, 256 }
 0x152   :  { %vm1517_vm12 = vcmp.lt.s32.totalorder %v1347_v1, %v1348_v2  ;;  %3866 = vmatmul.msk.f32.gmra.mxu0 %vm178_vm0, %v111_v6  ;;  %3946 = vmatmul.msk.f32.gmra.mxu1 %vm178_vm0, %v111_v6 }
 0x153   :  { %v4760_v18 = vsel %vm1517_vm12, %v1347_v1, %v1348_v2 }
 0x154   :  { %v1520_v8 = vshra.s32 %v4760_v18, 16 }
 0x156   :  { %v4769_v13 = vcvt.s32.f32 %v1520_v8  ;;  %v4854_v8 = vadd.f32 %v4521_v56, %v4762_v19 }
 0x157   :  { %v1035_v14 = vpop.xlane.xlu2 %1034 }
 0x158   :  { %vm1221_vm13 = vcmp.le.f32.partialorder %v4583_v26, %v1035_v14  ;;  %vm1222_vm14 = vcmp.le.f32.partialorder %v4586_v27, %v1035_v14  ;;  %1523 = vmin.xlane.f32.xlu1 %v4769_v13  ;;  %1052 = vmin.xlane.f32.xlu2 %v1051_v9  ;;  %v4791_v27 = vpop.f32.mrf.mxu0  ;;  %v4793_v24 = vpop.f32.mrf.mxu1  ;;  %v4861_v9 = vadd.f32 %v4523_v57, %v4764_v7  ;;  %v51_v14 = vld [vmem:[%s8057_s0 + $0x110] sm:$0xff] }
 0x159   :  { %v1349_v21 = vsel %vm1221_vm13, %v4661_v10, 256  ;;  %v1350_v22 = vsel %vm1222_vm14, %v4669_v17, 256 }
 0x15a   :  { %vm1533_vm15 = vcmp.lt.s32.totalorder %v1349_v21, %v1350_v22  ;;  %3867 = vmatmul.msk.f32.gmra.mxu0 %vm178_vm0, %v112_v23  ;;  %3947 = vmatmul.msk.f32.gmra.mxu1 %vm178_vm0, %v112_v23  ;;  %v1063_v7 = vmin.f32 %v4854_v8, %v4861_v9 }
 0x15b   :  { %v4789_v26 = vsel %vm1533_vm15, %v1349_v21, %v1350_v22  ;;  %v115_v21 = vmul.f32 -2.0, %v51_v14 }
 0x15c   :  { %v1536_v28 = vshra.s32 %v4789_v26, 16 }
 0x15e   :  { %v4798_v61 = vcvt.s32.f32 %v1536_v28 }
 0x15f   :  { %v1038_v62 = vpop.xlane.xlu2 %1037 }
 0x160   :  { %vm1223_vm1 = vcmp.le.f32.partialorder %v4596_v33, %v1038_v62  ;;  %vm1224_vm2 = vcmp.le.f32.partialorder %v4599_v34, %v1038_v62  ;;  %1539 = vmin.xlane.f32.xlu0 %v4798_v61  ;;  %1055 = vmin.xlane.f32.xlu1 %v1054_v29  ;;  %v532_v34 = vpop.f32.mrf.mxu0  ;;  %v741_v43 = vpop.f32.mrf.mxu1  ;;  %v4880_v29 = vadd.f32 %v4521_v56, %v4791_v27 }
 0x161   :  { %v1351_v4 = vsel %vm1223_vm1, %v4661_v10, 256  ;;  %v1352_v5 = vsel %vm1224_vm2, %v4669_v17, 256  ;;  %v4884_v62 = vadd.f32 %v4523_v57, %v4793_v24  ;;  %v4894_v27 = vadd.f32 %v4521_v56, %v532_v34 }
 0x162   :  { %vm1549_vm3 = vcmp.lt.s32.totalorder %v1351_v4, %v1352_v5  ;;  %3868 = vmatmul.msk.f32.gmra.mxu0 %vm178_vm0, %v113_v42  ;;  %3948 = vmatmul.msk.f32.gmra.mxu1 %vm178_vm0, %v113_v42  ;;  %v4897_v24 = vadd.f32 %v4523_v57, %v741_v43 }
 0x163   :  { %v4818_v33 = vsel %vm1549_vm3, %v1351_v4, %v1352_v5  ;;  %v116_v4 = vmul.f32 -2.0, %v52_v37 }
 0x164   :  { %v1552_v45 = vshra.s32 %v4818_v33, 16 }
 0x166   :  { %v4823_v50 = vcvt.s32.f32 %v1552_v45  ;;  %v1066_v45 = vmin.f32 %v4880_v29, %v4884_v62 }
 0x167   :  { %v1041_v51 = vpop.xlane.xlu0 %1040 }
 0x168   :  { %vm1225_vm4 = vcmp.le.f32.partialorder %v4609_v40, %v1041_v51  ;;  %vm1226_vm5 = vcmp.le.f32.partialorder %v4612_v41, %v1041_v51  ;;  %1555 = vmin.xlane.f32.xlu2 %v4823_v50  ;;  %1058 = vmin.xlane.f32.xlu1 %v1057_v39  ;;  %v535_v41 = vpop.f32.mrf.mxu0  ;;  %v744_v1 = vpop.f32.mrf.mxu1  ;;  %v53_v39 = vld [vmem:[%s8057_s0 + $0x120] sm:$0xff] }
 0x169   :  { %v1353_v58 = vsel %vm1225_vm4, %v4661_v10, 256  ;;  %v1354_v11 = vsel %vm1226_vm5, %v4669_v17, 256  ;;  %v117_v51 = vmul.f32 -2.0, %v53_v39  ;;  %v4907_v34 = vadd.f32 %v4521_v56, %v535_v41 }
 0x16a   :  { %vm1565_vm6 = vcmp.lt.s32.totalorder %v1353_v58, %v1354_v11  ;;  %3869 = vmatmul.msk.f32.gmra.mxu0 %vm178_vm0, %v114_v60  ;;  %3949 = vmatmul.msk.f32.gmra.mxu1 %vm178_vm0, %v114_v60  ;;  %v4910_v43 = vadd.f32 %v4523_v57, %v744_v1  ;;  %v54_v60 = vld [vmem:[%s8057_s0 + $0x128] sm:$0xff] }
 0x16b   :  { %v4843_v40 = vsel %vm1565_vm6, %v1353_v58, %v1354_v11  ;;  %v1069_v11 = vmin.f32 %v4894_v27, %v4897_v24 }
 0x16c   :  { %v1568_v2 = vshra.s32 %v4843_v40, 16  ;;  %v1072_v14 = vmin.f32 %v4907_v34, %v4910_v43 }
 0x16e   :  { %v4848_v3 = vcvt.s32.f32 %v1568_v2  ;;  %v118_v2 = vmul.f32 -2.0, %v54_v60 }
 0x16f   :  { %v1044_v6 = vpop.xlane.xlu2 %1043 }
 0x170   :  { %vm1227_vm7 = vcmp.le.f32.partialorder %v4622_v47, %v1044_v6  ;;  %vm1228_vm8 = vcmp.le.f32.partialorder %v4625_v48, %v1044_v6  ;;  %1571 = vmin.xlane.f32.xlu2 %v4848_v3  ;;  %1061 = vmin.xlane.f32.xlu1 %v1060_v12  ;;  %v538_v48 = vpop.f32.mrf.mxu0  ;;  %v747_v22 = vpop.f32.mrf.mxu1 }
 0x171   :  { %v1355_v20 = vsel %vm1227_vm7, %v4661_v10, 256  ;;  %v1356_v19 = vsel %vm1228_vm8, %v4669_v17, 256  ;;  %v4920_v41 = vadd.f32 %v4521_v56, %v538_v48  ;;  %v4923_v1 = vadd.f32 %v4523_v57, %v747_v22 }
 0x172   :  { %vm1581_vm9 = vcmp.lt.s32.totalorder %v1355_v20, %v1356_v19  ;;  %3870 = vmatmul.msk.f32.gmra.mxu0 %vm178_vm0, %v115_v21  ;;  %3950 = vmatmul.msk.f32.gmra.mxu1 %vm178_vm0, %v115_v21  ;;  %v55_v21 = vld [vmem:[%s8057_s0 + $0x130] sm:$0xff] }
 0x173   :  { %v4868_v47 = vsel %vm1581_vm9, %v1355_v20, %v1356_v19 }
 0x174   :  { %v1584_v23 = vshra.s32 %v4868_v47, 16 }
 0x176   :  { %v4873_v28 = vcvt.s32.f32 %v1584_v23  ;;  %v1075_v23 = vmin.f32 %v4920_v41, %v4923_v1 }
 0x178   :  { %1587 = vmin.xlane.f32.xlu2 %v4873_v28  ;;  %1064 = vmin.xlane.f32.xlu1 %v1063_v7  ;;  %v541_v5 = vpop.f32.mrf.mxu0  ;;  %v750_v42 = vpop.f32.mrf.mxu1  ;;  %v119_v7 = vmul.f32 -2.0, %v55_v21 }
 0x179   :  { %v4933_v48 = vadd.f32 %v4521_v56, %v541_v5  ;;  %v4936_v22 = vadd.f32 %v4523_v57, %v750_v42 }
 0x17a   :  { %3871 = vmatmul.msk.f32.gmra.mxu0 %vm178_vm0, %v116_v4  ;;  %3951 = vmatmul.msk.f32.gmra.mxu1 %vm178_vm0, %v116_v4 }
 0x17b   :  { %v1078_v39 = vmin.f32 %v4933_v48, %v4936_v22 }
 0x180   :  { %1067 = vmin.xlane.f32.xlu1 %v1066_v45  ;;  %v544_v55 = vpop.f32.mrf.mxu0  ;;  %v753_v58 = vpop.f32.mrf.mxu1  ;;  %v56_v45 = vld [vmem:[%s8057_s0 + $0x138] sm:$0xff] }
 0x181   :  { %v4946_v5 = vadd.f32 %v4521_v56, %v544_v55  ;;  %v4949_v42 = vadd.f32 %v4523_v57, %v753_v58 }
 0x182   :  { %3872 = vmatmul.msk.f32.gmra.mxu0 %vm178_vm0, %v117_v51  ;;  %3952 = vmatmul.msk.f32.gmra.mxu1 %vm178_vm0, %v117_v51  ;;  %v120_v51 = vmul.f32 -2.0, %v56_v45  ;;  %v58_v45 = vld [vmem:[%s8057_s0 + $0x148] sm:$0xff] }
 0x183   :  { %8154 = vst [vmem:[#allocation2_spill] sm:$0xff] %v4949_v42 }
 0x188   :  { %1070 = vmin.xlane.f32.xlu1 %v1069_v11  ;;  %v547_v12 = vpop.f32.mrf.mxu0  ;;  %v756_v6 = vpop.f32.mrf.mxu1 }
 0x189   :  { %v4959_v55 = vadd.f32 %v4521_v56, %v547_v12  ;;  %v4962_v58 = vadd.f32 %v4523_v57, %v756_v6  ;;  %v1471_v12 = vand.u32 65535, %v4680_v25 }
 0x18a   :  { %3873 = vmatmul.msk.f32.gmra.mxu0 %vm178_vm0, %v118_v2  ;;  %3953 = vmatmul.msk.f32.gmra.mxu1 %vm178_vm0, %v118_v2  ;;  %v57_v2 = vld [vmem:[%s8057_s0 + $0x140] sm:$0xff] }
 0x18b   :  { %v121_v21 = vmul.f32 -2.0, %v57_v2 }
 0x190   :  { %1073 = vmin.xlane.f32.xlu1 %v1072_v14  ;;  %v759_v20 = vpop.f32.mrf.mxu1  ;;  %v550_v19 = vpop.f32.mrf.mxu0  ;;  %v1081_v14 = vmin.f32 %v4946_v5, %v4949_v42 }
 0x191   :  { %v4977_v6 = vadd.f32 %v4523_v57, %v759_v20  ;;  %v4980_v2 = vadd.f32 %v4521_v56, %v550_v19 }
 0x192   :  { %3954 = vmatmul.msk.f32.gmra.mxu1 %vm178_vm0, %v119_v7  ;;  %3874 = vmatmul.msk.f32.gmra.mxu0 %vm178_vm0, %v119_v7 }
 0x193   :  { %8155 = vst [vmem:[#allocation3_spill] sm:$0xff] %v4977_v6  ;;  %v1087_v25 = vmin.f32 %v4980_v2, %v4977_v6 }
 0x194   :  { %8156 = vst [vmem:[#allocation4_spill] sm:$0xff] %v4980_v2 }
 0x198   :  { %1076 = vmin.xlane.f32.xlu1 %v1075_v23  ;;  %v762_v37 = vpop.f32.mrf.mxu1  ;;  %v553_v4 = vpop.f32.mrf.mxu0 }
 0x19a   :  { %3955 = vmatmul.msk.f32.gmra.mxu1 %vm178_vm0, %v120_v51  ;;  %3875 = vmatmul.msk.f32.gmra.mxu0 %vm178_vm0, %v120_v51  ;;  %v122_v51 = vmul.f32 -2.0, %v58_v45  ;;  %v59_v45 = vld [vmem:[%s8057_s0 + $0x150] sm:$0xff] }
 0x1a0   :  { %1079 = vmin.xlane.f32.xlu1 %v1078_v39  ;;  %v765_v11 = vpop.f32.mrf.mxu1  ;;  %v556_v60 = vpop.f32.mrf.mxu0  ;;  %v1084_v39 = vmin.f32 %v4959_v55, %v4962_v58 }
 0x1a2   :  { %3956 = vmatmul.msk.f32.gmra.mxu1 %vm178_vm0, %v121_v21  ;;  %3876 = vmatmul.msk.f32.gmra.mxu0 %vm178_vm0, %v121_v21  ;;  %v1473_v21 = vcvt.s32.f32 %v1471_v12  ;;  %v4999_v12 = vadd.f32 %v4523_v57, %v762_v37 }
 0x1a8   :  { %1082 = vmin.xlane.f32.xlu1 %v1081_v14  ;;  %v4964_v23 = vpop.f32.mrf.mxu1  ;;  %v4966_v7 = vpop.f32.mrf.mxu0 }
 0x1aa   :  { %3957 = vmatmul.msk.f32.gmra.mxu1 %vm178_vm0, %v122_v51  ;;  %3877 = vmatmul.msk.f32.gmra.mxu0 %vm178_vm0, %v122_v51  ;;  %v1487_v51 = vand.u32 65535, %v4705_v38 }
 0x1ac   :  { %v1489_v2 = vcvt.s32.f32 %v1487_v51 }
 0x1b0   :  { %1085 = vmin.xlane.f32.xlu1 %v1084_v39  ;;  %v4984_v42 = vpop.f32.mrf.mxu1  ;;  %v4993_v20 = vpop.f32.mrf.mxu0  ;;  %v123_v39 = vmul.f32 -2.0, %v59_v45 }
 0x1b2   :  { %3958 = vmatmul.msk.f32.gmra.mxu1 %vm178_vm0, %v123_v39  ;;  %3878 = vmatmul.msk.f32.gmra.mxu0 %vm178_vm0, %v123_v39 }
 0x1b3   :  { %v4982_v14 = vpop.xlane.xlu1 %1475 }
 0x1b4   :  { %8157 = vst [vmem:[#allocation5_spill] sm:$0xff] %v4982_v14  ;;  %vm1477_vm10 = vcmp.eq.f32.partialorder %v4687_v30, %v4982_v14  ;;  %v5002_v30 = vadd.f32 %v4521_v56, %v553_v4 }
 0x1b5   :  { %v1478_v19 = vsel %vm1477_vm10, %v1473_v21, inf  ;;  %v60_v21 = vld [vmem:[%s8057_s0 + $0x158] sm:$0xff] }
 0x1b6   :  { %1479 = vmin.xlane.f32.xlu0 %v1478_v19  ;;  %v1090_v38 = vmin.f32 %v5002_v30, %v4999_v12 }
 0x1b8   :  { %1088 = vmin.xlane.f32.xlu1 %v1087_v25  ;;  %v5015_v37 = vpop.f32.mrf.mxu1  ;;  %v5017_v4 = vpop.f32.mrf.mxu0 }
 0x1bb   :  { %v5004_v14 = vpop.xlane.xlu0 %1491  ;;  %v1047_v6 = vpop.xlane.xlu1 %1046 }
 0x1bc   :  { %vm1229_vm11 = vcmp.le.f32.partialorder %v4695_v31, %v1047_v6  ;;  %vm1230_vm12 = vcmp.le.f32.partialorder %v4698_v32, %v1047_v6  ;;  %vm1493_vm13 = vcmp.eq.f32.partialorder %v4714_v44, %v5004_v14  ;;  %v124_v31 = vmul.f32 -2.0, %v60_v21 }
 0x1bd   :  { %v1357_v45 = vsel %vm1229_vm11, %v4661_v10, 256  ;;  %v1358_v25 = vsel %vm1230_vm12, %v4669_v17, 256  ;;  %v1494_v39 = vsel %vm1493_vm13, %v1489_v2, inf  ;;  %v1503_v32 = vand.u32 65535, %v4732_v54  ;;  %v61_v54 = vld [vmem:[%s8057_s0 + $0x160] sm:$0xff] }
 0x1be   :  { %1495 = vmin.xlane.f32.xlu0 %v1494_v39  ;;  %vm1597_vm14 = vcmp.lt.s32.totalorder %v1357_v45, %v1358_v25  ;;  %v5025_v44 = vadd.f32 %v4523_v57, %v765_v11  ;;  %v5028_v6 = vadd.f32 %v4521_v56, %v556_v60  ;;  %3959 = vmatmul.msk.f32.gmra.mxu1 %vm178_vm0, %v124_v31 }
 0x1bf   :  { %v5021_v19 = vsel %vm1597_vm14, %v1357_v45, %v1358_v25  ;;  %3879 = vmatmul.msk.f32.gmra.mxu0 %vm178_vm0, %v124_v31  ;;  %v1505_v25 = vcvt.s32.f32 %v1503_v32 }
 0x1c0   :  { %1091 = vmin.xlane.f32.xlu1 %v1090_v38  ;;  %8158 = vst [vmem:[#allocation6_spill] sm:$0xff] %v5025_v44  ;;  %v1600_v51 = vshra.s32 %v5021_v19, 16  ;;  %v1093_v11 = vmin.f32 %v5028_v6, %v5025_v44  ;;  %v5047_v60 = vpop.f32.mrf.mxu1  ;;  %v5049_v38 = vpop.f32.mrf.mxu0 }
 0x1c2   :  { %v5033_v2 = vcvt.s32.f32 %v1600_v51  ;;  %v1519_v51 = vand.u32 65535, %v4760_v18 }
 0x1c3   :  { %v5035_v21 = vpop.xlane.xlu2 %1507  ;;  %v1050_v45 = vpop.xlane.xlu0 %1049 }
 0x1c4   :  { %vm1231_vm15 = vcmp.le.f32.partialorder %v4719_v46, %v1050_v45  ;;  %vm1232_vm1 = vcmp.le.f32.partialorder %v4725_v49, %v1050_v45  ;;  %1603 = vmin.xlane.f32.xlu2 %v5033_v2  ;;  %vm1509_vm2 = vcmp.eq.f32.partialorder %v4741_v59, %v5035_v21  ;;  %v125_v46 = vmul.f32 -2.0, %v61_v54 }
 0x1c5   :  { %v1359_v39 = vsel %vm1231_vm15, %v4661_v10, 256  ;;  %v1360_v31 = vsel %vm1232_vm1, %v4669_v17, 256  ;;  %v1510_v32 = vsel %vm1509_vm2, %v1505_v25, inf  ;;  %v5058_v59 = vadd.f32 %v4523_v57, %v4964_v23  ;;  %v62_v23 = vld [vmem:[%s8057_s0 + $0x168] sm:$0xff] }
 0x1c6   :  { %1511 = vmin.xlane.f32.xlu0 %v1510_v32  ;;  %vm1613_vm3 = vcmp.lt.s32.totalorder %v1359_v39, %v1360_v31  ;;  %v5062_v45 = vadd.f32 %v4521_v56, %v4966_v7  ;;  %3960 = vmatmul.msk.f32.gmra.mxu1 %vm178_vm0, %v125_v46 }
 0x1c7   :  { %v5053_v49 = vsel %vm1613_vm3, %v1359_v39, %v1360_v31  ;;  %8159 = vst [vmem:[#allocation7_spill] sm:$0xff] %v5058_v59  ;;  %3880 = vmatmul.msk.f32.gmra.mxu0 %vm178_vm0, %v125_v46 }
 0x1c8   :  { %1094 = vmin.xlane.f32.xlu1 %v1093_v11  ;;  %v1616_v44 = vshra.s32 %v5053_v49, 16  ;;  %v1521_v11 = vcvt.s32.f32 %v1519_v51  ;;  %v1096_v7 = vmin.f32 %v5062_v45, %v5058_v59  ;;  %v5083_v39 = vpop.f32.mrf.mxu0  ;;  %v1535_v51 = vand.u32 65535, %v4789_v26 }
 0x1ca   :  { %v5067_v25 = vcvt.s32.f32 %v1616_v44  ;;  %v5081_v44 = vpop.f32.mrf.mxu1 }
 0x1cb   :  { %v5069_v54 = vpop.xlane.xlu1 %1523  ;;  %v1053_v18 = vpop.xlane.xlu2 %1052 }
 0x1cc   :  { %vm1233_vm4 = vcmp.le.f32.partialorder %v4746_v63, %v1053_v18  ;;  %vm1234_vm5 = vcmp.le.f32.partialorder %v4753_v0, %v1053_v18  ;;  %1619 = vmin.xlane.f32.xlu2 %v5067_v25  ;;  %vm1525_vm6 = vcmp.eq.f32.partialorder %v4769_v13, %v5069_v54  ;;  %v126_v63 = vmul.f32 -2.0, %v62_v23 }
 0x1cd   :  { %v1361_v31 = vsel %vm1233_vm4, %v4661_v10, 256  ;;  %v1362_v32 = vsel %vm1234_vm5, %v4669_v17, 256  ;;  %v1526_v46 = vsel %vm1525_vm6, %v1521_v11, inf  ;;  %v5092_v13 = vadd.f32 %v4523_v57, %v4984_v42  ;;  %v63_v42 = vld [vmem:[%s8057_s0 + $0x170] sm:$0xff] }
 0x1ce   :  { %1527 = vmin.xlane.f32.xlu0 %v1526_v46  ;;  %vm1629_vm7 = vcmp.lt.s32.totalorder %v1361_v31, %v1362_v32  ;;  %v5096_v18 = vadd.f32 %v4521_v56, %v4993_v20  ;;  %3961 = vmatmul.msk.f32.gmra.mxu1 %vm178_vm0, %v126_v63 }
 0x1cf   :  { %v5087_v0 = vsel %vm1629_vm7, %v1361_v31, %v1362_v32  ;;  %8160 = vst [vmem:[#allocation8_spill] sm:$0xff] %v5092_v13  ;;  %3881 = vmatmul.msk.f32.gmra.mxu0 %vm178_vm0, %v126_v63 }
 0x1d0   :  { %1097 = vmin.xlane.f32.xlu1 %v1096_v7  ;;  %v1632_v59 = vshra.s32 %v5087_v0, 16  ;;  %v1537_v7 = vcvt.s32.f32 %v1535_v51  ;;  %v1099_v20 = vmin.f32 %v5096_v18, %v5092_v13  ;;  %v5117_v31 = vpop.f32.mrf.mxu0  ;;  %v1551_v51 = vand.u32 65535, %v4818_v33 }
 0x1d2   :  { %v5101_v11 = vcvt.s32.f32 %v1632_v59  ;;  %v5115_v59 = vpop.f32.mrf.mxu1 }
 0x1d3   :  { %v5103_v23 = vpop.xlane.xlu0 %1539  ;;  %v1056_v26 = vpop.xlane.xlu1 %1055 }
 0x1d4   :  { %vm1235_vm8 = vcmp.le.f32.partialorder %v4775_v15, %v1056_v26  ;;  %vm1236_vm9 = vcmp.le.f32.partialorder %v4782_v16, %v1056_v26  ;;  %1635 = vmin.xlane.f32.xlu2 %v5101_v11  ;;  %vm1541_vm10 = vcmp.eq.f32.partialorder %v4798_v61, %v5103_v23  ;;  %v127_v15 = vmul.f32 -2.0, %v63_v42 }
 0x1d5   :  { %v1363_v32 = vsel %vm1235_vm8, %v4661_v10, 256  ;;  %v1364_v46 = vsel %vm1236_vm9, %v4669_v17, 256  ;;  %v1542_v63 = vsel %vm1541_vm10, %v1537_v7, inf  ;;  %v5126_v61 = vadd.f32 %v4523_v57, %v5015_v37  ;;  %v64_v37 = vld [vmem:[%s8057_s0 + $0x178] sm:$0xff] }
 0x1d6   :  { %1543 = vmin.xlane.f32.xlu0 %v1542_v63  ;;  %vm1645_vm11 = vcmp.lt.s32.totalorder %v1363_v32, %v1364_v46  ;;  %v5130_v26 = vadd.f32 %v4521_v56, %v5017_v4  ;;  %3962 = vmatmul.msk.f32.gmra.mxu1 %vm178_vm0, %v127_v15 }
 0x1d7   :  { %v5121_v16 = vsel %vm1645_vm11, %v1363_v32, %v1364_v46  ;;  %8161 = vst [vmem:[#allocation9_spill] sm:$0xff] %v5126_v61  ;;  %3882 = vmatmul.msk.f32.gmra.mxu0 %vm178_vm0, %v127_v15 }
 0x1d8   :  { %1100 = vmin.xlane.f32.xlu1 %v1099_v20  ;;  %v1648_v13 = vshra.s32 %v5121_v16, 16  ;;  %v1553_v20 = vcvt.s32.f32 %v1551_v51  ;;  %v1102_v4 = vmin.f32 %v5130_v26, %v5126_v61  ;;  %v5151_v32 = vpop.f32.mrf.mxu0  ;;  %v1567_v51 = vand.u32 65535, %v4843_v40 }
 0x1da   :  { %v5135_v7 = vcvt.s32.f32 %v1648_v13  ;;  %v5149_v13 = vpop.f32.mrf.mxu1 }
 0x1db   :  { %v5137_v42 = vpop.xlane.xlu2 %1555  ;;  %v1059_v33 = vpop.xlane.xlu1 %1058 }
 0x1dc   :  { %vm1237_vm12 = vcmp.le.f32.partialorder %v4804_v35, %v1059_v33  ;;  %vm1238_vm13 = vcmp.le.f32.partialorder %v4811_v36, %v1059_v33  ;;  %1651 = vmin.xlane.f32.xlu2 %v5135_v7  ;;  %vm1557_vm14 = vcmp.eq.f32.partialorder %v4823_v50, %v5137_v42  ;;  %v128_v35 = vmul.f32 -2.0, %v64_v37 }
 0x1dd   :  { %v1365_v46 = vsel %vm1237_vm12, %v4661_v10, 256  ;;  %v1366_v63 = vsel %vm1238_vm13, %v4669_v17, 256  ;;  %v1558_v15 = vsel %vm1557_vm14, %v1553_v20, inf  ;;  %v5160_v50 = vadd.f32 %v4523_v57, %v5047_v60  ;;  %v65_v60 = vld [vmem:[%s8057_s0 + $0x180] sm:$0xff] }
 0x1de   :  { %1559 = vmin.xlane.f32.xlu0 %v1558_v15  ;;  %vm1661_vm15 = vcmp.lt.s32.totalorder %v1365_v46, %v1366_v63  ;;  %v5164_v33 = vadd.f32 %v4521_v56, %v5049_v38  ;;  %3963 = vmatmul.msk.f32.gmra.mxu1 %vm178_vm0, %v128_v35 }
 0x1df   :  { %v5155_v36 = vsel %vm1661_vm15, %v1365_v46, %v1366_v63  ;;  %8162 = vst [vmem:[#allocation10_spill] sm:$0xff] %v5160_v50  ;;  %3883 = vmatmul.msk.f32.gmra.mxu0 %vm178_vm0, %v128_v35 }
 0x1e0   :  { %1103 = vmin.xlane.f32.xlu1 %v1102_v4  ;;  %v1664_v61 = vshra.s32 %v5155_v36, 16  ;;  %v1569_v4 = vcvt.s32.f32 %v1567_v51  ;;  %v1105_v38 = vmin.f32 %v5164_v33, %v5160_v50  ;;  %v5185_v46 = vpop.f32.mrf.mxu0  ;;  %v1583_v51 = vand.u32 65535, %v4868_v47 }
 0x1e2   :  { %v5169_v20 = vcvt.s32.f32 %v1664_v61  ;;  %v5183_v61 = vpop.f32.mrf.mxu1 }
 0x1e3   :  { %v5171_v37 = vpop.xlane.xlu2 %1571  ;;  %v1062_v40 = vpop.xlane.xlu1 %1061 }
 0x1e4   :  { %vm1239_vm1 = vcmp.le.f32.partialorder %v4829_v52, %v1062_v40  ;;  %vm1240_vm2 = vcmp.le.f32.partialorder %v4836_v53, %v1062_v40  ;;  %1667 = vmin.xlane.f32.xlu2 %v5169_v20  ;;  %vm1573_vm3 = vcmp.eq.f32.partialorder %v4848_v3, %v5171_v37  ;;  %v129_v52 = vmul.f32 -2.0, %v65_v60 }
 0x1e5   :  { %v1367_v63 = vsel %vm1239_vm1, %v4661_v10, 256  ;;  %v1368_v15 = vsel %vm1240_vm2, %v4669_v17, 256  ;;  %v1574_v35 = vsel %vm1573_vm3, %v1569_v4, inf  ;;  %v5194_v3 = vadd.f32 %v4523_v57, %v5081_v44  ;;  %v66_v44 = vld [vmem:[%s8057_s0 + $0x188] sm:$0xff] }
 0x1e6   :  { %1575 = vmin.xlane.f32.xlu0 %v1574_v35  ;;  %vm1677_vm4 = vcmp.lt.s32.totalorder %v1367_v63, %v1368_v15  ;;  %v5198_v40 = vadd.f32 %v4521_v56, %v5083_v39  ;;  %3964 = vmatmul.msk.f32.gmra.mxu1 %vm178_vm0, %v129_v52 }
 0x1e7   :  { %v5189_v53 = vsel %vm1677_vm4, %v1367_v63, %v1368_v15  ;;  %3884 = vmatmul.msk.f32.gmra.mxu0 %vm178_vm0, %v129_v52 }
 0x1e8   :  { %1106 = vmin.xlane.f32.xlu1 %v1105_v38  ;;  %v1680_v50 = vshra.s32 %v5189_v53, 16  ;;  %v1585_v38 = vcvt.s32.f32 %v1583_v51  ;;  %v1108_v39 = vmin.f32 %v5198_v40, %v5194_v3  ;;  %v5219_v63 = vpop.f32.mrf.mxu0  ;;  %v5231_v51 = vadd.f32 %v4521_v56, %v5117_v31 }
 0x1ea   :  { %v5203_v4 = vcvt.s32.f32 %v1680_v50  ;;  %v5217_v50 = vpop.f32.mrf.mxu1  ;;  %8164 = vst [vmem:[#allocation12_spill] sm:$0xff] %v5231_v51 }
 0x1eb   :  { %v5205_v60 = vpop.xlane.xlu2 %1587  ;;  %v1065_v47 = vpop.xlane.xlu1 %1064 }
 0x1ec   :  { %vm1241_vm5 = vcmp.le.f32.partialorder %v4854_v8, %v1065_v47  ;;  %vm1242_vm6 = vcmp.le.f32.partialorder %v4861_v9, %v1065_v47  ;;  %1683 = vmin.xlane.f32.xlu2 %v5203_v4  ;;  %vm1589_vm7 = vcmp.eq.f32.partialorder %v4873_v28, %v5205_v60  ;;  %v130_v8 = vmul.f32 -2.0, %v66_v44 }
 0x1ed   :  { %v1369_v15 = vsel %vm1241_vm5, %v4661_v10, 256  ;;  %v1370_v35 = vsel %vm1242_vm6, %v4669_v17, 256  ;;  %v1590_v52 = vsel %vm1589_vm7, %v1585_v38, inf  ;;  %v5227_v28 = vadd.f32 %v4523_v57, %v5115_v59 }
 0x1ee   :  { %1591 = vmin.xlane.f32.xlu0 %v1590_v52  ;;  %vm1693_vm8 = vcmp.lt.s32.totalorder %v1369_v15, %v1370_v35  ;;  %3965 = vmatmul.msk.f32.gmra.mxu1 %vm178_vm0, %v130_v8 }
 0x1ef   :  { %v5223_v9 = vsel %vm1693_vm8, %v1369_v15, %v1370_v35  ;;  %8163 = vst [vmem:[#allocation11_spill] sm:$0xff] %v5227_v28  ;;  %3885 = vmatmul.msk.f32.gmra.mxu0 %vm178_vm0, %v130_v8  ;;  %v1111_v59 = vmin.f32 %v5231_v51, %v5227_v28 }
 0x1f0   :  { %1109 = vmin.xlane.f32.xlu1 %v1108_v39  ;;  %v1696_v47 = vshra.s32 %v5223_v9, 16  ;;  %v67_v39 = vld [vmem:[%s8057_s0 + $0x190] sm:$0xff]  ;;  %v5248_v15 = vpop.f32.mrf.mxu0 }
 0x1f1   :  { %v131_v35 = vmul.f32 -2.0, %v67_v39 }
 0x1f2   :  { %v5236_v38 = vcvt.s32.f32 %v1696_v47  ;;  %v5246_v31 = vpop.f32.mrf.mxu1 }
 0x1f3   :  { %v1068_v44 = vpop.xlane.xlu1 %1067 }
 0x1f4   :  { %vm1243_vm9 = vcmp.le.f32.partialorder %v4880_v29, %v1068_v44  ;;  %vm1244_vm10 = vcmp.le.f32.partialorder %v4884_v62, %v1068_v44  ;;  %1699 = vmin.xlane.f32.xlu2 %v5236_v38  ;;  %v5256_v29 = vadd.f32 %v4523_v57, %v5149_v13  ;;  %v5260_v62 = vadd.f32 %v4521_v56, %v5151_v32 }
 0x1f5   :  { %v1371_v52 = vsel %vm1243_vm9, %v4661_v10, 256  ;;  %v1372_v8 = vsel %vm1244_vm10, %v4669_v17, 256 }
 0x1f6   :  { %vm1709_vm11 = vcmp.lt.s32.totalorder %v1371_v52, %v1372_v8  ;;  %8165 = vst [vmem:[#allocation13_spill] sm:$0xff] %v5256_v29  ;;  %3966 = vmatmul.msk.f32.gmra.mxu1 %vm178_vm0, %v131_v35  ;;  %v1114_v13 = vmin.f32 %v5260_v62, %v5256_v29 }
 0x1f7   :  { %v5252_v47 = vsel %vm1709_vm11, %v1371_v52, %v1372_v8  ;;  %8166 = vst [vmem:[#allocation14_spill] sm:$0xff] %v5260_v62  ;;  %3886 = vmatmul.msk.f32.gmra.mxu0 %vm178_vm0, %v131_v35 }
 0x1f8   :  { %1112 = vmin.xlane.f32.xlu1 %v1111_v59  ;;  %v1712_v44 = vshra.s32 %v5252_v47, 16  ;;  %v68_v59 = vld [vmem:[%s8057_s0 + $0x198] sm:$0xff]  ;;  %v5277_v52 = vpop.f32.mrf.mxu0 }
 0x1f9   :  { %v132_v35 = vmul.f32 -2.0, %v68_v59 }
 0x1fa   :  { %v5265_v39 = vcvt.s32.f32 %v1712_v44  ;;  %v5275_v32 = vpop.f32.mrf.mxu1 }
 0x1fb   :  { %v1071_v28 = vpop.xlane.xlu1 %1070 }
 0x1fc   :  { %vm1245_vm12 = vcmp.le.f32.partialorder %v4894_v27, %v1071_v28  ;;  %vm1246_vm13 = vcmp.le.f32.partialorder %v4897_v24, %v1071_v28  ;;  %1715 = vmin.xlane.f32.xlu2 %v5265_v39  ;;  %v5285_v27 = vadd.f32 %v4523_v57, %v5183_v61  ;;  %v5289_v24 = vadd.f32 %v4521_v56, %v5185_v46 }
 0x1fd   :  { %v1373_v8 = vsel %vm1245_vm12, %v4661_v10, 256  ;;  %v1374_v44 = vsel %vm1246_vm13, %v4669_v17, 256 }
 0x1fe   :  { %vm1725_vm14 = vcmp.lt.s32.totalorder %v1373_v8, %v1374_v44  ;;  %8167 = vst [vmem:[#allocation15_spill] sm:$0xff] %v5285_v27  ;;  %3967 = vmatmul.msk.f32.gmra.mxu1 %vm178_vm0, %v132_v35  ;;  %v1117_v61 = vmin.f32 %v5289_v24, %v5285_v27 }
 0x1ff   :  { %v5281_v51 = vsel %vm1725_vm14, %v1373_v8, %v1374_v44  ;;  %8168 = vst [vmem:[#allocation16_spill] sm:$0xff] %v5289_v24  ;;  %3887 = vmatmul.msk.f32.gmra.mxu0 %vm178_vm0, %v132_v35 }
 0x200   :  { %1115 = vmin.xlane.f32.xlu1 %v1114_v13  ;;  %v1728_v28 = vshra.s32 %v5281_v51, 16  ;;  %v69_v13 = vld [vmem:[%s8057_s0 + $0x1a0] sm:$0xff]  ;;  %v5306_v8 = vpop.f32.mrf.mxu0 }
 0x201   :  { %v133_v35 = vmul.f32 -2.0, %v69_v13 }
 0x202   :  { %v5294_v59 = vcvt.s32.f32 %v1728_v28  ;;  %v5304_v46 = vpop.f32.mrf.mxu1 }
 0x203   :  { %v1074_v29 = vpop.xlane.xlu1 %1073 }
 0x204   :  { %vm1247_vm15 = vcmp.le.f32.partialorder %v4907_v34, %v1074_v29  ;;  %vm1248_vm1 = vcmp.le.f32.partialorder %v4910_v43, %v1074_v29  ;;  %1731 = vmin.xlane.f32.xlu2 %v5294_v59  ;;  %v5314_v34 = vadd.f32 %v4523_v57, %v5217_v50  ;;  %v5318_v43 = vadd.f32 %v4521_v56, %v5219_v63 }
 0x205   :  { %v1375_v44 = vsel %vm1247_vm15, %v4661_v10, 256  ;;  %v1376_v28 = vsel %vm1248_vm1, %v4669_v17, 256  ;;  %vm3295_vm15 = vcmask 7168  }
 0x206   :  { %vm1741_vm2 = vcmp.lt.s32.totalorder %v1375_v44, %v1376_v28  ;;  %8169 = vst [vmem:[#allocation17_spill] sm:$0xff] %v5314_v34  ;;  %3968 = vmatmul.msk.f32.gmra.mxu1 %vm178_vm0, %v133_v35  ;;  %v1120_v50 = vmin.f32 %v5318_v43, %v5314_v34 }
 0x207   :  { %v5310_v62 = vsel %vm1741_vm2, %v1375_v44, %v1376_v28  ;;  %8170 = vst [vmem:[#allocation18_spill] sm:$0xff] %v5318_v43  ;;  %3888 = vmatmul.msk.f32.gmra.mxu0 %vm178_vm0, %v133_v35 }
 0x208   :  { %1118 = vmin.xlane.f32.xlu1 %v1117_v61  ;;  %v1744_v29 = vshra.s32 %v5310_v62, 16  ;;  %v70_v61 = vld [vmem:[%s8057_s0 + $0x1a8] sm:$0xff]  ;;  %v5335_v44 = vpop.f32.mrf.mxu0 }
 0x209   :  { %v134_v35 = vmul.f32 -2.0, %v70_v61 }
 0x20a   :  { %v5323_v13 = vcvt.s32.f32 %v1744_v29  ;;  %v5333_v63 = vpop.f32.mrf.mxu1 }
 0x20b   :  { %v1077_v27 = vpop.xlane.xlu1 %1076 }
 0x20c   :  { %vm1249_vm3 = vcmp.le.f32.partialorder %v4920_v41, %v1077_v27  ;;  %vm1250_vm4 = vcmp.le.f32.partialorder %v4923_v1, %v1077_v27  ;;  %1747 = vmin.xlane.f32.xlu2 %v5323_v13  ;;  %v5343_v41 = vadd.f32 %v4523_v57, %v5246_v31  ;;  %v5347_v1 = vadd.f32 %v4521_v56, %v5248_v15 }
 0x20d   :  { %v1377_v28 = vsel %vm1249_vm3, %v4661_v10, 256  ;;  %v1378_v29 = vsel %vm1250_vm4, %v4669_v17, 256 }
 0x20e   :  { %vm1757_vm5 = vcmp.lt.s32.totalorder %v1377_v28, %v1378_v29  ;;  %8171 = vst [vmem:[#allocation19_spill] sm:$0xff] %v5343_v41  ;;  %3969 = vmatmul.msk.f32.gmra.mxu1 %vm178_vm0, %v134_v35  ;;  %v1123_v31 = vmin.f32 %v5347_v1, %v5343_v41 }
 0x20f   :  { %v5339_v24 = vsel %vm1757_vm5, %v1377_v28, %v1378_v29  ;;  %8172 = vst [vmem:[#allocation20_spill] sm:$0xff] %v5347_v1  ;;  %3889 = vmatmul.msk.f32.gmra.mxu0 %vm178_vm0, %v134_v35 }
 0x210   :  { %1121 = vmin.xlane.f32.xlu1 %v1120_v50  ;;  %v1760_v27 = vshra.s32 %v5339_v24, 16  ;;  %v71_v50 = vld [vmem:[%s8057_s0 + $0x1b0] sm:$0xff]  ;;  %v5364_v28 = vpop.f32.mrf.mxu0 }
 0x211   :  { %v135_v35 = vmul.f32 -2.0, %v71_v50 }
 0x212   :  { %v5352_v61 = vcvt.s32.f32 %v1760_v27  ;;  %v5362_v15 = vpop.f32.mrf.mxu1 }
 0x213   :  { %v1080_v34 = vpop.xlane.xlu1 %1079 }
 0x214   :  { %vm1251_vm6 = vcmp.le.f32.partialorder %v4933_v48, %v1080_v34  ;;  %vm1252_vm7 = vcmp.le.f32.partialorder %v4936_v22, %v1080_v34  ;;  %1763 = vmin.xlane.f32.xlu2 %v5352_v61  ;;  %v5372_v48 = vadd.f32 %v4523_v57, %v5275_v32  ;;  %v5376_v22 = vadd.f32 %v4521_v56, %v5277_v52  ;;  %v8176_v32 = vld [vmem:[#allocation2_spill] sm:$0xff] }
 0x215   :  { %v1379_v29 = vsel %vm1251_vm6, %v4661_v10, 256  ;;  %v1380_v27 = vsel %vm1252_vm7, %v4669_v17, 256 }
 0x216   :  { %vm1773_vm8 = vcmp.lt.s32.totalorder %v1379_v29, %v1380_v27  ;;  %8174 = vst [vmem:[#allocation22_spill] sm:$0xff] %v5372_v48  ;;  %3970 = vmatmul.msk.f32.gmra.mxu1 %vm178_vm0, %v135_v35  ;;  %v1126_v52 = vmin.f32 %v5376_v22, %v5372_v48 }
 0x217   :  { %v5368_v43 = vsel %vm1773_vm8, %v1379_v29, %v1380_v27  ;;  %8175 = vst [vmem:[#allocation23_spill] sm:$0xff] %v5376_v22  ;;  %3890 = vmatmul.msk.f32.gmra.mxu0 %vm178_vm0, %v135_v35  ;;  %v8181_v22 = vld [vmem:[#allocation5_spill] sm:$0xff] }
 0x218   :  { %8173 = vst [vmem:[#allocation21_spill] sm:$0xff] %v5368_v43  ;;  %1124 = vmin.xlane.f32.xlu1 %v1123_v31  ;;  %v1776_v34 = vshra.s32 %v5368_v43, 16  ;;  %v72_v31 = vld [vmem:[%s8057_s0 + $0x1b8] sm:$0xff]  ;;  %v5393_v27 = vpop.f32.mrf.mxu0 }
 0x219   :  { %v136_v35 = vmul.f32 -2.0, %v72_v31 }
 0x21a   :  { %v5381_v50 = vcvt.s32.f32 %v1776_v34  ;;  %v5391_v29 = vpop.f32.mrf.mxu1 }
 0x21b   :  { %v1083_v41 = vpop.xlane.xlu1 %1082 }
 0x21c   :  { %vm1253_vm9 = vcmp.le.f32.partialorder %v4946_v5, %v1083_v41  ;;  %vm1254_vm10 = vcmp.le.f32.partialorder %v8176_v32, %v1083_v41  ;;  %1779 = vmin.xlane.f32.xlu2 %v5381_v50  ;;  %v5401_v5 = vadd.f32 %v4523_v57, %v5304_v46  ;;  %v5405_v41 = vadd.f32 %v4521_v56, %v5306_v8 }
 0x21d   :  { %v1381_v34 = vsel %vm1253_vm9, %v4661_v10, 256  ;;  %v1382_v1 = vsel %vm1254_vm10, %v4669_v17, 256 }
 0x21e   :  { %vm1789_vm11 = vcmp.lt.s32.totalorder %v1381_v34, %v1382_v1  ;;  %8178 = vst [vmem:[#allocation24_spill] sm:$0xff] %v5401_v5  ;;  %3971 = vmatmul.msk.f32.gmra.mxu1 %vm178_vm0, %v136_v35  ;;  %v1129_v46 = vmin.f32 %v5405_v41, %v5401_v5 }
 0x21f   :  { %v5397_v43 = vsel %vm1789_vm11, %v1381_v34, %v1382_v1  ;;  %8179 = vst [vmem:[#allocation25_spill] sm:$0xff] %v5405_v41  ;;  %3891 = vmatmul.msk.f32.gmra.mxu0 %vm178_vm0, %v136_v35  ;;  %v73_v1 = vld [vmem:[%s8057_s0 + $0x1c0] sm:$0xff] }
 0x220   :  { %8177 = vst [vmem:[#allocation2_spill] sm:$0xff] %v5397_v43  ;;  %1127 = vmin.xlane.f32.xlu1 %v1126_v52  ;;  %v1792_v32 = vshra.s32 %v5397_v43, 16  ;;  %v5422_v52 = vpop.f32.mrf.mxu0  ;;  %v137_v35 = vmul.f32 -2.0, %v73_v1  ;;  %v1482_v43 = vcvt.f32.s32 %v8181_v22 }
 0x222   :  { %v5410_v31 = vcvt.s32.f32 %v1792_v32  ;;  %v5420_v8 = vpop.f32.mrf.mxu1  ;;  %v1483_v22 = vshll.u32 %v1482_v43, 16 }
 0x223   :  { %v1086_v48 = vpop.xlane.xlu1 %1085 }
 0x224   :  { %8180 = vst [vmem:[#allocation26_spill] sm:$0xff] %v5410_v31  ;;  %vm1255_vm12 = vcmp.le.f32.partialorder %v4959_v55, %v1086_v48  ;;  %vm1256_vm13 = vcmp.le.f32.partialorder %v4962_v58, %v1086_v48  ;;  %1795 = vmin.xlane.f32.xlu2 %v5410_v31  ;;  %v5429_v55 = vadd.f32 %v4523_v57, %v5333_v63 }
 0x225   :  { %v1383_v34 = vsel %vm1255_vm12, %v4661_v10, 256  ;;  %v1384_v32 = vsel %vm1256_vm13, %v4669_v17, 256  ;;  %v5433_v58 = vadd.f32 %v4521_v56, %v5335_v44 }
 0x226   :  { %vm1805_vm14 = vcmp.lt.s32.totalorder %v1383_v34, %v1384_v32  ;;  %8182 = vst [vmem:[#allocation5_spill] sm:$0xff] %v5429_v55  ;;  %3972 = vmatmul.msk.f32.gmra.mxu1 %vm178_vm0, %v137_v35 }
 0x227   :  { %8183 = vst [vmem:[#allocation27_spill] sm:$0xff] %v5433_v58  ;;  %v5435_v48 = vsel %vm1805_vm14, %v1383_v34, %v1384_v32  ;;  %3892 = vmatmul.msk.f32.gmra.mxu0 %vm178_vm0, %v137_v35  ;;  %v1132_v44 = vmin.f32 %v5433_v58, %v5429_v55  ;;  %v8186_v32 = vld [vmem:[#allocation4_spill] sm:$0xff]  ;;  %v1498_v58 = vcvt.f32.s32 %v5004_v14  ;;  %v5471_v14 = vadd.f32 %v4521_v56, %v5364_v28 }
 0x228   :  { %8184 = vst [vmem:[#allocation28_spill] sm:$0xff] %v5435_v48  ;;  %1130 = vmin.xlane.f32.xlu1 %v1129_v46  ;;  %v1808_v1 = vshra.s32 %v5435_v48, 16  ;;  %v74_v46 = vld [vmem:[%s8057_s0 + $0x1c8] sm:$0xff]  ;;  %v1599_v28 = vand.u32 65535, %v5021_v19 }
 0x229   :  { %v1480_v5 = vpop.xlane.xlu0 %1479  ;;  %v8187_v48 = vld [vmem:[#allocation3_spill] sm:$0xff]  ;;  %v138_v35 = vmul.f32 -2.0, %v74_v46 }
 0x22a   :  { %v1481_v41 = vcvt.f32.s32 %v1480_v5  ;;  %v5440_v31 = vcvt.s32.f32 %v1808_v1  ;;  %v5450_v43 = vpop.f32.mrf.mxu1  ;;  %v5452_v5 = vpop.f32.mrf.mxu0  ;;  %8189 = vst [vmem:[#allocation3_spill] sm:$0xff] %v5471_v14 }
 0x22b   :  { %v1089_v63 = vpop.xlane.xlu1 %1088 }
 0x22c   :  { %8185 = vst [vmem:[#allocation29_spill] sm:$0xff] %v5440_v31  ;;  %v1484_v34 = vadd.s32 %v1483_v22, %v1481_v41  ;;  %vm1257_vm1 = vcmp.le.f32.partialorder %v8186_v32, %v1089_v63  ;;  %vm1258_vm2 = vcmp.le.f32.partialorder %v8187_v48, %v1089_v63  ;;  %1811 = vmin.xlane.f32.xlu2 %v5440_v31  ;;  %v8091_v41 = vmov 1.0  }
 0x22d   :  { %v1385_v1 = vsel %vm1257_vm1, %v4661_v10, 256  ;;  %v1386_v55 = vsel %vm1258_vm2, %v4669_v17, 256  ;;  %v5467_v48 = vadd.f32 %v4523_v57, %v5362_v15 }
 0x22e   :  { %3296 = vst.msk [vmem:[%s8059_s4] sm:$0xff] %vm3295_vm15, %v1484_v34  ;;  %vm2493_vm3 = vcmp.eq.s32.totalorder %v4661_v10, %v1484_v34  ;;  %vm2494_vm4 = vcmp.eq.s32.totalorder %v4669_v17, %v1484_v34  ;;  %vm1821_vm5 = vcmp.lt.s32.totalorder %v1385_v1, %v1386_v55  ;;  %3973 = vmatmul.msk.f32.gmra.mxu1 %vm178_vm0, %v138_v35  ;;  %v1499_v34 = vshll.u32 %v1498_v58, 16 }
 0x22f   :  { %4108 = vmatmul.msk.f32.vlgmr.msra.gmra.mxu2 %vm2493_vm3, %v8091_v41  ;;  %4172 = vmatmul.msk.f32.vlgmr.msra.gmra.mxu3 %vm2494_vm4, %v8091_v41  ;;  %8188 = vst [vmem:[#allocation4_spill] sm:$0xff] %v5467_v48  ;;  %v5473_v22 = vsel %vm1821_vm5, %v1385_v1, %v1386_v55  ;;  %v1135_v31 = vmin.f32 %v5471_v14, %v5467_v48  ;;  %v75_v55 = vld [vmem:[%s8057_s0 + $0x1d0] sm:$0xff] }
 0x230   :  { %1133 = vmin.xlane.f32.xlu1 %v1132_v44  ;;  %v1824_v63 = vshra.s32 %v5473_v22, 16  ;;  %3893 = vmatmul.msk.f32.gmra.mxu0 %vm178_vm0, %v138_v35  ;;  %v139_v1 = vmul.f32 -2.0, %v75_v55 }
 0x231   :  { %v1496_v46 = vpop.xlane.xlu0 %1495 }
 0x232   :  { %v1497_v32 = vcvt.f32.s32 %v1496_v46  ;;  %v5478_v41 = vcvt.s32.f32 %v1824_v63  ;;  %v5489_v58 = vpop.f32.mrf.mxu1  ;;  %v5491_v35 = vpop.f32.mrf.mxu0  ;;  %v1514_v46 = vcvt.f32.s32 %v5035_v21  ;;  %v5508_v21 = vadd.f32 %v4523_v57, %v5391_v29 }
 0x233   :  { %v1092_v15 = vpop.xlane.xlu1 %1091 }
 0x234   :  { %v1500_v44 = vadd.s32 %v1499_v34, %v1497_v32  ;;  %vm1259_vm6 = vcmp.le.f32.partialorder %v5002_v30, %v1092_v15  ;;  %vm1260_vm7 = vcmp.le.f32.partialorder %v4999_v12, %v1092_v15  ;;  %1827 = vmin.xlane.f32.xlu2 %v5478_v41  ;;  %v8190_v12 = vmov 1.0   ;;  %8191 = vst [vmem:[#allocation30_spill] sm:$0xff] %v5508_v21 }
 0x235   :  { %v1387_v63 = vsel %vm1259_vm6, %v4661_v10, 256  ;;  %v1388_v19 = vsel %vm1260_vm7, %v4669_v17, 256  ;;  %v1601_v34 = vcvt.s32.f32 %v1599_v28  ;;  %v5512_v32 = vadd.f32 %v4521_v56, %v5393_v27 }
 0x236   :  { %3297 = vst.msk [vmem:[%s8059_s4 + $0x8] sm:$0xff] %vm3295_vm15, %v1500_v44  ;;  %vm2495_vm8 = vcmp.eq.s32.totalorder %v4661_v10, %v1500_v44  ;;  %vm2496_vm9 = vcmp.eq.s32.totalorder %v4669_v17, %v1500_v44  ;;  %vm1837_vm10 = vcmp.lt.s32.totalorder %v1387_v63, %v1388_v19  ;;  %3974 = vmatmul.msk.f32.gmra.mxu1 %vm178_vm0, %v139_v1  ;;  %v1515_v29 = vshll.u32 %v1514_v46, 16 }
 0x237   :  { %4109 = vmatmul.msk.f32.gmra.mxu2 %vm2495_vm8, %v8190_v12  ;;  %4173 = vmatmul.msk.f32.gmra.mxu3 %vm2496_vm9, %v8190_v12  ;;  %v5504_v30 = vpop.xlane.xlu2 %1603  ;;  %v5514_v15 = vsel %vm1837_vm10, %v1387_v63, %v1388_v19  ;;  %v1615_v63 = vand.u32 65535, %v5053_v49  ;;  %v1530_v49 = vcvt.f32.s32 %v5069_v54  ;;  %v5551_v54 = vadd.f32 %v4523_v57, %v5420_v8 }
 0x238   :  { %1136 = vmin.xlane.f32.xlu1 %v1135_v31  ;;  %vm1605_vm11 = vcmp.eq.f32.partialorder %v5033_v2, %v5504_v30  ;;  %v1840_v55 = vshra.s32 %v5514_v15, 16  ;;  %3894 = vmatmul.msk.f32.gmra.mxu0 %vm178_vm0, %v139_v1  ;;  %v1138_v31 = vmin.f32 %v5512_v32, %v5508_v21  ;;  %v76_v2 = vld [vmem:[%s8057_s0 + $0x1d8] sm:$0xff] }
 0x239   :  { %v1512_v44 = vpop.xlane.xlu0 %1511  ;;  %v1606_v28 = vsel %vm1605_vm11, %v1601_v34, inf  ;;  %v8192_v34 = vld [vmem:[#allocation6_spill] sm:$0xff]  ;;  %v140_v1 = vmul.f32 -2.0, %v76_v2  ;;  %v1531_v8 = vshll.u32 %v1530_v49, 16 }
 0x23a   :  { %v1513_v48 = vcvt.f32.s32 %v1512_v44  ;;  %1607 = vmin.xlane.f32.xlu0 %v1606_v28  ;;  %v5521_v14 = vcvt.s32.f32 %v1840_v55  ;;  %v1617_v28 = vcvt.s32.f32 %v1615_v63  ;;  %8193 = vst [vmem:[#allocation6_spill] sm:$0xff] %v5551_v54 }
 0x23b   :  { %v1095_v27 = vpop.xlane.xlu1 %1094  ;;  %v5534_v44 = vpop.f32.mrf.mxu1 }
 0x23c   :  { %v1516_v19 = vadd.s32 %v1515_v29, %v1513_v48  ;;  %vm1261_vm12 = vcmp.le.f32.partialorder %v5028_v6, %v1095_v27  ;;  %vm1262_vm13 = vcmp.le.f32.partialorder %v8192_v34, %v1095_v27  ;;  %1843 = vmin.xlane.f32.xlu2 %v5521_v14  ;;  %v5543_v6 = vpop.f32.mrf.mxu0  ;;  %v5555_v29 = vadd.f32 %v4521_v56, %v5422_v52 }
 0x23d   :  { %v1389_v46 = vsel %vm1261_vm12, %v4661_v10, 256  ;;  %v1390_v55 = vsel %vm1262_vm13, %v4669_v17, 256 }
 0x23e   :  { %3298 = vst.msk [vmem:[%s8059_s4 + $0x10] sm:$0xff] %vm3295_vm15, %v1516_v19  ;;  %vm2497_vm14 = vcmp.eq.s32.totalorder %v4661_v10, %v1516_v19  ;;  %vm2498_vm1 = vcmp.eq.s32.totalorder %v4669_v17, %v1516_v19  ;;  %vm1853_vm2 = vcmp.lt.s32.totalorder %v1389_v46, %v1390_v55  ;;  %3975 = vmatmul.msk.f32.gmra.mxu1 %vm178_vm0, %v140_v1 }
 0x23f   :  { %4110 = vmatmul.msk.f32.gmra.mxu2 %vm2497_vm14, %v8190_v12  ;;  %4174 = vmatmul.msk.f32.gmra.mxu3 %vm2498_vm1, %v8190_v12  ;;  %v5547_v48 = vpop.xlane.xlu2 %1619  ;;  %v5557_v27 = vsel %vm1853_vm2, %v1389_v46, %v1390_v55  ;;  %v1631_v46 = vand.u32 65535, %v5087_v0  ;;  %v1546_v0 = vcvt.f32.s32 %v5103_v23  ;;  %v5594_v23 = vadd.f32 %v4523_v57, %v5450_v43 }
 0x240   :  { %1139 = vmin.xlane.f32.xlu1 %v1138_v31  ;;  %vm1621_vm3 = vcmp.eq.f32.partialorder %v5067_v25, %v5547_v48  ;;  %v1856_v2 = vshra.s32 %v5557_v27, 16  ;;  %3895 = vmatmul.msk.f32.gmra.mxu0 %vm178_vm0, %v140_v1  ;;  %v1141_v31 = vmin.f32 %v5555_v29, %v5551_v54  ;;  %v77_v25 = vld [vmem:[%s8057_s0 + $0x1e0] sm:$0xff] }
 0x241   :  { %v1528_v19 = vpop.xlane.xlu0 %1527  ;;  %v1622_v63 = vsel %vm1621_vm3, %v1617_v28, inf  ;;  %v8194_v28 = vld [vmem:[#allocation7_spill] sm:$0xff]  ;;  %v141_v1 = vmul.f32 -2.0, %v77_v25  ;;  %v1547_v43 = vshll.u32 %v1546_v0, 16 }
 0x242   :  { %v1529_v34 = vcvt.f32.s32 %v1528_v19  ;;  %1623 = vmin.xlane.f32.xlu0 %v1622_v63  ;;  %v5564_v21 = vcvt.s32.f32 %v1856_v2  ;;  %8195 = vst [vmem:[#allocation7_spill] sm:$0xff] %v5594_v23 }
 0x243   :  { %v1098_v52 = vpop.xlane.xlu1 %1097  ;;  %v5577_v19 = vpop.f32.mrf.mxu1 }
 0x244   :  { %v1532_v55 = vadd.s32 %v1531_v8, %v1529_v34  ;;  %vm1263_vm4 = vcmp.le.f32.partialorder %v5062_v45, %v1098_v52  ;;  %vm1264_vm5 = vcmp.le.f32.partialorder %v8194_v28, %v1098_v52  ;;  %1859 = vmin.xlane.f32.xlu2 %v5564_v21  ;;  %v5586_v45 = vpop.f32.mrf.mxu0  ;;  %v1633_v8 = vcvt.s32.f32 %v1631_v46 }
 0x245   :  { %v1391_v49 = vsel %vm1263_vm4, %v4661_v10, 256  ;;  %v1392_v2 = vsel %vm1264_vm5, %v4669_v17, 256  ;;  %v5598_v34 = vadd.f32 %v4521_v56, %v5452_v5 }
 0x246   :  { %3299 = vst.msk [vmem:[%s8059_s4 + $0x18] sm:$0xff] %vm3295_vm15, %v1532_v55  ;;  %vm2499_vm6 = vcmp.eq.s32.totalorder %v4661_v10, %v1532_v55  ;;  %vm2500_vm7 = vcmp.eq.s32.totalorder %v4669_v17, %v1532_v55  ;;  %vm1869_vm8 = vcmp.lt.s32.totalorder %v1391_v49, %v1392_v2  ;;  %3976 = vmatmul.msk.f32.gmra.mxu1 %vm178_vm0, %v141_v1 }
 0x247   :  { %4111 = vmatmul.msk.f32.gmra.mxu2 %vm2499_vm6, %v8190_v12  ;;  %4175 = vmatmul.msk.f32.gmra.mxu3 %vm2500_vm7, %v8190_v12  ;;  %v5590_v63 = vpop.xlane.xlu2 %1635  ;;  %v5600_v52 = vsel %vm1869_vm8, %v1391_v49, %v1392_v2  ;;  %v1647_v49 = vand.u32 65535, %v5121_v16  ;;  %v1562_v16 = vcvt.f32.s32 %v5137_v42  ;;  %v5637_v42 = vadd.f32 %v4523_v57, %v5489_v58 }
 0x248   :  { %1142 = vmin.xlane.f32.xlu1 %v1141_v31  ;;  %vm1637_vm9 = vcmp.eq.f32.partialorder %v5101_v11, %v5590_v63  ;;  %v1872_v25 = vshra.s32 %v5600_v52, 16  ;;  %3896 = vmatmul.msk.f32.gmra.mxu0 %vm178_vm0, %v141_v1  ;;  %v1144_v31 = vmin.f32 %v5598_v34, %v5594_v23  ;;  %v78_v11 = vld [vmem:[%s8057_s0 + $0x1e8] sm:$0xff] }
 0x249   :  { %v1544_v55 = vpop.xlane.xlu0 %1543  ;;  %v1638_v46 = vsel %vm1637_vm9, %v1633_v8, inf  ;;  %v8196_v8 = vld [vmem:[#allocation8_spill] sm:$0xff]  ;;  %v142_v1 = vmul.f32 -2.0, %v78_v11  ;;  %v1563_v58 = vshll.u32 %v1562_v16, 16 }
 0x24a   :  { %v1545_v28 = vcvt.f32.s32 %v1544_v55  ;;  %1639 = vmin.xlane.f32.xlu0 %v1638_v46  ;;  %v5607_v54 = vcvt.s32.f32 %v1872_v25  ;;  %8197 = vst [vmem:[#allocation8_spill] sm:$0xff] %v5637_v42 }
 0x24b   :  { %v1101_v5 = vpop.xlane.xlu1 %1100  ;;  %v5620_v55 = vpop.f32.mrf.mxu1 }
 0x24c   :  { %v1548_v2 = vadd.s32 %v1547_v43, %v1545_v28  ;;  %vm1265_vm10 = vcmp.le.f32.partialorder %v5096_v18, %v1101_v5  ;;  %vm1266_vm11 = vcmp.le.f32.partialorder %v8196_v8, %v1101_v5  ;;  %1875 = vmin.xlane.f32.xlu2 %v5607_v54  ;;  %v5629_v18 = vpop.f32.mrf.mxu0  ;;  %v1649_v43 = vcvt.s32.f32 %v1647_v49 }
 0x24d   :  { %v1393_v0 = vsel %vm1265_vm10, %v4661_v10, 256  ;;  %v1394_v25 = vsel %vm1266_vm11, %v4669_v17, 256  ;;  %v5641_v28 = vadd.f32 %v4521_v56, %v5491_v35 }
 0x24e   :  { %3300 = vst.msk [vmem:[%s8059_s4 + $0x20] sm:$0xff] %vm3295_vm15, %v1548_v2  ;;  %vm2501_vm12 = vcmp.eq.s32.totalorder %v4661_v10, %v1548_v2  ;;  %vm2502_vm13 = vcmp.eq.s32.totalorder %v4669_v17, %v1548_v2  ;;  %vm1885_vm14 = vcmp.lt.s32.totalorder %v1393_v0, %v1394_v25  ;;  %3977 = vmatmul.msk.f32.gmra.mxu1 %vm178_vm0, %v142_v1 }
 0x24f   :  { %4112 = vmatmul.msk.f32.gmra.mxu2 %vm2501_vm12, %v8190_v12  ;;  %4176 = vmatmul.msk.f32.gmra.mxu3 %vm2502_vm13, %v8190_v12  ;;  %v5633_v46 = vpop.xlane.xlu2 %1651  ;;  %v5643_v5 = vsel %vm1885_vm14, %v1393_v0, %v1394_v25  ;;  %v1663_v0 = vand.u32 65535, %v5155_v36  ;;  %v1578_v36 = vcvt.f32.s32 %v5171_v37  ;;  %v5680_v37 = vadd.f32 %v4523_v57, %v5534_v44 }
 0x250   :  { %1145 = vmin.xlane.f32.xlu1 %v1144_v31  ;;  %vm1653_vm1 = vcmp.eq.f32.partialorder %v5135_v7, %v5633_v46  ;;  %v1888_v11 = vshra.s32 %v5643_v5, 16  ;;  %3897 = vmatmul.msk.f32.gmra.mxu0 %vm178_vm0, %v142_v1  ;;  %v1147_v31 = vmin.f32 %v5641_v28, %v5637_v42  ;;  %v79_v7 = vld [vmem:[%s8057_s0 + $0x1f0] sm:$0xff] }
 0x251   :  { %v1560_v2 = vpop.xlane.xlu0 %1559  ;;  %v1654_v49 = vsel %vm1653_vm1, %v1649_v43, inf  ;;  %v8198_v43 = vld [vmem:[#allocation9_spill] sm:$0xff]  ;;  %v143_v1 = vmul.f32 -2.0, %v79_v7  ;;  %v1579_v44 = vshll.u32 %v1578_v36, 16 }
 0x252   :  { %v1561_v8 = vcvt.f32.s32 %v1560_v2  ;;  %1655 = vmin.xlane.f32.xlu0 %v1654_v49  ;;  %v5650_v23 = vcvt.s32.f32 %v1888_v11 }
 0x253   :  { %v1104_v35 = vpop.xlane.xlu1 %1103  ;;  %v5663_v2 = vpop.f32.mrf.mxu1 }
 0x254   :  { %v1564_v25 = vadd.s32 %v1563_v58, %v1561_v8  ;;  %vm1267_vm2 = vcmp.le.f32.partialorder %v5130_v26, %v1104_v35  ;;  %vm1268_vm3 = vcmp.le.f32.partialorder %v8198_v43, %v1104_v35  ;;  %1891 = vmin.xlane.f32.xlu2 %v5650_v23  ;;  %v5672_v26 = vpop.f32.mrf.mxu0  ;;  %v1665_v58 = vcvt.s32.f32 %v1663_v0 }
 0x255   :  { %v1395_v16 = vsel %vm1267_vm2, %v4661_v10, 256  ;;  %v1396_v11 = vsel %vm1268_vm3, %v4669_v17, 256  ;;  %v5684_v8 = vadd.f32 %v4521_v56, %v5543_v6 }
 0x256   :  { %3301 = vst.msk [vmem:[%s8059_s4 + $0x28] sm:$0xff] %vm3295_vm15, %v1564_v25  ;;  %vm2503_vm4 = vcmp.eq.s32.totalorder %v4661_v10, %v1564_v25  ;;  %vm2504_vm5 = vcmp.eq.s32.totalorder %v4669_v17, %v1564_v25  ;;  %vm1901_vm6 = vcmp.lt.s32.totalorder %v1395_v16, %v1396_v11  ;;  %3978 = vmatmul.msk.f32.gmra.mxu1 %vm178_vm0, %v143_v1 }
 0x257   :  { %4113 = vmatmul.msk.f32.gmra.mxu2 %vm2503_vm4, %v8190_v12  ;;  %4177 = vmatmul.msk.f32.gmra.mxu3 %vm2504_vm5, %v8190_v12  ;;  %v5676_v49 = vpop.xlane.xlu2 %1667  ;;  %v5686_v35 = vsel %vm1901_vm6, %v1395_v16, %v1396_v11  ;;  %v1679_v16 = vand.u32 65535, %v5189_v53  ;;  %v1594_v53 = vcvt.f32.s32 %v5205_v60 }
 0x258   :  { %1148 = vmin.xlane.f32.xlu1 %v1147_v31  ;;  %vm1669_vm7 = vcmp.eq.f32.partialorder %v5169_v20, %v5676_v49  ;;  %v1904_v7 = vshra.s32 %v5686_v35, 16  ;;  %3898 = vmatmul.msk.f32.gmra.mxu0 %vm178_vm0, %v143_v1  ;;  %v1150_v31 = vmin.f32 %v5684_v8, %v5680_v37  ;;  %v80_v20 = vld [vmem:[%s8057_s0 + $0x1f8] sm:$0xff] }
 0x259   :  { %v1576_v25 = vpop.xlane.xlu0 %1575  ;;  %v1670_v0 = vsel %vm1669_vm7, %v1665_v58, inf  ;;  %v8199_v58 = vld [vmem:[#allocation10_spill] sm:$0xff]  ;;  %v144_v1 = vmul.f32 -2.0, %v80_v20 }
 0x25a   :  { %v1577_v43 = vcvt.f32.s32 %v1576_v25  ;;  %1671 = vmin.xlane.f32.xlu0 %v1670_v0  ;;  %v5693_v42 = vcvt.s32.f32 %v1904_v7 }
 0x25b   :  { %v1107_v6 = vpop.xlane.xlu1 %1106  ;;  %v5706_v25 = vpop.f32.mrf.mxu1 }
 0x25c   :  { %v1580_v11 = vadd.s32 %v1579_v44, %v1577_v43  ;;  %vm1269_vm8 = vcmp.le.f32.partialorder %v5164_v33, %v1107_v6  ;;  %vm1270_vm9 = vcmp.le.f32.partialorder %v8199_v58, %v1107_v6  ;;  %1907 = vmin.xlane.f32.xlu2 %v5693_v42  ;;  %v5715_v33 = vpop.f32.mrf.mxu0  ;;  %v1681_v44 = vcvt.s32.f32 %v1679_v16 }
 0x25d   :  { %v1397_v36 = vsel %vm1269_vm8, %v4661_v10, 256  ;;  %v1398_v7 = vsel %vm1270_vm9, %v4669_v17, 256  ;;  %v5727_v43 = vadd.f32 %v4523_v57, %v5577_v19  ;;  %v5731_v6 = vadd.f32 %v4521_v56, %v5586_v45 }
 0x25e   :  { %3302 = vst.msk [vmem:[%s8059_s4 + $0x30] sm:$0xff] %vm3295_vm15, %v1580_v11  ;;  %vm2505_vm10 = vcmp.eq.s32.totalorder %v4661_v10, %v1580_v11  ;;  %vm2506_vm11 = vcmp.eq.s32.totalorder %v4669_v17, %v1580_v11  ;;  %vm1917_vm12 = vcmp.lt.s32.totalorder %v1397_v36, %v1398_v7  ;;  %3979 = vmatmul.msk.f32.gmra.mxu1 %vm178_vm0, %v144_v1  ;;  %v1695_v19 = vand.u32 65535, %v5223_v9 }
 0x25f   :  { %4114 = vmatmul.msk.f32.gmra.mxu2 %vm2505_vm10, %v8190_v12  ;;  %4178 = vmatmul.msk.f32.gmra.mxu3 %vm2506_vm11, %v8190_v12  ;;  %v5719_v0 = vpop.xlane.xlu2 %1683  ;;  %v5721_v60 = vsel %vm1917_vm12, %v1397_v36, %v1398_v7  ;;  %v1153_v45 = vmin.f32 %v5731_v6, %v5727_v43 }
 0x260   :  { %1151 = vmin.xlane.f32.xlu1 %v1150_v31  ;;  %vm1685_vm13 = vcmp.eq.f32.partialorder %v5203_v4, %v5719_v0  ;;  %v1920_v20 = vshra.s32 %v5721_v60, 16  ;;  %3899 = vmatmul.msk.f32.gmra.mxu0 %vm178_vm0, %v144_v1  ;;  %v1595_v31 = vshll.u32 %v1594_v53, 16  ;;  %v1697_v9 = vcvt.s32.f32 %v1695_v19 }
 0x261   :  { %v1592_v11 = vpop.xlane.xlu0 %1591  ;;  %v1686_v16 = vsel %vm1685_vm13, %v1681_v44, inf }
 0x262   :  { %v1593_v58 = vcvt.f32.s32 %v1592_v11  ;;  %1687 = vmin.xlane.f32.xlu0 %v1686_v16  ;;  %v5736_v4 = vcvt.s32.f32 %v1920_v20  ;;  %v5766_v11 = vadd.f32 %v4523_v57, %v5620_v55  ;;  %v5770_v16 = vadd.f32 %v4521_v56, %v5629_v18 }
 0x263   :  { %v1110_v36 = vpop.xlane.xlu1 %1109  ;;  %v5746_v44 = vpop.f32.mrf.mxu1 }
 0x264   :  { %v1596_v7 = vadd.s32 %v1595_v31, %v1593_v58  ;;  %vm1271_vm14 = vcmp.le.f32.partialorder %v5198_v40, %v1110_v36  ;;  %vm1272_vm1 = vcmp.le.f32.partialorder %v5194_v3, %v1110_v36  ;;  %1923 = vmin.xlane.f32.xlu2 %v5736_v4  ;;  %v5754_v3 = vpop.f32.mrf.mxu0  ;;  %8200 = vst [vmem:[#allocation9_spill] sm:$0xff] %v5766_v11 }
 0x265   :  { %v1399_v1 = vsel %vm1271_vm14, %v4661_v10, 256  ;;  %v1400_v53 = vsel %vm1272_vm1, %v4669_v17, 256  ;;  %8201 = vst [vmem:[#allocation10_spill] sm:$0xff] %v5770_v16  ;;  %v1156_v55 = vmin.f32 %v5770_v16, %v5766_v11 }
 0x266   :  { %3303 = vst.msk [vmem:[%s8059_s4 + $0x38] sm:$0xff] %vm3295_vm15, %v1596_v7  ;;  %vm2507_vm2 = vcmp.eq.s32.totalorder %v4661_v10, %v1596_v7  ;;  %vm2508_vm3 = vcmp.eq.s32.totalorder %v4669_v17, %v1596_v7  ;;  %vm1933_vm4 = vcmp.lt.s32.totalorder %v1399_v1, %v1400_v53  ;;  %v1711_v7 = vand.u32 65535, %v5252_v47 }
 0x267   :  { %4115 = vmatmul.msk.f32.gmra.mxu2 %vm2507_vm2, %v8190_v12  ;;  %4179 = vmatmul.msk.f32.gmra.mxu3 %vm2508_vm3, %v8190_v12  ;;  %v5758_v40 = vpop.xlane.xlu2 %1699  ;;  %v5760_v20 = vsel %vm1933_vm4, %v1399_v1, %v1400_v53 }
 0x268   :  { %1154 = vmin.xlane.f32.xlu1 %v1153_v45  ;;  %vm1701_vm5 = vcmp.eq.f32.partialorder %v5236_v38, %v5758_v40  ;;  %v1936_v31 = vshra.s32 %v5760_v20, 16  ;;  %v8202_v45 = vld [vmem:[#allocation12_spill] sm:$0xff]  ;;  %v8203_v38 = vld [vmem:[#allocation11_spill] sm:$0xff]  ;;  %v1713_v47 = vcvt.s32.f32 %v1711_v7 }
 0x269   :  { %v1702_v58 = vsel %vm1701_vm5, %v1697_v9, inf }
 0x26a   :  { %1703 = vmin.xlane.f32.xlu0 %v1702_v58  ;;  %v5773_v36 = vcvt.s32.f32 %v1936_v31 }
 0x26b   :  { %v1113_v19 = vpop.xlane.xlu1 %1112  ;;  %v5783_v53 = vpop.f32.mrf.mxu1 }
 0x26c   :  { %vm1273_vm6 = vcmp.le.f32.partialorder %v8202_v45, %v1113_v19  ;;  %vm1274_vm7 = vcmp.le.f32.partialorder %v8203_v38, %v1113_v19  ;;  %1939 = vmin.xlane.f32.xlu2 %v5773_v36  ;;  %v5785_v9 = vpop.f32.mrf.mxu0  ;;  %v5795_v19 = vadd.f32 %v4523_v57, %v5663_v2  ;;  %v5799_v45 = vadd.f32 %v4521_v56, %v5672_v26 }
 0x26d   :  { %v1401_v18 = vsel %vm1273_vm6, %v4661_v10, 256  ;;  %v1402_v1 = vsel %vm1274_vm7, %v4669_v17, 256 }
 0x26e   :  { %vm1949_vm8 = vcmp.lt.s32.totalorder %v1401_v18, %v1402_v1  ;;  %8204 = vst [vmem:[#allocation12_spill] sm:$0xff] %v5795_v19  ;;  %v1159_v2 = vmin.f32 %v5799_v45, %v5795_v19 }
 0x26f   :  { %v5787_v31 = vpop.xlane.xlu2 %1715  ;;  %v5789_v58 = vsel %vm1949_vm8, %v1401_v18, %v1402_v1  ;;  %8205 = vst [vmem:[#allocation11_spill] sm:$0xff] %v5799_v45  ;;  %v8207_v18 = vld [vmem:[#allocation14_spill] sm:$0xff] }
 0x270   :  { %1157 = vmin.xlane.f32.xlu1 %v1156_v55  ;;  %vm1717_vm9 = vcmp.eq.f32.partialorder %v5265_v39, %v5787_v31  ;;  %v1952_v38 = vshra.s32 %v5789_v58, 16  ;;  %v1727_v55 = vand.u32 65535, %v5281_v51  ;;  %v8208_v39 = vld [vmem:[#allocation13_spill] sm:$0xff] }
 0x271   :  { %v1718_v11 = vsel %vm1717_vm9, %v1713_v47, inf }
 0x272   :  { %1719 = vmin.xlane.f32.xlu0 %v1718_v11  ;;  %v5802_v16 = vcvt.s32.f32 %v1952_v38  ;;  %v1729_v51 = vcvt.s32.f32 %v1727_v55 }
 0x273   :  { %v1116_v7 = vpop.xlane.xlu1 %1115  ;;  %v5812_v47 = vpop.f32.mrf.mxu1 }
 0x274   :  { %8206 = vst [vmem:[#allocation31_spill] sm:$0xff] %v5802_v16  ;;  %vm1275_vm10 = vcmp.le.f32.partialorder %v8207_v18, %v1116_v7  ;;  %vm1276_vm11 = vcmp.le.f32.partialorder %v8208_v39, %v1116_v7  ;;  %1955 = vmin.xlane.f32.xlu2 %v5802_v16  ;;  %v5814_v11 = vpop.f32.mrf.mxu0  ;;  %v5824_v7 = vadd.f32 %v4523_v57, %v5706_v25 }
 0x275   :  { %v1403_v26 = vsel %vm1275_vm10, %v4661_v10, 256  ;;  %v1404_v1 = vsel %vm1276_vm11, %v4669_v17, 256  ;;  %v5828_v39 = vadd.f32 %v4521_v56, %v5715_v33 }
 0x276   :  { %vm1965_vm12 = vcmp.lt.s32.totalorder %v1403_v26, %v1404_v1  ;;  %8209 = vst [vmem:[#allocation14_spill] sm:$0xff] %v5824_v7 }
 0x277   :  { %v5816_v38 = vpop.xlane.xlu2 %1731  ;;  %v5818_v18 = vsel %vm1965_vm12, %v1403_v26, %v1404_v1  ;;  %8210 = vst [vmem:[#allocation13_spill] sm:$0xff] %v5828_v39  ;;  %v8212_v26 = vld [vmem:[#allocation16_spill] sm:$0xff]  ;;  %v1162_v25 = vmin.f32 %v5828_v39, %v5824_v7 }
 0x278   :  { %1160 = vmin.xlane.f32.xlu1 %v1159_v2  ;;  %vm1733_vm13 = vcmp.eq.f32.partialorder %v5294_v59, %v5816_v38  ;;  %v1968_v19 = vshra.s32 %v5818_v18, 16  ;;  %v1743_v2 = vand.u32 65535, %v5310_v62  ;;  %v8213_v59 = vld [vmem:[#allocation15_spill] sm:$0xff] }
 0x279   :  { %v1734_v45 = vsel %vm1733_vm13, %v1729_v51, inf }
 0x27a   :  { %1735 = vmin.xlane.f32.xlu0 %v1734_v45  ;;  %v5831_v16 = vcvt.s32.f32 %v1968_v19  ;;  %v1745_v62 = vcvt.s32.f32 %v1743_v2 }
 0x27b   :  { %v1119_v55 = vpop.xlane.xlu1 %1118  ;;  %v5841_v51 = vpop.f32.mrf.mxu1 }
 0x27c   :  { %8211 = vst [vmem:[#allocation32_spill] sm:$0xff] %v5831_v16  ;;  %vm1277_vm14 = vcmp.le.f32.partialorder %v8212_v26, %v1119_v55  ;;  %vm1278_vm1 = vcmp.le.f32.partialorder %v8213_v59, %v1119_v55  ;;  %1971 = vmin.xlane.f32.xlu2 %v5831_v16  ;;  %v5843_v19 = vpop.f32.mrf.mxu0  ;;  %v5853_v55 = vadd.f32 %v4523_v57, %v5746_v44 }
 0x27d   :  { %v1405_v33 = vsel %vm1277_vm14, %v4661_v10, 256  ;;  %v1406_v1 = vsel %vm1278_vm1, %v4669_v17, 256  ;;  %v5857_v59 = vadd.f32 %v4521_v56, %v5754_v3 }
 0x27e   :  { %vm1981_vm2 = vcmp.lt.s32.totalorder %v1405_v33, %v1406_v1  ;;  %8214 = vst [vmem:[#allocation16_spill] sm:$0xff] %v5853_v55 }
 0x27f   :  { %v5845_v45 = vpop.xlane.xlu2 %1747  ;;  %v5847_v26 = vsel %vm1981_vm2, %v1405_v33, %v1406_v1  ;;  %8215 = vst [vmem:[#allocation15_spill] sm:$0xff] %v5857_v59  ;;  %v8217_v33 = vld [vmem:[#allocation18_spill] sm:$0xff]  ;;  %v1165_v44 = vmin.f32 %v5857_v59, %v5853_v55 }
 0x280   :  { %1163 = vmin.xlane.f32.xlu1 %v1162_v25  ;;  %vm1749_vm3 = vcmp.eq.f32.partialorder %v5323_v13, %v5845_v45  ;;  %v1984_v7 = vshra.s32 %v5847_v26, 16  ;;  %v1759_v25 = vand.u32 65535, %v5339_v24  ;;  %v8218_v13 = vld [vmem:[#allocation17_spill] sm:$0xff] }
 0x281   :  { %v1750_v39 = vsel %vm1749_vm3, %v1745_v62, inf }
 0x282   :  { %1751 = vmin.xlane.f32.xlu0 %v1750_v39  ;;  %v5860_v16 = vcvt.s32.f32 %v1984_v7  ;;  %v1761_v39 = vcvt.s32.f32 %v1759_v25 }
 0x283   :  { %v1122_v2 = vpop.xlane.xlu1 %1121  ;;  %v5870_v62 = vpop.f32.mrf.mxu1 }
 0x284   :  { %8216 = vst [vmem:[#allocation33_spill] sm:$0xff] %v5860_v16  ;;  %vm1279_vm4 = vcmp.le.f32.partialorder %v8217_v33, %v1122_v2  ;;  %vm1280_vm5 = vcmp.le.f32.partialorder %v8218_v13, %v1122_v2  ;;  %1987 = vmin.xlane.f32.xlu2 %v5860_v16  ;;  %v5876_v33 = vpop.f32.mrf.mxu0  ;;  %v5882_v2 = vadd.f32 %v4523_v57, %v5783_v53  ;;  %v8224_v16 = vld [vmem:[#allocation20_spill] sm:$0xff] }
 0x285   :  { %v1407_v3 = vsel %vm1279_vm4, %v4661_v10, 256  ;;  %v1408_v1 = vsel %vm1280_vm5, %v4669_v17, 256  ;;  %v5886_v13 = vadd.f32 %v4521_v56, %v5785_v9 }
 0x286   :  { %vm1997_vm6 = vcmp.lt.s32.totalorder %v1407_v3, %v1408_v1  ;;  %8220 = vst [vmem:[#allocation17_spill] sm:$0xff] %v5882_v2 }
 0x287   :  { %v5872_v7 = vpop.xlane.xlu2 %1763  ;;  %v5874_v24 = vsel %vm1997_vm6, %v1407_v3, %v1408_v1  ;;  %8221 = vst [vmem:[#allocation34_spill] sm:$0xff] %v5886_v13  ;;  %v8223_v1 = vld [vmem:[#allocation21_spill] sm:$0xff]  ;;  %v1168_v53 = vmin.f32 %v5886_v13, %v5882_v2 }
 0x288   :  { %8219 = vst [vmem:[#allocation18_spill] sm:$0xff] %v5874_v24  ;;  %1166 = vmin.xlane.f32.xlu1 %v1165_v44  ;;  %vm1765_vm7 = vcmp.eq.f32.partialorder %v5352_v61, %v5872_v7  ;;  %v2000_v55 = vshra.s32 %v5874_v24, 16  ;;  %v1775_v44 = vand.u32 65535, %v8223_v1  ;;  %v8225_v61 = vld [vmem:[#allocation19_spill] sm:$0xff] }
 0x289   :  { %v1766_v59 = vsel %vm1765_vm7, %v1761_v39, inf }
 0x28a   :  { %1767 = vmin.xlane.f32.xlu0 %v1766_v59  ;;  %v5889_v25 = vcvt.s32.f32 %v2000_v55  ;;  %v1777_v55 = vcvt.s32.f32 %v1775_v44 }
 0x28b   :  { %v1125_v3 = vpop.xlane.xlu1 %1124  ;;  %v5903_v1 = vpop.f32.mrf.mxu1 }
 0x28c   :  { %8222 = vst [vmem:[#allocation35_spill] sm:$0xff] %v5889_v25  ;;  %vm1281_vm8 = vcmp.le.f32.partialorder %v8224_v16, %v1125_v3  ;;  %vm1282_vm9 = vcmp.le.f32.partialorder %v8225_v61, %v1125_v3  ;;  %2003 = vmin.xlane.f32.xlu2 %v5889_v25  ;;  %v5909_v16 = vadd.f32 %v4523_v57, %v5812_v47  ;;  %v643_v44 = vpop.f32.mrf.mxu0  ;;  %v8231_v25 = vld [vmem:[#allocation23_spill] sm:$0xff] }
 0x28d   :  { %v1409_v9 = vsel %vm1281_vm8, %v4661_v10, 256  ;;  %v1410_v24 = vsel %vm1282_vm9, %v4669_v17, 256  ;;  %v5913_v3 = vadd.f32 %v4521_v56, %v5814_v11 }
 0x28e   :  { %vm2013_vm10 = vcmp.lt.s32.totalorder %v1409_v9, %v1410_v24  ;;  %8227 = vst [vmem:[#allocation20_spill] sm:$0xff] %v5909_v16 }
 0x28f   :  { %v5899_v59 = vpop.xlane.xlu2 %1779  ;;  %v5901_v39 = vsel %vm2013_vm10, %v1409_v9, %v1410_v24  ;;  %8228 = vst [vmem:[#allocation19_spill] sm:$0xff] %v5913_v3  ;;  %v1171_v47 = vmin.f32 %v5913_v3, %v5909_v16 }
 0x290   :  { %8226 = vst [vmem:[#allocation21_spill] sm:$0xff] %v5901_v39  ;;  %1169 = vmin.xlane.f32.xlu1 %v1168_v53  ;;  %vm1781_vm11 = vcmp.eq.f32.partialorder %v5381_v50, %v5899_v59  ;;  %v2016_v61 = vshra.s32 %v5901_v39, 16  ;;  %v8230_v53 = vld [vmem:[#allocation2_spill] sm:$0xff] }
 0x291   :  { %v1782_v2 = vsel %vm1781_vm11, %v1777_v55, inf  ;;  %v1791_v13 = vand.u32 65535, %v8230_v53  ;;  %v8232_v50 = vld [vmem:[#allocation22_spill] sm:$0xff]  ;;  %v5938_v53 = vadd.f32 %v4521_v56, %v5843_v19 }
 0x292   :  { %1783 = vmin.xlane.f32.xlu0 %v1782_v2  ;;  %v5916_v24 = vcvt.s32.f32 %v2016_v61 }
 0x293   :  { %v1128_v9 = vpop.xlane.xlu1 %1127  ;;  %v1793_v61 = vcvt.s32.f32 %v1791_v13  ;;  %8236 = vst [vmem:[#allocation22_spill] sm:$0xff] %v5938_v53  ;;  %v855_v3 = vpop.f32.mrf.mxu1 }
 0x294   :  { %8229 = vst [vmem:[#allocation36_spill] sm:$0xff] %v5916_v24  ;;  %vm1283_vm12 = vcmp.le.f32.partialorder %v8231_v25, %v1128_v9  ;;  %vm1284_vm13 = vcmp.le.f32.partialorder %v8232_v50, %v1128_v9  ;;  %2019 = vmin.xlane.f32.xlu2 %v5916_v24  ;;  %v8234_v25 = vld [vmem:[#allocation26_spill] sm:$0xff]  ;;  %v5934_v9 = vadd.f32 %v4523_v57, %v5841_v51  ;;  %v5944_v24 = vpop.f32.mrf.mxu0  ;;  %v8240_v51 = vld [vmem:[#allocation24_spill] sm:$0xff] }
 0x295   :  { %v1411_v11 = vsel %vm1283_vm12, %v4661_v10, 256  ;;  %v1412_v55 = vsel %vm1284_vm13, %v4669_v17, 256 }
 0x296   :  { %vm2029_vm14 = vcmp.lt.s32.totalorder %v1411_v11, %v1412_v55  ;;  %8235 = vst [vmem:[#allocation23_spill] sm:$0xff] %v5934_v9  ;;  %v1174_v19 = vmin.f32 %v5938_v53, %v5934_v9 }
 0x297   :  { %v5926_v2 = vpop.xlane.xlu2 %1795  ;;  %v5928_v39 = vsel %vm2029_vm14, %v1411_v11, %v1412_v55 }
 0x298   :  { %8233 = vst [vmem:[#allocation2_spill] sm:$0xff] %v5928_v39  ;;  %1172 = vmin.xlane.f32.xlu1 %v1171_v47  ;;  %vm1797_vm1 = vcmp.eq.f32.partialorder %v8234_v25, %v5926_v2  ;;  %v2032_v50 = vshra.s32 %v5928_v39, 16  ;;  %v8238_v47 = vld [vmem:[#allocation28_spill] sm:$0xff]  ;;  %v8239_v25 = vld [vmem:[#allocation25_spill] sm:$0xff] }
 0x299   :  { %v1798_v16 = vsel %vm1797_vm1, %v1793_v61, inf  ;;  %v1807_v55 = vand.u32 65535, %v8238_v47 }
 0x29a   :  { %1799 = vmin.xlane.f32.xlu0 %v1798_v16  ;;  %v5941_v13 = vcvt.s32.f32 %v2032_v50 }
 0x29b   :  { %v1131_v11 = vpop.xlane.xlu1 %1130  ;;  %v1809_v39 = vcvt.s32.f32 %v1807_v55 }
 0x29c   :  { %8237 = vst [vmem:[#allocation26_spill] sm:$0xff] %v5941_v13  ;;  %vm1285_vm2 = vcmp.le.f32.partialorder %v8239_v25, %v1131_v11  ;;  %vm1286_vm3 = vcmp.le.f32.partialorder %v8240_v51, %v1131_v11  ;;  %2035 = vmin.xlane.f32.xlu2 %v5941_v13  ;;  %v8242_v25 = vld [vmem:[#allocation29_spill] sm:$0xff]  ;;  %v5961_v11 = vadd.f32 %v4523_v57, %v5870_v62 }
 0x29d   :  { %v1413_v61 = vsel %vm1285_vm2, %v4661_v10, 256  ;;  %v1414_v16 = vsel %vm1286_vm3, %v4669_v17, 256  ;;  %v5965_v51 = vadd.f32 %v4521_v56, %v5876_v33 }
 0x29e   :  { %vm2045_vm4 = vcmp.lt.s32.totalorder %v1413_v61, %v1414_v16  ;;  %8243 = vst [vmem:[#allocation25_spill] sm:$0xff] %v5961_v11 }
 0x29f   :  { %v5953_v50 = vpop.xlane.xlu2 %1811  ;;  %v5955_v47 = vsel %vm2045_vm4, %v1413_v61, %v1414_v16  ;;  %8244 = vst [vmem:[#allocation24_spill] sm:$0xff] %v5965_v51  ;;  %v5971_v61 = vpop.f32.mrf.mxu1  ;;  %v8245_v16 = vld [vmem:[#allocation27_spill] sm:$0xff]  ;;  %v1177_v62 = vmin.f32 %v5965_v51, %v5961_v11  ;;  %v1610_v51 = vcvt.f32.s32 %v5504_v30 }
 0x2a0   :  { %8241 = vst [vmem:[#allocation28_spill] sm:$0xff] %v5955_v47  ;;  %1175 = vmin.xlane.f32.xlu1 %v1174_v19  ;;  %vm1813_vm5 = vcmp.eq.f32.partialorder %v8242_v25, %v5953_v50  ;;  %v2048_v9 = vshra.s32 %v5955_v47, 16  ;;  %v1823_v19 = vand.u32 65535, %v5473_v22  ;;  %v8246_v25 = vld [vmem:[#allocation5_spill] sm:$0xff] }
 0x2a1   :  { %v1814_v53 = vsel %vm1813_vm5, %v1809_v39, inf }
 0x2a2   :  { %1815 = vmin.xlane.f32.xlu0 %v1814_v53  ;;  %v5968_v13 = vcvt.s32.f32 %v2048_v9  ;;  %v5980_v9 = vpop.f32.mrf.mxu0  ;;  %v1825_v22 = vcvt.s32.f32 %v1823_v19 }
 0x2a3   :  { %v1134_v55 = vpop.xlane.xlu1 %1133 }
 0x2a4   :  { %vm1287_vm6 = vcmp.le.f32.partialorder %v8245_v16, %v1134_v55  ;;  %vm1288_vm7 = vcmp.le.f32.partialorder %v8246_v25, %v1134_v55  ;;  %2051 = vmin.xlane.f32.xlu2 %v5968_v13  ;;  %v5990_v55 = vadd.f32 %v4523_v57, %v5903_v1  ;;  %v5993_v16 = vadd.f32 %v4521_v56, %v643_v44 }
 0x2a5   :  { %v1415_v33 = vsel %vm1287_vm6, %v4661_v10, 256  ;;  %v1416_v39 = vsel %vm1288_vm7, %v4669_v17, 256 }
 0x2a6   :  { %vm2061_vm8 = vcmp.lt.s32.totalorder %v1415_v33, %v1416_v39  ;;  %8248 = vst [vmem:[#allocation27_spill] sm:$0xff] %v5990_v55  ;;  %v1180_v1 = vmin.f32 %v5993_v16, %v5990_v55 }
 0x2a7   :  { %v5982_v53 = vpop.xlane.xlu2 %1827  ;;  %v5984_v47 = vsel %vm2061_vm8, %v1415_v33, %v1416_v39  ;;  %8249 = vst [vmem:[#allocation5_spill] sm:$0xff] %v5993_v16  ;;  %v8251_v39 = vld [vmem:[#allocation3_spill] sm:$0xff] }
 0x2a8   :  { %8247 = vst [vmem:[#allocation29_spill] sm:$0xff] %v5984_v47  ;;  %1178 = vmin.xlane.f32.xlu1 %v1177_v62  ;;  %vm1829_vm9 = vcmp.eq.f32.partialorder %v5478_v41, %v5982_v53  ;;  %v2064_v25 = vshra.s32 %v5984_v47, 16  ;;  %v1839_v62 = vand.u32 65535, %v5514_v15  ;;  %v8252_v41 = vld [vmem:[#allocation4_spill] sm:$0xff] }
 0x2a9   :  { %v1830_v11 = vsel %vm1829_vm9, %v1825_v22, inf }
 0x2aa   :  { %1831 = vmin.xlane.f32.xlu0 %v1830_v11  ;;  %v5997_v19 = vcvt.s32.f32 %v2064_v25  ;;  %v6007_v11 = vpop.f32.mrf.mxu1  ;;  %v1611_v25 = vshll.u32 %v1610_v51, 16  ;;  %v6022_v51 = vadd.f32 %v4521_v56, %v5944_v24 }
 0x2ab   :  { %v1137_v33 = vpop.xlane.xlu1 %1136 }
 0x2ac   :  { %8250 = vst [vmem:[#allocation37_spill] sm:$0xff] %v5997_v19  ;;  %vm1289_vm10 = vcmp.le.f32.partialorder %v8251_v39, %v1137_v33  ;;  %vm1290_vm11 = vcmp.le.f32.partialorder %v8252_v41, %v1137_v33  ;;  %2067 = vmin.xlane.f32.xlu2 %v5997_v19  ;;  %v1841_v39 = vcvt.s32.f32 %v1839_v62  ;;  %v6012_v33 = vadd.f32 %v4523_v57, %v855_v3  ;;  %v6016_v19 = vpop.f32.mrf.mxu0 }
 0x2ad   :  { %v1417_v44 = vsel %vm1289_vm10, %v4661_v10, 256  ;;  %v1418_v22 = vsel %vm1290_vm11, %v4669_v17, 256  ;;  %v1608_v30 = vpop.xlane.xlu0 %1607  ;;  %v1626_v62 = vcvt.f32.s32 %v5547_v48 }
 0x2ae   :  { %v1609_v47 = vcvt.f32.s32 %v1608_v30  ;;  %vm2077_vm12 = vcmp.lt.s32.totalorder %v1417_v44, %v1418_v22 }
 0x2af   :  { %v6009_v15 = vpop.xlane.xlu2 %1843  ;;  %v6014_v41 = vsel %vm2077_vm12, %v1417_v44, %v1418_v22  ;;  %v8254_v44 = vld [vmem:[#allocation30_spill] sm:$0xff] }
 0x2b0   :  { %v1612_v55 = vadd.s32 %v1611_v25, %v1609_v47  ;;  %1181 = vmin.xlane.f32.xlu1 %v1180_v1  ;;  %vm1845_vm13 = vcmp.eq.f32.partialorder %v5521_v14, %v6009_v15  ;;  %v2080_v30 = vshra.s32 %v6014_v41, 16  ;;  %v1855_v1 = vand.u32 65535, %v5557_v27 }
 0x2b1   :  { %v1846_v16 = vsel %vm1845_vm13, %v1841_v39, inf  ;;  %v1627_v25 = vshll.u32 %v1626_v62, 16  ;;  %v6065_v62 = vadd.f32 %v4521_v56, %v5980_v9 }
 0x2b2   :  { %3304 = vst.msk [vmem:[%s8059_s4 + $0x40] sm:$0xff] %vm3295_vm15, %v1612_v55  ;;  %v2894_v3 = vpop.f32.mrf.mxu2  ;;  %v3103_v47 = vpop.f32.mrf.mxu3  ;;  %1847 = vmin.xlane.f32.xlu0 %v1846_v16  ;;  %vm2509_vm14 = vcmp.eq.s32.totalorder %v4661_v10, %v1612_v55  ;;  %vm2510_vm1 = vcmp.eq.s32.totalorder %v4669_v17, %v1612_v55  ;;  %v6032_v14 = vcvt.s32.f32 %v2080_v30  ;;  %v1183_v55 = vmin.f32 %v6022_v51, %v6012_v33 }
 0x2b3   :  { %v6034_v24 = vadd.f32 %v3103_v47, %v2894_v3  ;;  %4116 = vmatmul.msk.f32.gmra.mxu2 %vm2509_vm14, %v8190_v12  ;;  %4180 = vmatmul.msk.f32.gmra.mxu3 %vm2510_vm1, %v8190_v12  ;;  %v1140_v48 = vpop.xlane.xlu1 %1139  ;;  %v1857_v30 = vcvt.s32.f32 %v1855_v1  ;;  %v6055_v3 = vadd.f32 %v4523_v57, %v5971_v61  ;;  %v1642_v61 = vcvt.f32.s32 %v5590_v63 }
 0x2b4   :  { %vm1291_vm2 = vcmp.le.f32.partialorder %v5512_v32, %v1140_v48  ;;  %vm1292_vm3 = vcmp.le.f32.partialorder %v8254_v44, %v1140_v48  ;;  %2083 = vmin.xlane.f32.xlu2 %v6032_v14  ;;  %v6059_v48 = vpop.f32.mrf.mxu1 }
 0x2b5   :  { %8253 = vst [vmem:[#allocation3_spill] sm:$0xff] %v6034_v24  ;;  %v1419_v16 = vsel %vm1291_vm2, %v4661_v10, 256  ;;  %v1420_v22 = vsel %vm1292_vm3, %v4669_v17, 256  ;;  %v1624_v27 = vpop.xlane.xlu0 %1623 }
 0x2b6   :  { %3360 = vst.msk [vmem:[%s8060_s3] sm:$0xff] %vm178_vm0, %v6034_v24  ;;  %v1625_v32 = vcvt.f32.s32 %v1624_v27  ;;  %vm2093_vm4 = vcmp.lt.s32.totalorder %v1419_v16, %v1420_v22  ;;  %v6068_v24 = vpop.f32.mrf.mxu0 }
 0x2b7   :  { %v6051_v39 = vpop.xlane.xlu2 %1859  ;;  %8255 = vst [vmem:[#allocation4_spill] sm:$0xff] %v6055_v3  ;;  %v6057_v47 = vsel %vm2093_vm4, %v1419_v16, %v1420_v22  ;;  %v1871_v22 = vand.u32 65535, %v5600_v52 }
 0x2b8   :  { %v1628_v44 = vadd.s32 %v1627_v25, %v1625_v32  ;;  %1184 = vmin.xlane.f32.xlu1 %v1183_v55  ;;  %vm1861_vm5 = vcmp.eq.f32.partialorder %v5564_v21, %v6051_v39  ;;  %v2096_v27 = vshra.s32 %v6057_v47, 16  ;;  %v8257_v25 = vld [vmem:[#allocation6_spill] sm:$0xff]  ;;  %v1186_v32 = vmin.f32 %v6065_v62, %v6055_v3 }
 0x2b9   :  { %v1862_v1 = vsel %vm1861_vm5, %v1857_v30, inf }
 0x2ba   :  { %3305 = vst.msk [vmem:[%s8059_s4 + $0x48] sm:$0xff] %vm3295_vm15, %v1628_v44  ;;  %v2897_v55 = vpop.f32.mrf.mxu2  ;;  %v3106_v16 = vpop.f32.mrf.mxu3  ;;  %1863 = vmin.xlane.f32.xlu0 %v1862_v1  ;;  %vm2511_vm6 = vcmp.eq.s32.totalorder %v4661_v10, %v1628_v44  ;;  %vm2512_vm7 = vcmp.eq.s32.totalorder %v4669_v17, %v1628_v44  ;;  %v6077_v21 = vcvt.s32.f32 %v2096_v27  ;;  %v1643_v27 = vshll.u32 %v1642_v61, 16 }
 0x2bb   :  { %v6079_v9 = vadd.f32 %v3106_v16, %v2897_v55  ;;  %4117 = vmatmul.msk.f32.gmra.mxu2 %vm2511_vm6, %v8190_v12  ;;  %4181 = vmatmul.msk.f32.gmra.mxu3 %vm2512_vm7, %v8190_v12  ;;  %v1143_v63 = vpop.xlane.xlu1 %1142  ;;  %v1873_v55 = vcvt.s32.f32 %v1871_v22  ;;  %v6100_v16 = vadd.f32 %v4523_v57, %v6007_v11  ;;  %v1658_v22 = vcvt.f32.s32 %v5633_v46 }
 0x2bc   :  { %vm1293_vm8 = vcmp.le.f32.partialorder %v5555_v29, %v1143_v63  ;;  %vm1294_vm9 = vcmp.le.f32.partialorder %v8257_v25, %v1143_v63  ;;  %2099 = vmin.xlane.f32.xlu2 %v6077_v21  ;;  %v6111_v3 = vpop.f32.mrf.mxu1 }
 0x2bd   :  { %8256 = vst [vmem:[#allocation30_spill] sm:$0xff] %v6079_v9  ;;  %v1421_v30 = vsel %vm1293_vm8, %v4661_v10, 256  ;;  %v1422_v44 = vsel %vm1294_vm9, %v4669_v17, 256  ;;  %v1640_v52 = vpop.xlane.xlu0 %1639 }
 0x2be   :  { %3361 = vst.msk [vmem:[%s8060_s3 + $0x8] sm:$0xff] %vm178_vm0, %v6079_v9  ;;  %v1641_v29 = vcvt.f32.s32 %v1640_v52  ;;  %vm2109_vm10 = vcmp.lt.s32.totalorder %v1421_v30, %v1422_v44  ;;  %v6108_v9 = vadd.f32 %v4521_v56, %v6016_v19 }
 0x2bf   :  { %v6096_v1 = vpop.xlane.xlu2 %1875  ;;  %v6102_v63 = vsel %vm2109_vm10, %v1421_v30, %v1422_v44  ;;  %v1887_v30 = vand.u32 65535, %v5643_v5  ;;  %v658_v44 = vpop.f32.mrf.mxu0 }
 0x2c0   :  { %v1644_v25 = vadd.s32 %v1643_v27, %v1641_v29  ;;  %1187 = vmin.xlane.f32.xlu1 %v1186_v32  ;;  %vm1877_vm11 = vcmp.eq.f32.partialorder %v5607_v54, %v6096_v1  ;;  %v2112_v61 = vshra.s32 %v6102_v63, 16  ;;  %v8259_v27 = vld [vmem:[#allocation7_spill] sm:$0xff]  ;;  %v1189_v29 = vmin.f32 %v6108_v9, %v6100_v16 }
 0x2c1   :  { %v1878_v52 = vsel %vm1877_vm11, %v1873_v55, inf }
 0x2c2   :  { %3306 = vst.msk [vmem:[%s8059_s4 + $0x50] sm:$0xff] %vm3295_vm15, %v1644_v25  ;;  %v2900_v11 = vpop.f32.mrf.mxu2  ;;  %v3109_v32 = vpop.f32.mrf.mxu3  ;;  %1879 = vmin.xlane.f32.xlu0 %v1878_v52  ;;  %vm2513_vm12 = vcmp.eq.s32.totalorder %v4661_v10, %v1644_v25  ;;  %vm2514_vm13 = vcmp.eq.s32.totalorder %v4669_v17, %v1644_v25  ;;  %v6120_v54 = vcvt.s32.f32 %v2112_v61  ;;  %v1659_v61 = vshll.u32 %v1658_v22, 16 }
 0x2c3   :  { %v6122_v19 = vadd.f32 %v3109_v32, %v2900_v11  ;;  %4118 = vmatmul.msk.f32.gmra.mxu2 %vm2513_vm12, %v8190_v12  ;;  %4182 = vmatmul.msk.f32.gmra.mxu3 %vm2514_vm13, %v8190_v12  ;;  %v1146_v46 = vpop.xlane.xlu1 %1145  ;;  %v1889_v11 = vcvt.s32.f32 %v1887_v30  ;;  %v6143_v32 = vadd.f32 %v4523_v57, %v6059_v48  ;;  %v1674_v30 = vcvt.f32.s32 %v5676_v49 }
 0x2c4   :  { %vm1295_vm14 = vcmp.le.f32.partialorder %v5598_v34, %v1146_v46  ;;  %vm1296_vm1 = vcmp.le.f32.partialorder %v8259_v27, %v1146_v46  ;;  %2115 = vmin.xlane.f32.xlu2 %v6120_v54 }
 0x2c5   :  { %8258 = vst [vmem:[#allocation6_spill] sm:$0xff] %v6122_v19  ;;  %v1423_v55 = vsel %vm1295_vm14, %v4661_v10, 256  ;;  %v1424_v5 = vsel %vm1296_vm1, %v4669_v17, 256  ;;  %v1656_v25 = vpop.xlane.xlu0 %1655 }
 0x2c6   :  { %3362 = vst.msk [vmem:[%s8060_s3 + $0x10] sm:$0xff] %vm178_vm0, %v6122_v19  ;;  %v1657_v34 = vcvt.f32.s32 %v1656_v25  ;;  %vm2125_vm2 = vcmp.lt.s32.totalorder %v1423_v55, %v1424_v5  ;;  %v6151_v19 = vadd.f32 %v4521_v56, %v6068_v24 }
 0x2c7   :  { %v6139_v52 = vpop.xlane.xlu2 %1891  ;;  %8260 = vst [vmem:[#allocation7_spill] sm:$0xff] %v6143_v32  ;;  %v6145_v46 = vsel %vm2125_vm2, %v1423_v55, %v1424_v5  ;;  %v870_v5 = vpop.f32.mrf.mxu1 }
 0x2c8   :  { %v1660_v27 = vadd.s32 %v1659_v61, %v1657_v34  ;;  %1190 = vmin.xlane.f32.xlu1 %v1189_v29  ;;  %vm1893_vm3 = vcmp.eq.f32.partialorder %v5650_v23, %v6139_v52  ;;  %8261 = vst [vmem:[#allocation38_spill] sm:$0xff] %v6151_v19  ;;  %v2128_v22 = vshra.s32 %v6145_v46, 16  ;;  %v1903_v29 = vand.u32 65535, %v5686_v35  ;;  %v8263_v61 = vld [vmem:[#allocation8_spill] sm:$0xff] }
 0x2c9   :  { %v1894_v25 = vsel %vm1893_vm3, %v1889_v11, inf  ;;  %v1192_v34 = vmin.f32 %v6151_v19, %v6143_v32  ;;  %v1690_v19 = vcvt.f32.s32 %v5719_v0 }
 0x2ca   :  { %3307 = vst.msk [vmem:[%s8059_s4 + $0x58] sm:$0xff] %vm3295_vm15, %v1660_v27  ;;  %v2903_v48 = vpop.f32.mrf.mxu2  ;;  %v3112_v55 = vpop.f32.mrf.mxu3  ;;  %1895 = vmin.xlane.f32.xlu0 %v1894_v25  ;;  %vm2515_vm4 = vcmp.eq.s32.totalorder %v4661_v10, %v1660_v27  ;;  %vm2516_vm5 = vcmp.eq.s32.totalorder %v4669_v17, %v1660_v27  ;;  %v6161_v23 = vcvt.s32.f32 %v2128_v22 }
 0x2cb   :  { %v6163_v24 = vadd.f32 %v3112_v55, %v2903_v48  ;;  %4119 = vmatmul.msk.f32.gmra.mxu2 %vm2515_vm4, %v8190_v12  ;;  %4183 = vmatmul.msk.f32.gmra.mxu3 %vm2516_vm5, %v8190_v12  ;;  %v1149_v49 = vpop.xlane.xlu1 %1148  ;;  %v661_v22 = vpop.f32.mrf.mxu0  ;;  %v1905_v55 = vcvt.s32.f32 %v1903_v29 }
 0x2cc   :  { %vm1297_vm6 = vcmp.le.f32.partialorder %v5641_v28, %v1149_v49  ;;  %vm1298_vm7 = vcmp.le.f32.partialorder %v8263_v61, %v1149_v49  ;;  %2131 = vmin.xlane.f32.xlu2 %v6161_v23  ;;  %v1675_v28 = vshll.u32 %v1674_v30, 16  ;;  %v6184_v49 = vadd.f32 %v4523_v57, %v6111_v3 }
 0x2cd   :  { %8262 = vst [vmem:[#allocation39_spill] sm:$0xff] %v6163_v24  ;;  %v1425_v11 = vsel %vm1297_vm6, %v4661_v10, 256  ;;  %v1426_v35 = vsel %vm1298_vm7, %v4669_v17, 256  ;;  %v1672_v27 = vpop.xlane.xlu0 %1671 }
 0x2ce   :  { %3363 = vst.msk [vmem:[%s8060_s3 + $0x18] sm:$0xff] %vm178_vm0, %v6163_v24  ;;  %vm2141_vm8 = vcmp.lt.s32.totalorder %v1425_v11, %v1426_v35  ;;  %v1673_v25 = vcvt.f32.s32 %v1672_v27  ;;  %v6191_v24 = vadd.f32 %v4521_v56, %v658_v44 }
 0x2cf   :  { %v6180_v48 = vpop.xlane.xlu2 %1907  ;;  %v6186_v61 = vsel %vm2141_vm8, %v1425_v11, %v1426_v35 }
 0x2d0   :  { %v1676_v32 = vadd.s32 %v1675_v28, %v1673_v25  ;;  %1193 = vmin.xlane.f32.xlu1 %v1192_v34  ;;  %vm1909_vm9 = vcmp.eq.f32.partialorder %v5693_v42, %v6180_v48  ;;  %v2144_v30 = vshra.s32 %v6186_v61, 16  ;;  %v1919_v34 = vand.u32 65535, %v5721_v60  ;;  %v873_v28 = vpop.f32.mrf.mxu1 }
 0x2d1   :  { %v1910_v27 = vsel %vm1909_vm9, %v1905_v55, inf  ;;  %v1195_v11 = vmin.f32 %v6191_v24, %v6184_v49 }
 0x2d2   :  { %3308 = vst.msk [vmem:[%s8059_s4 + $0x60] sm:$0xff] %vm3295_vm15, %v1676_v32  ;;  %v2906_v3 = vpop.f32.mrf.mxu2  ;;  %v3115_v29 = vpop.f32.mrf.mxu3  ;;  %1911 = vmin.xlane.f32.xlu0 %v1910_v27  ;;  %vm2517_vm10 = vcmp.eq.s32.totalorder %v4661_v10, %v1676_v32  ;;  %vm2518_vm11 = vcmp.eq.s32.totalorder %v4669_v17, %v1676_v32  ;;  %v6201_v42 = vcvt.s32.f32 %v2144_v30  ;;  %v1921_v55 = vcvt.s32.f32 %v1919_v34 }
 0x2d3   :  { %v6203_v44 = vadd.f32 %v3115_v29, %v2906_v3  ;;  %4120 = vmatmul.msk.f32.gmra.mxu2 %vm2517_vm10, %v8190_v12  ;;  %4184 = vmatmul.msk.f32.gmra.mxu3 %vm2518_vm11, %v8190_v12  ;;  %v1152_v0 = vpop.xlane.xlu1 %1151  ;;  %v6223_v30 = vadd.f32 %v4523_v57, %v870_v5  ;;  %v664_v3 = vpop.f32.mrf.mxu0 }
 0x2d4   :  { %vm1299_vm12 = vcmp.le.f32.partialorder %v5684_v8, %v1152_v0  ;;  %vm1300_vm13 = vcmp.le.f32.partialorder %v5680_v37, %v1152_v0  ;;  %2147 = vmin.xlane.f32.xlu2 %v6201_v42  ;;  %v1691_v8 = vshll.u32 %v1690_v19, 16  ;;  %v6230_v0 = vadd.f32 %v4521_v56, %v661_v22 }
 0x2d5   :  { %8264 = vst [vmem:[#allocation8_spill] sm:$0xff] %v6203_v44  ;;  %v1427_v32 = vsel %vm1299_vm12, %v4661_v10, 256  ;;  %v1428_v35 = vsel %vm1300_vm13, %v4669_v17, 256  ;;  %v1688_v60 = vpop.xlane.xlu0 %1687 }
 0x2d6   :  { %3364 = vst.msk [vmem:[%s8060_s3 + $0x20] sm:$0xff] %vm178_vm0, %v6203_v44  ;;  %vm2157_vm14 = vcmp.lt.s32.totalorder %v1427_v32, %v1428_v35  ;;  %v1689_v37 = vcvt.f32.s32 %v1688_v60  ;;  %v1706_v44 = vcvt.f32.s32 %v5758_v40 }
 0x2d7   :  { %v6220_v25 = vpop.xlane.xlu2 %1923  ;;  %8265 = vst [vmem:[#allocation40_spill] sm:$0xff] %v6223_v30  ;;  %v6225_v27 = vsel %vm2157_vm14, %v1427_v32, %v1428_v35  ;;  %v1198_v32 = vmin.f32 %v6230_v0, %v6223_v30 }
 0x2d8   :  { %v1692_v29 = vadd.s32 %v1691_v8, %v1689_v37  ;;  %1196 = vmin.xlane.f32.xlu1 %v1195_v11  ;;  %vm1925_vm1 = vcmp.eq.f32.partialorder %v5736_v4, %v6220_v25  ;;  %8266 = vst [vmem:[#allocation41_spill] sm:$0xff] %v6230_v0  ;;  %v2160_v19 = vshra.s32 %v6225_v27, 16  ;;  %v1935_v11 = vand.u32 65535, %v5760_v20 }
 0x2d9   :  { %v1926_v60 = vsel %vm1925_vm1, %v1921_v55, inf  ;;  %v1707_v37 = vshll.u32 %v1706_v44, 16  ;;  %v1818_v0 = vcvt.f32.s32 %v5953_v50  ;;  %v8301_v50 = vld [vmem:[#allocation22_spill] sm:$0xff] }
 0x2da   :  { %3309 = vst.msk [vmem:[%s8059_s4 + $0x68] sm:$0xff] %vm3295_vm15, %v1692_v29  ;;  %v2909_v5 = vpop.f32.mrf.mxu2  ;;  %v3118_v34 = vpop.f32.mrf.mxu3  ;;  %1927 = vmin.xlane.f32.xlu0 %v1926_v60  ;;  %vm2519_vm2 = vcmp.eq.s32.totalorder %v4661_v10, %v1692_v29  ;;  %vm2520_vm3 = vcmp.eq.s32.totalorder %v4669_v17, %v1692_v29  ;;  %v6240_v4 = vcvt.s32.f32 %v2160_v19  ;;  %v1937_v55 = vcvt.s32.f32 %v1935_v11 }
 0x2db   :  { %v6242_v22 = vadd.f32 %v3118_v34, %v2909_v5  ;;  %4121 = vmatmul.msk.f32.gmra.mxu2 %vm2519_vm2, %v8190_v12  ;;  %4185 = vmatmul.msk.f32.gmra.mxu3 %vm2520_vm3, %v8190_v12  ;;  %v1155_v40 = vpop.xlane.xlu1 %1154  ;;  %v6262_v29 = vadd.f32 %v4523_v57, %v873_v28  ;;  %v876_v60 = vpop.f32.mrf.mxu1  ;;  %v6269_v34 = vadd.f32 %v4521_v56, %v664_v3  ;;  %v1722_v11 = vcvt.f32.s32 %v5787_v31 }
 0x2dc   :  { %vm1301_vm4 = vcmp.le.f32.partialorder %v5731_v6, %v1155_v40  ;;  %vm1302_vm5 = vcmp.le.f32.partialorder %v5727_v43, %v1155_v40  ;;  %2163 = vmin.xlane.f32.xlu2 %v6240_v4 }
 0x2dd   :  { %8267 = vst [vmem:[#allocation42_spill] sm:$0xff] %v6242_v22  ;;  %v1429_v35 = vsel %vm1301_vm4, %v4661_v10, 256  ;;  %v1430_v8 = vsel %vm1302_vm5, %v4669_v17, 256  ;;  %v1704_v20 = vpop.xlane.xlu0 %1703 }
 0x2de   :  { %3365 = vst.msk [vmem:[%s8060_s3 + $0x28] sm:$0xff] %vm178_vm0, %v6242_v22  ;;  %vm2173_vm6 = vcmp.lt.s32.totalorder %v1429_v35, %v1430_v8  ;;  %v1705_v6 = vcvt.f32.s32 %v1704_v20  ;;  %v667_v20 = vpop.f32.mrf.mxu0  ;;  %v8274_v22 = vld [vmem:[#allocation31_spill] sm:$0xff] }
 0x2df   :  { %v6259_v43 = vpop.xlane.xlu2 %1939  ;;  %8268 = vst [vmem:[#allocation43_spill] sm:$0xff] %v6262_v29  ;;  %v6264_v19 = vsel %vm2173_vm6, %v1429_v35, %v1430_v8  ;;  %v8271_v8 = vld [vmem:[#allocation10_spill] sm:$0xff] }
 0x2e0   :  { %v1708_v5 = vadd.s32 %v1707_v37, %v1705_v6  ;;  %1199 = vmin.xlane.f32.xlu1 %v1198_v32  ;;  %vm1941_vm7 = vcmp.eq.f32.partialorder %v5773_v36, %v6259_v43  ;;  %8269 = vst [vmem:[#allocation44_spill] sm:$0xff] %v6269_v34  ;;  %v2176_v44 = vshra.s32 %v6264_v19, 16  ;;  %v1951_v32 = vand.u32 65535, %v5789_v58  ;;  %v8272_v37 = vld [vmem:[#allocation9_spill] sm:$0xff] }
 0x2e1   :  { %v1942_v40 = vsel %vm1941_vm7, %v1937_v55, inf  ;;  %v1201_v6 = vmin.f32 %v6269_v34, %v6262_v29  ;;  %v1738_v34 = vcvt.f32.s32 %v5816_v38 }
 0x2e2   :  { %3310 = vst.msk [vmem:[%s8059_s4 + $0x70] sm:$0xff] %vm3295_vm15, %v1708_v5  ;;  %v2912_v28 = vpop.f32.mrf.mxu2  ;;  %v3121_v35 = vpop.f32.mrf.mxu3  ;;  %1943 = vmin.xlane.f32.xlu0 %v1942_v40  ;;  %vm2521_vm8 = vcmp.eq.s32.totalorder %v4661_v10, %v1708_v5  ;;  %vm2522_vm9 = vcmp.eq.s32.totalorder %v4669_v17, %v1708_v5  ;;  %v6279_v36 = vcvt.s32.f32 %v2176_v44  ;;  %v1723_v44 = vshll.u32 %v1722_v11, 16 }
 0x2e3   :  { %v6281_v3 = vadd.f32 %v3121_v35, %v2912_v28  ;;  %4122 = vmatmul.msk.f32.gmra.mxu2 %vm2521_vm8, %v8190_v12  ;;  %4186 = vmatmul.msk.f32.gmra.mxu3 %vm2522_vm9, %v8190_v12  ;;  %v1158_v31 = vpop.xlane.xlu1 %1157  ;;  %v1953_v35 = vcvt.s32.f32 %v1951_v32 }
 0x2e4   :  { %vm1303_vm10 = vcmp.le.f32.partialorder %v8271_v8, %v1158_v31  ;;  %vm1304_vm11 = vcmp.le.f32.partialorder %v8272_v37, %v1158_v31  ;;  %2179 = vmin.xlane.f32.xlu2 %v6279_v36  ;;  %v6301_v31 = vadd.f32 %v4523_v57, %v876_v60 }
 0x2e5   :  { %8270 = vst [vmem:[#allocation45_spill] sm:$0xff] %v6281_v3  ;;  %v1431_v55 = vsel %vm1303_vm10, %v4661_v10, 256  ;;  %v1432_v5 = vsel %vm1304_vm11, %v4669_v17, 256  ;;  %v1720_v58 = vpop.xlane.xlu0 %1719 }
 0x2e6   :  { %3366 = vst.msk [vmem:[%s8060_s3 + $0x30] sm:$0xff] %vm178_vm0, %v6281_v3  ;;  %vm2189_vm12 = vcmp.lt.s32.totalorder %v1431_v55, %v1432_v5  ;;  %v1721_v40 = vcvt.f32.s32 %v1720_v58  ;;  %v6308_v3 = vadd.f32 %v4521_v56, %v667_v20  ;;  %v879_v58 = vpop.f32.mrf.mxu1 }
 0x2e7   :  { %v6298_v28 = vpop.xlane.xlu2 %1955  ;;  %8273 = vst [vmem:[#allocation10_spill] sm:$0xff] %v6301_v31  ;;  %v6303_v8 = vsel %vm2189_vm12, %v1431_v55, %v1432_v5  ;;  %v670_v55 = vpop.f32.mrf.mxu0  ;;  %v8277_v5 = vld [vmem:[#allocation11_spill] sm:$0xff] }
 0x2e8   :  { %v1724_v37 = vadd.s32 %v1723_v44, %v1721_v40  ;;  %1202 = vmin.xlane.f32.xlu1 %v1201_v6  ;;  %vm1957_vm13 = vcmp.eq.f32.partialorder %v8274_v22, %v6298_v28  ;;  %8275 = vst [vmem:[#allocation9_spill] sm:$0xff] %v6308_v3  ;;  %v2192_v11 = vshra.s32 %v6303_v8, 16  ;;  %v1967_v6 = vand.u32 65535, %v5818_v18  ;;  %v8278_v44 = vld [vmem:[#allocation12_spill] sm:$0xff] }
 0x2e9   :  { %v1958_v29 = vsel %vm1957_vm13, %v1953_v35, inf }
 0x2ea   :  { %3311 = vst.msk [vmem:[%s8059_s4 + $0x78] sm:$0xff] %vm3295_vm15, %v1724_v37  ;;  %v2915_v60 = vpop.f32.mrf.mxu2  ;;  %v3124_v32 = vpop.f32.mrf.mxu3  ;;  %1959 = vmin.xlane.f32.xlu0 %v1958_v29  ;;  %vm2523_vm14 = vcmp.eq.s32.totalorder %v4661_v10, %v1724_v37  ;;  %vm2524_vm1 = vcmp.eq.s32.totalorder %v4669_v17, %v1724_v37  ;;  %v6318_v22 = vcvt.s32.f32 %v2192_v11  ;;  %v1204_v29 = vmin.f32 %v6308_v3, %v6301_v31 }
 0x2eb   :  { %v6320_v20 = vadd.f32 %v3124_v32, %v2915_v60  ;;  %4123 = vmatmul.msk.f32.gmra.mxu2 %vm2523_vm14, %v8190_v12  ;;  %4187 = vmatmul.msk.f32.gmra.mxu3 %vm2524_vm1, %v8190_v12  ;;  %v1161_v38 = vpop.xlane.xlu1 %1160  ;;  %v1739_v37 = vshll.u32 %v1738_v34, 16  ;;  %v1969_v32 = vcvt.s32.f32 %v1967_v6  ;;  %v6347_v31 = vadd.f32 %v4521_v56, %v670_v55  ;;  %v8283_v55 = vld [vmem:[#allocation14_spill] sm:$0xff] }
 0x2ec   :  { %vm1305_vm2 = vcmp.le.f32.partialorder %v8277_v5, %v1161_v38  ;;  %vm1306_vm3 = vcmp.le.f32.partialorder %v8278_v44, %v1161_v38  ;;  %2195 = vmin.xlane.f32.xlu2 %v6318_v22  ;;  %v6340_v38 = vadd.f32 %v4523_v57, %v879_v58  ;;  %v1983_v6 = vand.u32 65535, %v5847_v26 }
 0x2ed   :  { %8276 = vst [vmem:[#allocation31_spill] sm:$0xff] %v6320_v20  ;;  %v1433_v40 = vsel %vm1305_vm2, %v4661_v10, 256  ;;  %v1434_v18 = vsel %vm1306_vm3, %v4669_v17, 256  ;;  %v1736_v35 = vpop.xlane.xlu0 %1735 }
 0x2ee   :  { %3367 = vst.msk [vmem:[%s8060_s3 + $0x38] sm:$0xff] %vm178_vm0, %v6320_v20  ;;  %vm2205_vm4 = vcmp.lt.s32.totalorder %v1433_v40, %v1434_v18  ;;  %v1737_v11 = vcvt.f32.s32 %v1736_v35  ;;  %v8280_v20 = vld [vmem:[#allocation32_spill] sm:$0xff]  ;;  %v1754_v35 = vcvt.f32.s32 %v5845_v45  ;;  %v8282_v45 = vld [vmem:[#allocation13_spill] sm:$0xff] }
 0x2ef   :  { %v6337_v60 = vpop.xlane.xlu2 %1971  ;;  %8279 = vst [vmem:[#allocation11_spill] sm:$0xff] %v6340_v38  ;;  %v6342_v5 = vsel %vm2205_vm4, %v1433_v40, %v1434_v18 }
 0x2f0   :  { %v1740_v44 = vadd.s32 %v1739_v37, %v1737_v11  ;;  %1205 = vmin.xlane.f32.xlu1 %v1204_v29  ;;  %vm1973_vm5 = vcmp.eq.f32.partialorder %v8280_v20, %v6337_v60  ;;  %8281 = vst [vmem:[#allocation12_spill] sm:$0xff] %v6347_v31  ;;  %v2208_v34 = vshra.s32 %v6342_v5, 16  ;;  %v882_v29 = vpop.f32.mrf.mxu1  ;;  %v673_v11 = vpop.f32.mrf.mxu0 }
 0x2f1   :  { %v1974_v3 = vsel %vm1973_vm5, %v1969_v32, inf  ;;  %v1755_v32 = vshll.u32 %v1754_v35, 16 }
 0x2f2   :  { %3312 = vst.msk [vmem:[%s8059_s4 + $0x80] sm:$0xff] %vm3295_vm15, %v1740_v44  ;;  %1975 = vmin.xlane.f32.xlu0 %v1974_v3  ;;  %vm2525_vm6 = vcmp.eq.s32.totalorder %v4661_v10, %v1740_v44  ;;  %vm2526_vm7 = vcmp.eq.s32.totalorder %v4669_v17, %v1740_v44  ;;  %v6357_v58 = vcvt.s32.f32 %v2208_v34  ;;  %v1207_v3 = vmin.f32 %v6347_v31, %v6340_v38  ;;  %v8285_v38 = vld [vmem:[#allocation33_spill] sm:$0xff] }
 0x2f3   :  { %4124 = vmatmul.msk.f32.gmra.mxu2 %vm2525_vm6, %v8190_v12  ;;  %4188 = vmatmul.msk.f32.gmra.mxu3 %vm2526_vm7, %v8190_v12  ;;  %v1164_v20 = vpop.xlane.xlu1 %1163  ;;  %v1985_v34 = vcvt.s32.f32 %v1983_v6  ;;  %v6379_v31 = vadd.f32 %v4521_v56, %v673_v11 }
 0x2f4   :  { %vm1307_vm8 = vcmp.le.f32.partialorder %v8282_v45, %v1164_v20  ;;  %vm1308_vm9 = vcmp.le.f32.partialorder %v8283_v55, %v1164_v20  ;;  %2211 = vmin.xlane.f32.xlu2 %v6357_v58  ;;  %v6372_v20 = vadd.f32 %v4523_v57, %v882_v29 }
 0x2f5   :  { %v1435_v40 = vsel %vm1307_vm8, %v4661_v10, 256  ;;  %v1436_v18 = vsel %vm1308_vm9, %v4669_v17, 256  ;;  %v1752_v37 = vpop.xlane.xlu0 %1751  ;;  %8286 = vst [vmem:[#allocation13_spill] sm:$0xff] %v6379_v31 }
 0x2f6   :  { %vm2221_vm10 = vcmp.lt.s32.totalorder %v1435_v40, %v1436_v18  ;;  %v1753_v44 = vcvt.f32.s32 %v1752_v37  ;;  %8284 = vst [vmem:[#allocation32_spill] sm:$0xff] %v6372_v20  ;;  %v1770_v37 = vcvt.f32.s32 %v5872_v7  ;;  %v8288_v7 = vld [vmem:[#allocation15_spill] sm:$0xff] }
 0x2f7   :  { %v6369_v26 = vpop.xlane.xlu2 %1987  ;;  %v6374_v45 = vsel %vm2221_vm10, %v1435_v40, %v1436_v18 }
 0x2f8   :  { %v1756_v55 = vadd.s32 %v1755_v32, %v1753_v44  ;;  %1208 = vmin.xlane.f32.xlu1 %v1207_v3  ;;  %vm1989_vm11 = vcmp.eq.f32.partialorder %v8285_v38, %v6369_v26  ;;  %v2224_v35 = vshra.s32 %v6374_v45, 16  ;;  %v8287_v38 = vld [vmem:[#allocation18_spill] sm:$0xff]  ;;  %v8289_v3 = vld [vmem:[#allocation16_spill] sm:$0xff]  ;;  %v1771_v11 = vshll.u32 %v1770_v37, 16 }
 0x2f9   :  { %v1990_v30 = vsel %vm1989_vm11, %v1985_v34, inf  ;;  %v1999_v6 = vand.u32 65535, %v8287_v38 }
 0x2fa   :  { %3313 = vst.msk [vmem:[%s8059_s4 + $0x88] sm:$0xff] %vm3295_vm15, %v1756_v55  ;;  %1991 = vmin.xlane.f32.xlu0 %v1990_v30  ;;  %vm2527_vm12 = vcmp.eq.s32.totalorder %v4661_v10, %v1756_v55  ;;  %vm2528_vm13 = vcmp.eq.s32.totalorder %v4669_v17, %v1756_v55  ;;  %v6389_v57 = vcvt.s32.f32 %v2224_v35  ;;  %v1210_v30 = vmin.f32 %v6379_v31, %v6372_v20 }
 0x2fb   :  { %4125 = vmatmul.msk.f32.gmra.mxu2 %vm2527_vm12, %v8190_v12  ;;  %4189 = vmatmul.msk.f32.gmra.mxu3 %vm2528_vm13, %v8190_v12  ;;  %v1167_v56 = vpop.xlane.xlu1 %1166  ;;  %v2001_v34 = vcvt.s32.f32 %v1999_v6  ;;  %v1802_v20 = vcvt.f32.s32 %v5926_v2  ;;  %v8296_v2 = vld [vmem:[#allocation19_spill] sm:$0xff] }
 0x2fc   :  { %vm1309_vm14 = vcmp.le.f32.partialorder %v8288_v7, %v1167_v56  ;;  %vm1310_vm1 = vcmp.le.f32.partialorder %v8289_v3, %v1167_v56  ;;  %2227 = vmin.xlane.f32.xlu2 %v6389_v57  ;;  %v8290_v56 = vld [vmem:[#allocation35_spill] sm:$0xff]  ;;  %v1786_v3 = vcvt.f32.s32 %v5899_v59  ;;  %v8292_v59 = vld [vmem:[#allocation34_spill] sm:$0xff] }
 0x2fd   :  { %v1437_v29 = vsel %vm1309_vm14, %v4661_v10, 256  ;;  %v1438_v40 = vsel %vm1310_vm1, %v4669_v17, 256  ;;  %v1768_v18 = vpop.xlane.xlu0 %1767 }
 0x2fe   :  { %vm2237_vm2 = vcmp.lt.s32.totalorder %v1437_v29, %v1438_v40  ;;  %v1769_v32 = vcvt.f32.s32 %v1768_v18 }
 0x2ff   :  { %v6401_v44 = vpop.xlane.xlu2 %2003  ;;  %v6403_v55 = vsel %vm2237_vm2, %v1437_v29, %v1438_v40  ;;  %v8293_v40 = vld [vmem:[#allocation17_spill] sm:$0xff] }
 0x300   :  { %v1772_v35 = vadd.s32 %v1771_v11, %v1769_v32  ;;  %1211 = vmin.xlane.f32.xlu1 %v1210_v30  ;;  %vm2005_vm3 = vcmp.eq.f32.partialorder %v8290_v56, %v6401_v44  ;;  %v2240_v38 = vshra.s32 %v6403_v55, 16  ;;  %v8291_v30 = vld [vmem:[#allocation21_spill] sm:$0xff] }
 0x301   :  { %v2006_v7 = vsel %vm2005_vm3, %v2001_v34, inf  ;;  %v2015_v29 = vand.u32 65535, %v8291_v30  ;;  %v1787_v34 = vshll.u32 %v1786_v3, 16 }
 0x302   :  { %3314 = vst.msk [vmem:[%s8059_s4 + $0x90] sm:$0xff] %vm3295_vm15, %v1772_v35  ;;  %2007 = vmin.xlane.f32.xlu0 %v2006_v7  ;;  %vm2529_vm4 = vcmp.eq.s32.totalorder %v4661_v10, %v1772_v35  ;;  %vm2530_vm5 = vcmp.eq.s32.totalorder %v4669_v17, %v1772_v35  ;;  %v6415_v37 = vcvt.s32.f32 %v2240_v38 }
 0x303   :  { %4126 = vmatmul.msk.f32.gmra.mxu2 %vm2529_vm4, %v8190_v12  ;;  %4190 = vmatmul.msk.f32.gmra.mxu3 %vm2530_vm5, %v8190_v12  ;;  %v1170_v6 = vpop.xlane.xlu1 %1169  ;;  %v2017_v7 = vcvt.s32.f32 %v2015_v29 }
 0x304   :  { %vm1311_vm6 = vcmp.le.f32.partialorder %v8292_v59, %v1170_v6  ;;  %vm1312_vm7 = vcmp.le.f32.partialorder %v8293_v40, %v1170_v6  ;;  %2243 = vmin.xlane.f32.xlu2 %v6415_v37  ;;  %v8294_v59 = vld [vmem:[#allocation36_spill] sm:$0xff] }
 0x305   :  { %v1439_v18 = vsel %vm1311_vm6, %v4661_v10, 256  ;;  %v1440_v11 = vsel %vm1312_vm7, %v4669_v17, 256  ;;  %v1784_v32 = vpop.xlane.xlu0 %1783 }
 0x306   :  { %vm2253_vm8 = vcmp.lt.s32.totalorder %v1439_v18, %v1440_v11  ;;  %v1785_v35 = vcvt.f32.s32 %v1784_v32  ;;  %v8297_v32 = vld [vmem:[#allocation20_spill] sm:$0xff] }
 0x307   :  { %v6425_v56 = vsel %vm2253_vm8, %v1439_v18, %v1440_v11  ;;  %v6427_v38 = vpop.xlane.xlu2 %2019  ;;  %v8295_v18 = vld [vmem:[#allocation2_spill] sm:$0xff] }
 0x308   :  { %v1788_v30 = vadd.s32 %v1787_v34, %v1785_v35  ;;  %vm2021_vm9 = vcmp.eq.f32.partialorder %v8294_v59, %v6427_v38  ;;  %v2256_v6 = vshra.s32 %v6425_v56, 16  ;;  %v2031_v11 = vand.u32 65535, %v8295_v18 }
 0x309   :  { %v2022_v40 = vsel %vm2021_vm9, %v2017_v7, inf }
 0x30a   :  { %3315 = vst.msk [vmem:[%s8059_s4 + $0x98] sm:$0xff] %vm3295_vm15, %v1788_v30  ;;  %2023 = vmin.xlane.f32.xlu0 %v2022_v40  ;;  %vm2531_vm10 = vcmp.eq.s32.totalorder %v4661_v10, %v1788_v30  ;;  %vm2532_vm11 = vcmp.eq.s32.totalorder %v4669_v17, %v1788_v30  ;;  %v6439_v3 = vcvt.s32.f32 %v2256_v6  ;;  %v1803_v30 = vshll.u32 %v1802_v20, 16 }
 0x30b   :  { %4127 = vmatmul.msk.f32.gmra.mxu2 %vm2531_vm10, %v8190_v12  ;;  %4191 = vmatmul.msk.f32.gmra.mxu3 %vm2532_vm11, %v8190_v12  ;;  %v1173_v29 = vpop.xlane.xlu1 %1172  ;;  %v2033_v31 = vcvt.s32.f32 %v2031_v11 }
 0x30c   :  { %vm1313_vm12 = vcmp.le.f32.partialorder %v8296_v2, %v1173_v29  ;;  %vm1314_vm13 = vcmp.le.f32.partialorder %v8297_v32, %v1173_v29  ;;  %2259 = vmin.xlane.f32.xlu2 %v6439_v3  ;;  %v8299_v2 = vld [vmem:[#allocation26_spill] sm:$0xff] }
 0x30d   :  { %v1441_v34 = vsel %vm1313_vm12, %v4661_v10, 256  ;;  %v1442_v35 = vsel %vm1314_vm13, %v4669_v17, 256  ;;  %v1800_v7 = vpop.xlane.xlu0 %1799 }
 0x30e   :  { %vm2269_vm14 = vcmp.lt.s32.totalorder %v1441_v34, %v1442_v35  ;;  %v1801_v59 = vcvt.f32.s32 %v1800_v7 }
 0x30f   :  { %v6449_v6 = vsel %vm2269_vm14, %v1441_v34, %v1442_v35  ;;  %v6451_v40 = vpop.xlane.xlu2 %2035  ;;  %v8302_v35 = vld [vmem:[#allocation23_spill] sm:$0xff] }
 0x310   :  { %8298 = vst [vmem:[#allocation14_spill] sm:$0xff] %v6449_v6  ;;  %v1804_v18 = vadd.s32 %v1803_v30, %v1801_v59  ;;  %vm2037_vm1 = vcmp.eq.f32.partialorder %v8299_v2, %v6451_v40  ;;  %v2272_v29 = vshra.s32 %v6449_v6, 16 }
 0x311   :  { %v2038_v32 = vsel %vm2037_vm1, %v2033_v31, inf  ;;  %v8300_v31 = vld [vmem:[#allocation28_spill] sm:$0xff] }
 0x312   :  { %3316 = vst.msk [vmem:[%s8059_s4 + $0xa0] sm:$0xff] %vm3295_vm15, %v1804_v18  ;;  %2039 = vmin.xlane.f32.xlu0 %v2038_v32  ;;  %vm2533_vm2 = vcmp.eq.s32.totalorder %v4661_v10, %v1804_v18  ;;  %vm2534_vm3 = vcmp.eq.s32.totalorder %v4669_v17, %v1804_v18  ;;  %v6463_v20 = vcvt.s32.f32 %v2272_v29  ;;  %v2047_v34 = vand.u32 65535, %v8300_v31 }
 0x313   :  { %4128 = vmatmul.msk.f32.gmra.mxu2 %vm2533_vm2, %v8190_v12  ;;  %4192 = vmatmul.msk.f32.gmra.mxu3 %vm2534_vm3, %v8190_v12  ;;  %v1176_v11 = vpop.xlane.xlu1 %1175  ;;  %v1819_v18 = vshll.u32 %v1818_v0, 16 }
 0x314   :  { %vm1315_vm4 = vcmp.le.f32.partialorder %v8301_v50, %v1176_v11  ;;  %vm1316_vm5 = vcmp.le.f32.partialorder %v8302_v35, %v1176_v11  ;;  %2275 = vmin.xlane.f32.xlu2 %v6463_v20  ;;  %v2049_v6 = vcvt.s32.f32 %v2047_v34  ;;  %v1834_v35 = vcvt.f32.s32 %v5982_v53  ;;  %v8306_v53 = vld [vmem:[#allocation24_spill] sm:$0xff] }
 0x315   :  { %v1443_v7 = vsel %vm1315_vm4, %v4661_v10, 256  ;;  %v1444_v30 = vsel %vm1316_vm5, %v4669_v17, 256  ;;  %v1816_v59 = vpop.xlane.xlu0 %1815 }
 0x316   :  { %vm2285_vm6 = vcmp.lt.s32.totalorder %v1443_v7, %v1444_v30  ;;  %v1817_v2 = vcvt.f32.s32 %v1816_v59 }
 0x317   :  { %v6473_v29 = vsel %vm2285_vm6, %v1443_v7, %v1444_v30  ;;  %v6475_v32 = vpop.xlane.xlu2 %2051  ;;  %v8307_v7 = vld [vmem:[#allocation25_spill] sm:$0xff] }
 0x318   :  { %8303 = vst [vmem:[#allocation33_spill] sm:$0xff] %v6473_v29  ;;  %v1820_v31 = vadd.s32 %v1819_v18, %v1817_v2  ;;  %vm2053_vm7 = vcmp.eq.f32.partialorder %v5968_v13, %v6475_v32  ;;  %v2288_v11 = vshra.s32 %v6473_v29, 16  ;;  %v1835_v2 = vshll.u32 %v1834_v35, 16 }
 0x319   :  { %v2054_v50 = vsel %vm2053_vm7, %v2049_v6, inf  ;;  %v8305_v6 = vld [vmem:[#allocation29_spill] sm:$0xff] }
 0x31a   :  { %3317 = vst.msk [vmem:[%s8059_s4 + $0xa8] sm:$0xff] %vm3295_vm15, %v1820_v31  ;;  %2055 = vmin.xlane.f32.xlu0 %v2054_v50  ;;  %vm2535_vm8 = vcmp.eq.s32.totalorder %v4661_v10, %v1820_v31  ;;  %vm2536_vm9 = vcmp.eq.s32.totalorder %v4669_v17, %v1820_v31  ;;  %v6487_v0 = vcvt.s32.f32 %v2288_v11  ;;  %v2063_v34 = vand.u32 65535, %v8305_v6 }
 0x31b   :  { %4129 = vmatmul.msk.f32.gmra.mxu2 %vm2535_vm8, %v8190_v12  ;;  %4193 = vmatmul.msk.f32.gmra.mxu3 %vm2536_vm9, %v8190_v12  ;;  %v1179_v13 = vpop.xlane.xlu1 %1178 }
 0x31c   :  { %8304 = vst [vmem:[#allocation18_spill] sm:$0xff] %v6487_v0  ;;  %vm1317_vm10 = vcmp.le.f32.partialorder %v8306_v53, %v1179_v13  ;;  %vm1318_vm11 = vcmp.le.f32.partialorder %v8307_v7, %v1179_v13  ;;  %2291 = vmin.xlane.f32.xlu2 %v6487_v0  ;;  %v2065_v29 = vcvt.s32.f32 %v2063_v34  ;;  %v8308_v53 = vld [vmem:[#allocation37_spill] sm:$0xff]  ;;  %v1850_v0 = vcvt.f32.s32 %v6009_v15 }
 0x31d   :  { %v1445_v30 = vsel %vm1317_vm10, %v4661_v10, 256  ;;  %v1446_v59 = vsel %vm1318_vm11, %v4669_v17, 256  ;;  %v1832_v18 = vpop.xlane.xlu0 %1831  ;;  %v8309_v15 = vld [vmem:[#allocation5_spill] sm:$0xff] }
 0x31e   :  { %vm2301_vm12 = vcmp.lt.s32.totalorder %v1445_v30, %v1446_v59  ;;  %v1833_v31 = vcvt.f32.s32 %v1832_v18 }
 0x31f   :  { %v6497_v11 = vsel %vm2301_vm12, %v1445_v30, %v1446_v59  ;;  %v6499_v50 = vpop.xlane.xlu2 %2067  ;;  %v8310_v30 = vld [vmem:[#allocation27_spill] sm:$0xff] }
 0x320   :  { %v1836_v6 = vadd.s32 %v1835_v2, %v1833_v31  ;;  %vm2069_vm13 = vcmp.eq.f32.partialorder %v8308_v53, %v6499_v50  ;;  %v2304_v13 = vshra.s32 %v6497_v11, 16  ;;  %v1851_v31 = vshll.u32 %v1850_v0, 16 }
 0x321   :  { %v2070_v7 = vsel %vm2069_vm13, %v2065_v29, inf  ;;  %v2079_v29 = vand.u32 65535, %v6014_v41 }
 0x322   :  { %3318 = vst.msk [vmem:[%s8059_s4 + $0xb0] sm:$0xff] %vm3295_vm15, %v1836_v6  ;;  %2071 = vmin.xlane.f32.xlu0 %v2070_v7  ;;  %vm2537_vm14 = vcmp.eq.s32.totalorder %v4661_v10, %v1836_v6  ;;  %vm2538_vm1 = vcmp.eq.s32.totalorder %v4669_v17, %v1836_v6  ;;  %v6511_v35 = vcvt.s32.f32 %v2304_v13 }
 0x323   :  { %4130 = vmatmul.msk.f32.gmra.mxu2 %vm2537_vm14, %v8190_v12  ;;  %4194 = vmatmul.msk.f32.gmra.mxu3 %vm2538_vm1, %v8190_v12  ;;  %v1182_v34 = vpop.xlane.xlu1 %1181  ;;  %v2081_v7 = vcvt.s32.f32 %v2079_v29  ;;  %v2095_v29 = vand.u32 65535, %v6057_v47 }
 0x324   :  { %vm1319_vm2 = vcmp.le.f32.partialorder %v8309_v15, %v1182_v34  ;;  %vm1320_vm3 = vcmp.le.f32.partialorder %v8310_v30, %v1182_v34  ;;  %2307 = vmin.xlane.f32.xlu2 %v6511_v35  ;;  %v1866_v30 = vcvt.f32.s32 %v6051_v39 }
 0x325   :  { %v1447_v59 = vsel %vm1319_vm2, %v4661_v10, 256  ;;  %v1448_v18 = vsel %vm1320_vm3, %v4669_v17, 256  ;;  %v1848_v2 = vpop.xlane.xlu0 %1847 }
 0x326   :  { %vm2317_vm4 = vcmp.lt.s32.totalorder %v1447_v59, %v1448_v18  ;;  %v1849_v6 = vcvt.f32.s32 %v1848_v2  ;;  %v1867_v2 = vshll.u32 %v1866_v30, 16  ;;  %v2111_v30 = vand.u32 65535, %v6102_v63 }
 0x327   :  { %v6521_v53 = vsel %vm2317_vm4, %v1447_v59, %v1448_v18  ;;  %v6523_v13 = vpop.xlane.xlu2 %2083 }
 0x328   :  { %v1852_v41 = vadd.s32 %v1851_v31, %v1849_v6  ;;  %vm2085_vm5 = vcmp.eq.f32.partialorder %v6032_v14, %v6523_v13  ;;  %v2320_v34 = vshra.s32 %v6521_v53, 16 }
 0x329   :  { %v2086_v15 = vsel %vm2085_vm5, %v2081_v7, inf }
 0x32a   :  { %3319 = vst.msk [vmem:[%s8059_s4 + $0xb8] sm:$0xff] %vm3295_vm15, %v1852_v41  ;;  %2087 = vmin.xlane.f32.xlu0 %v2086_v15  ;;  %vm2539_vm6 = vcmp.eq.s32.totalorder %v4661_v10, %v1852_v41  ;;  %vm2540_vm7 = vcmp.eq.s32.totalorder %v4669_v17, %v1852_v41  ;;  %v6535_v0 = vcvt.s32.f32 %v2320_v34  ;;  %v2097_v41 = vcvt.s32.f32 %v2095_v29 }
 0x32b   :  { %4131 = vmatmul.msk.f32.gmra.mxu2 %vm2539_vm6, %v8190_v12  ;;  %4195 = vmatmul.msk.f32.gmra.mxu3 %vm2540_vm7, %v8190_v12  ;;  %v1185_v14 = vpop.xlane.xlu1 %1184  ;;  %v1882_v34 = vcvt.f32.s32 %v6096_v1  ;;  %v8311_v1 = vld [vmem:[#allocation4_spill] sm:$0xff] }
 0x32c   :  { %vm1321_vm8 = vcmp.le.f32.partialorder %v6022_v51, %v1185_v14  ;;  %vm1322_vm9 = vcmp.le.f32.partialorder %v6012_v33, %v1185_v14  ;;  %2323 = vmin.xlane.f32.xlu2 %v6535_v0 }
 0x32d   :  { %v1449_v39 = vsel %vm1321_vm8, %v4661_v10, 256  ;;  %v1450_v59 = vsel %vm1322_vm9, %v4669_v17, 256  ;;  %v1864_v18 = vpop.xlane.xlu0 %1863 }
 0x32e   :  { %vm2333_vm10 = vcmp.lt.s32.totalorder %v1449_v39, %v1450_v59  ;;  %v1865_v31 = vcvt.f32.s32 %v1864_v18 }
 0x32f   :  { %v6545_v6 = vsel %vm2333_vm10, %v1449_v39, %v1450_v59  ;;  %v6547_v7 = vpop.xlane.xlu2 %2099  ;;  %v1883_v59 = vshll.u32 %v1882_v34, 16 }
 0x330   :  { %v1868_v47 = vadd.s32 %v1867_v2, %v1865_v31  ;;  %vm2101_vm11 = vcmp.eq.f32.partialorder %v6077_v21, %v6547_v7  ;;  %v2336_v33 = vshra.s32 %v6545_v6, 16 }
 0x331   :  { %v2102_v51 = vsel %vm2101_vm11, %v2097_v41, inf }
 0x332   :  { %3320 = vst.msk [vmem:[%s8059_s4 + $0xc0] sm:$0xff] %vm3295_vm15, %v1868_v47  ;;  %2103 = vmin.xlane.f32.xlu0 %v2102_v51  ;;  %vm2541_vm12 = vcmp.eq.s32.totalorder %v4661_v10, %v1868_v47  ;;  %vm2542_vm13 = vcmp.eq.s32.totalorder %v4669_v17, %v1868_v47  ;;  %v6559_v15 = vcvt.s32.f32 %v2336_v33 }
 0x333   :  { %4132 = vmatmul.msk.f32.gmra.mxu2 %vm2541_vm12, %v8190_v12  ;;  %4196 = vmatmul.msk.f32.gmra.mxu3 %vm2542_vm13, %v8190_v12  ;;  %v1188_v21 = vpop.xlane.xlu1 %1187 }
 0x334   :  { %vm1323_vm14 = vcmp.le.f32.partialorder %v6065_v62, %v1188_v21  ;;  %vm1324_vm1 = vcmp.le.f32.partialorder %v8311_v1, %v1188_v21  ;;  %2339 = vmin.xlane.f32.xlu2 %v6559_v15  ;;  %v2113_v62 = vcvt.s32.f32 %v2111_v30  ;;  %v1898_v21 = vcvt.f32.s32 %v6139_v52 }
 0x335   :  { %v1451_v14 = vsel %vm1323_vm14, %v4661_v10, 256  ;;  %v1452_v29 = vsel %vm1324_vm1, %v4669_v17, 256  ;;  %v1880_v39 = vpop.xlane.xlu0 %1879  ;;  %v2127_v1 = vand.u32 65535, %v6145_v46 }
 0x336   :  { %vm2349_vm2 = vcmp.lt.s32.totalorder %v1451_v14, %v1452_v29  ;;  %v1881_v18 = vcvt.f32.s32 %v1880_v39  ;;  %v2918_v2 = vpop.f32.mrf.mxu2  ;;  %v3127_v31 = vpop.f32.mrf.mxu3  ;;  %v1899_v39 = vshll.u32 %v1898_v21, 16 }
 0x337   :  { %v6569_v41 = vsel %vm2349_vm2, %v1451_v14, %v1452_v29  ;;  %v6571_v47 = vadd.f32 %v3127_v31, %v2918_v2  ;;  %v6573_v63 = vpop.xlane.xlu2 %2115 }
 0x338   :  { %v1884_v33 = vadd.s32 %v1883_v59, %v1881_v18  ;;  %vm2117_vm3 = vcmp.eq.f32.partialorder %v6120_v54, %v6573_v63  ;;  %v2352_v51 = vshra.s32 %v6569_v41, 16 }
 0x339   :  { %3368 = vst.msk [vmem:[%s8060_s3 + $0x40] sm:$0xff] %vm178_vm0, %v6571_v47  ;;  %v2118_v34 = vsel %vm2117_vm3, %v2113_v62, inf }
 0x33a   :  { %3321 = vst.msk [vmem:[%s8059_s4 + $0xc8] sm:$0xff] %vm3295_vm15, %v1884_v33  ;;  %2119 = vmin.xlane.f32.xlu0 %v2118_v34  ;;  %vm2543_vm4 = vcmp.eq.s32.totalorder %v4661_v10, %v1884_v33  ;;  %vm2544_vm5 = vcmp.eq.s32.totalorder %v4669_v17, %v1884_v33  ;;  %v6590_v54 = vcvt.s32.f32 %v2352_v51  ;;  %v1914_v34 = vcvt.f32.s32 %v6180_v48  ;;  %v8312_v48 = vld [vmem:[#allocation38_spill] sm:$0xff] }
 0x33b   :  { %4133 = vmatmul.msk.f32.gmra.mxu2 %vm2543_vm4, %v8190_v12  ;;  %4197 = vmatmul.msk.f32.gmra.mxu3 %vm2544_vm5, %v8190_v12  ;;  %v1191_v30 = vpop.xlane.xlu1 %1190 }
 0x33c   :  { %vm1325_vm6 = vcmp.le.f32.partialorder %v6108_v9, %v1191_v30  ;;  %vm1326_vm7 = vcmp.le.f32.partialorder %v6100_v16, %v1191_v30  ;;  %2355 = vmin.xlane.f32.xlu2 %v6590_v54  ;;  %v2129_v9 = vcvt.s32.f32 %v2127_v1  ;;  %v2143_v30 = vand.u32 65535, %v6186_v61  ;;  %v8313_v1 = vld [vmem:[#allocation7_spill] sm:$0xff] }
 0x33d   :  { %v1453_v52 = vsel %vm1325_vm6, %v4661_v10, 256  ;;  %v1454_v14 = vsel %vm1326_vm7, %v4669_v17, 256  ;;  %v1896_v29 = vpop.xlane.xlu0 %1895 }
 0x33e   :  { %vm2365_vm8 = vcmp.lt.s32.totalorder %v1453_v52, %v1454_v14  ;;  %v1897_v59 = vcvt.f32.s32 %v1896_v29  ;;  %v2921_v18 = vpop.f32.mrf.mxu2  ;;  %v3130_v2 = vpop.f32.mrf.mxu3 }
 0x33f   :  { %v6600_v31 = vsel %vm2365_vm8, %v1453_v52, %v1454_v14  ;;  %v6602_v62 = vadd.f32 %v3130_v2, %v2921_v18  ;;  %v6604_v46 = vpop.xlane.xlu2 %2131 }
 0x340   :  { %v1900_v16 = vadd.s32 %v1899_v39, %v1897_v59  ;;  %vm2133_vm9 = vcmp.eq.f32.partialorder %v6161_v23, %v6604_v46  ;;  %v2368_v33 = vshra.s32 %v6600_v31, 16  ;;  %v1915_v39 = vshll.u32 %v1914_v34, 16 }
 0x341   :  { %3369 = vst.msk [vmem:[%s8060_s3 + $0x48] sm:$0xff] %vm178_vm0, %v6602_v62  ;;  %v2134_v51 = vsel %vm2133_vm9, %v2129_v9, inf }
 0x342   :  { %3322 = vst.msk [vmem:[%s8059_s4 + $0xd0] sm:$0xff] %vm3295_vm15, %v1900_v16  ;;  %2135 = vmin.xlane.f32.xlu0 %v2134_v51  ;;  %vm2545_vm10 = vcmp.eq.s32.totalorder %v4661_v10, %v1900_v16  ;;  %vm2546_vm11 = vcmp.eq.s32.totalorder %v4669_v17, %v1900_v16  ;;  %v6621_v23 = vcvt.s32.f32 %v2368_v33  ;;  %v2145_v33 = vcvt.s32.f32 %v2143_v30 }
 0x343   :  { %4134 = vmatmul.msk.f32.gmra.mxu2 %vm2545_vm10, %v8190_v12  ;;  %4198 = vmatmul.msk.f32.gmra.mxu3 %vm2546_vm11, %v8190_v12  ;;  %v1194_v21 = vpop.xlane.xlu1 %1193  ;;  %v2159_v30 = vand.u32 65535, %v6225_v27 }
 0x344   :  { %vm1327_vm12 = vcmp.le.f32.partialorder %v8312_v48, %v1194_v21  ;;  %vm1328_vm13 = vcmp.le.f32.partialorder %v8313_v1, %v1194_v21  ;;  %2371 = vmin.xlane.f32.xlu2 %v6621_v23  ;;  %v1930_v48 = vcvt.f32.s32 %v6220_v25 }
 0x345   :  { %v1455_v52 = vsel %vm1327_vm12, %v4661_v10, 256  ;;  %v1456_v14 = vsel %vm1328_vm13, %v4669_v17, 256  ;;  %v1912_v29 = vpop.xlane.xlu0 %1911 }
 0x346   :  { %vm2381_vm14 = vcmp.lt.s32.totalorder %v1455_v52, %v1456_v14  ;;  %v1913_v59 = vcvt.f32.s32 %v1912_v29  ;;  %v2924_v18 = vpop.f32.mrf.mxu2  ;;  %v3133_v2 = vpop.f32.mrf.mxu3  ;;  %v1931_v29 = vshll.u32 %v1930_v48, 16  ;;  %v2175_v48 = vand.u32 65535, %v6264_v19 }
 0x347   :  { %v6631_v9 = vsel %vm2381_vm14, %v1455_v52, %v1456_v14  ;;  %v6633_v16 = vadd.f32 %v3133_v2, %v2924_v18  ;;  %v6635_v61 = vpop.xlane.xlu2 %2147 }
 0x348   :  { %v1916_v51 = vadd.s32 %v1915_v39, %v1913_v59  ;;  %vm2149_vm1 = vcmp.eq.f32.partialorder %v6201_v42, %v6635_v61  ;;  %v2384_v21 = vshra.s32 %v6631_v9, 16 }
 0x349   :  { %3370 = vst.msk [vmem:[%s8060_s3 + $0x50] sm:$0xff] %vm178_vm0, %v6633_v16  ;;  %v2150_v34 = vsel %vm2149_vm1, %v2145_v33, inf }
 0x34a   :  { %3323 = vst.msk [vmem:[%s8059_s4 + $0xd8] sm:$0xff] %vm3295_vm15, %v1916_v51  ;;  %2151 = vmin.xlane.f32.xlu0 %v2150_v34  ;;  %vm2547_vm2 = vcmp.eq.s32.totalorder %v4661_v10, %v1916_v51  ;;  %vm2548_vm3 = vcmp.eq.s32.totalorder %v4669_v17, %v1916_v51  ;;  %v6652_v42 = vcvt.s32.f32 %v2384_v21  ;;  %v1946_v34 = vcvt.f32.s32 %v6259_v43 }
 0x34b   :  { %4135 = vmatmul.msk.f32.gmra.mxu2 %vm2547_vm2, %v8190_v12  ;;  %4199 = vmatmul.msk.f32.gmra.mxu3 %vm2548_vm3, %v8190_v12  ;;  %v1197_v1 = vpop.xlane.xlu1 %1196 }
 0x34c   :  { %vm1329_vm4 = vcmp.le.f32.partialorder %v6191_v24, %v1197_v1  ;;  %vm1330_vm5 = vcmp.le.f32.partialorder %v6184_v49, %v1197_v1  ;;  %2387 = vmin.xlane.f32.xlu2 %v6652_v42  ;;  %v2161_v24 = vcvt.s32.f32 %v2159_v30  ;;  %v1947_v30 = vshll.u32 %v1946_v34, 16 }
 0x34d   :  { %v1457_v25 = vsel %vm1329_vm4, %v4661_v10, 256  ;;  %v1458_v52 = vsel %vm1330_vm5, %v4669_v17, 256  ;;  %v1928_v14 = vpop.xlane.xlu0 %1927 }
 0x34e   :  { %vm2397_vm6 = vcmp.lt.s32.totalorder %v1457_v25, %v1458_v52  ;;  %v1929_v39 = vcvt.f32.s32 %v1928_v14  ;;  %v2927_v27 = vpop.f32.mrf.mxu2  ;;  %v3136_v59 = vpop.f32.mrf.mxu3 }
 0x34f   :  { %v6662_v18 = vsel %vm2397_vm6, %v1457_v25, %v1458_v52  ;;  %v6664_v2 = vadd.f32 %v3136_v59, %v2927_v27  ;;  %v6666_v33 = vpop.xlane.xlu2 %2163  ;;  %v1962_v59 = vcvt.f32.s32 %v6298_v28 }
 0x350   :  { %v1932_v49 = vadd.s32 %v1931_v29, %v1929_v39  ;;  %vm2165_vm7 = vcmp.eq.f32.partialorder %v6240_v4, %v6666_v33  ;;  %v2400_v51 = vshra.s32 %v6662_v18, 16  ;;  %v2177_v39 = vcvt.s32.f32 %v2175_v48 }
 0x351   :  { %3371 = vst.msk [vmem:[%s8060_s3 + $0x58] sm:$0xff] %vm178_vm0, %v6664_v2  ;;  %v2166_v21 = vsel %vm2165_vm7, %v2161_v24, inf }
 0x352   :  { %3324 = vst.msk [vmem:[%s8059_s4 + $0xe0] sm:$0xff] %vm3295_vm15, %v1932_v49  ;;  %2167 = vmin.xlane.f32.xlu0 %v2166_v21  ;;  %vm2549_vm8 = vcmp.eq.s32.totalorder %v4661_v10, %v1932_v49  ;;  %vm2550_vm9 = vcmp.eq.s32.totalorder %v4669_v17, %v1932_v49  ;;  %v6683_v4 = vcvt.s32.f32 %v2400_v51  ;;  %v1963_v49 = vshll.u32 %v1962_v59, 16 }
 0x353   :  { %4136 = vmatmul.msk.f32.gmra.mxu2 %vm2549_vm8, %v8190_v12  ;;  %4200 = vmatmul.msk.f32.gmra.mxu3 %vm2550_vm9, %v8190_v12 }
 0x354   :  { %2403 = vmin.xlane.f32.xlu1 %v6683_v4 }
 0x355   :  { %v1944_v43 = vpop.xlane.xlu0 %1943 }
 0x356   :  { %v1945_v1 = vcvt.f32.s32 %v1944_v43  ;;  %v2930_v25 = vpop.f32.mrf.mxu2  ;;  %v3139_v52 = vpop.f32.mrf.mxu3 }
 0x357   :  { %v6689_v14 = vadd.f32 %v3139_v52, %v2930_v25  ;;  %v6691_v29 = vpop.xlane.xlu2 %2179 }
 0x358   :  { %v1948_v27 = vadd.s32 %v1947_v30, %v1945_v1  ;;  %vm2181_vm10 = vcmp.eq.f32.partialorder %v6279_v36, %v6691_v29  ;;  %v2191_v36 = vand.u32 65535, %v6303_v8  ;;  %v1978_v1 = vcvt.f32.s32 %v6337_v60 }
 0x359   :  { %3372 = vst.msk [vmem:[%s8060_s3 + $0x60] sm:$0xff] %vm178_vm0, %v6689_v14  ;;  %v2182_v19 = vsel %vm2181_vm10, %v2177_v39, inf }
 0x35a   :  { %3325 = vst.msk [vmem:[%s8059_s4 + $0xe8] sm:$0xff] %vm3295_vm15, %v1948_v27  ;;  %2183 = vmin.xlane.f32.xlu0 %v2182_v19  ;;  %vm2551_vm11 = vcmp.eq.s32.totalorder %v4661_v10, %v1948_v27  ;;  %vm2552_vm12 = vcmp.eq.s32.totalorder %v4669_v17, %v1948_v27  ;;  %v2193_v43 = vcvt.s32.f32 %v2191_v36  ;;  %v1979_v52 = vshll.u32 %v1978_v1, 16 }
 0x35b   :  { %4137 = vmatmul.msk.f32.gmra.mxu2 %vm2551_vm11, %v8190_v12  ;;  %4201 = vmatmul.msk.f32.gmra.mxu3 %vm2552_vm12, %v8190_v12 }
 0x35d   :  { %v1960_v24 = vpop.xlane.xlu0 %1959 }
 0x35e   :  { %v1961_v51 = vcvt.f32.s32 %v1960_v24  ;;  %v2933_v28 = vpop.f32.mrf.mxu2  ;;  %v3142_v21 = vpop.f32.mrf.mxu3 }
 0x35f   :  { %v6710_v34 = vadd.f32 %v3142_v21, %v2933_v28  ;;  %v6712_v48 = vpop.xlane.xlu2 %2195 }
 0x360   :  { %v1964_v30 = vadd.s32 %v1963_v49, %v1961_v51  ;;  %vm2197_vm13 = vcmp.eq.f32.partialorder %v6318_v22, %v6712_v48  ;;  %v2207_v22 = vand.u32 65535, %v6342_v5  ;;  %v1994_v49 = vcvt.f32.s32 %v6369_v26 }
 0x361   :  { %3373 = vst.msk [vmem:[%s8060_s3 + $0x68] sm:$0xff] %vm178_vm0, %v6710_v34  ;;  %v2198_v8 = vsel %vm2197_vm13, %v2193_v43, inf }
 0x362   :  { %3326 = vst.msk [vmem:[%s8059_s4 + $0xf0] sm:$0xff] %vm3295_vm15, %v1964_v30  ;;  %2199 = vmin.xlane.f32.xlu0 %v2198_v8  ;;  %vm2553_vm14 = vcmp.eq.s32.totalorder %v4661_v10, %v1964_v30  ;;  %vm2554_vm1 = vcmp.eq.s32.totalorder %v4669_v17, %v1964_v30  ;;  %v2209_v36 = vcvt.s32.f32 %v2207_v22  ;;  %v1995_v28 = vshll.u32 %v1994_v49, 16 }
 0x363   :  { %4138 = vmatmul.msk.f32.gmra.mxu2 %vm2553_vm14, %v8190_v12  ;;  %4202 = vmatmul.msk.f32.gmra.mxu3 %vm2554_vm1, %v8190_v12 }
 0x365   :  { %v1976_v25 = vpop.xlane.xlu0 %1975 }
 0x366   :  { %v1977_v39 = vcvt.f32.s32 %v1976_v25  ;;  %v2936_v60 = vpop.f32.mrf.mxu2  ;;  %v3145_v27 = vpop.f32.mrf.mxu3  ;;  %v2010_v25 = vcvt.f32.s32 %v6401_v44 }
 0x367   :  { %v6731_v19 = vadd.f32 %v3145_v27, %v2936_v60  ;;  %v6733_v59 = vpop.xlane.xlu2 %2211 }
 0x368   :  { %v1980_v24 = vadd.s32 %v1979_v52, %v1977_v39  ;;  %vm2213_vm2 = vcmp.eq.f32.partialorder %v6357_v58, %v6733_v59  ;;  %v2223_v58 = vand.u32 65535, %v6374_v45  ;;  %v2011_v39 = vshll.u32 %v2010_v25, 16 }
 0x369   :  { %3374 = vst.msk [vmem:[%s8060_s3 + $0x70] sm:$0xff] %vm178_vm0, %v6731_v19  ;;  %v2214_v5 = vsel %vm2213_vm2, %v2209_v36, inf  ;;  %v2042_v25 = vcvt.f32.s32 %v6451_v40 }
 0x36a   :  { %3327 = vst.msk [vmem:[%s8059_s4 + $0xf8] sm:$0xff] %vm3295_vm15, %v1980_v24  ;;  %2215 = vmin.xlane.f32.xlu0 %v2214_v5  ;;  %vm2555_vm3 = vcmp.eq.s32.totalorder %v4661_v10, %v1980_v24  ;;  %vm2556_vm4 = vcmp.eq.s32.totalorder %v4669_v17, %v1980_v24  ;;  %v2225_v1 = vcvt.s32.f32 %v2223_v58  ;;  %v2026_v58 = vcvt.f32.s32 %v6427_v38 }
 0x36b   :  { %4139 = vmatmul.msk.f32.gmra.mxu2 %vm2555_vm3, %v8190_v12  ;;  %4203 = vmatmul.msk.f32.gmra.mxu3 %vm2556_vm4, %v8190_v12 }
 0x36d   :  { %v1992_v51 = vpop.xlane.xlu0 %1991 }
 0x36e   :  { %v1993_v21 = vcvt.f32.s32 %v1992_v51  ;;  %v2939_v26 = vpop.f32.mrf.mxu2  ;;  %v3148_v43 = vpop.f32.mrf.mxu3 }
 0x36f   :  { %v6752_v30 = vadd.f32 %v3148_v43, %v2939_v26  ;;  %v6754_v8 = vpop.xlane.xlu2 %2227 }
 0x370   :  { %v1996_v22 = vadd.s32 %v1995_v28, %v1993_v21  ;;  %vm2229_vm5 = vcmp.eq.f32.partialorder %v6389_v57, %v6754_v8  ;;  %v2239_v57 = vand.u32 65535, %v6403_v55  ;;  %v2027_v28 = vshll.u32 %v2026_v58, 16 }
 0x371   :  { %3375 = vst.msk [vmem:[%s8060_s3 + $0x78] sm:$0xff] %vm178_vm0, %v6752_v30  ;;  %v2230_v45 = vsel %vm2229_vm5, %v2225_v1, inf }
 0x372   :  { %3328 = vst.msk [vmem:[%s8059_s4 + $0x100] sm:$0xff] %vm3295_vm15, %v1996_v22  ;;  %2231 = vmin.xlane.f32.xlu0 %v2230_v45  ;;  %vm2557_vm6 = vcmp.eq.s32.totalorder %v4661_v10, %v1996_v22  ;;  %vm2558_vm7 = vcmp.eq.s32.totalorder %v4669_v17, %v1996_v22  ;;  %v2241_v5 = vcvt.s32.f32 %v2239_v57 }
 0x373   :  { %4140 = vmatmul.msk.f32.gmra.mxu2 %vm2557_vm6, %v8190_v12  ;;  %4204 = vmatmul.msk.f32.gmra.mxu3 %vm2558_vm7, %v8190_v12 }
 0x375   :  { %v2008_v52 = vpop.xlane.xlu0 %2007 }
 0x376   :  { %v2009_v60 = vcvt.f32.s32 %v2008_v52  ;;  %v2942_v44 = vpop.f32.mrf.mxu2  ;;  %v3151_v27 = vpop.f32.mrf.mxu3 }
 0x377   :  { %v6773_v36 = vadd.f32 %v3151_v27, %v2942_v44  ;;  %v6775_v24 = vpop.xlane.xlu2 %2243  ;;  %v1200_v52 = vpop.xlane.xlu1 %1199 }
 0x378   :  { %v2012_v49 = vadd.s32 %v2011_v39, %v2009_v60  ;;  %vm2245_vm8 = vcmp.eq.f32.partialorder %v6415_v37, %v6775_v24  ;;  %v2255_v37 = vand.u32 65535, %v6425_v56  ;;  %v2043_v60 = vshll.u32 %v2042_v25, 16 }
 0x379   :  { %3376 = vst.msk [vmem:[%s8060_s3 + $0x80] sm:$0xff] %vm178_vm0, %v6773_v36  ;;  %v2246_v55 = vsel %vm2245_vm8, %v2241_v5, inf }
 0x37a   :  { %3329 = vst.msk [vmem:[%s8059_s4 + $0x108] sm:$0xff] %vm3295_vm15, %v2012_v49  ;;  %2247 = vmin.xlane.f32.xlu0 %v2246_v55  ;;  %vm2559_vm9 = vcmp.eq.s32.totalorder %v4661_v10, %v2012_v49  ;;  %vm2560_vm10 = vcmp.eq.s32.totalorder %v4669_v17, %v2012_v49  ;;  %v2257_v22 = vcvt.s32.f32 %v2255_v37 }
 0x37b   :  { %4141 = vmatmul.msk.f32.gmra.mxu2 %vm2559_vm9, %v8190_v12  ;;  %4205 = vmatmul.msk.f32.gmra.mxu3 %vm2560_vm10, %v8190_v12 }
 0x37d   :  { %v2024_v51 = vpop.xlane.xlu0 %2023 }
 0x37e   :  { %v2025_v21 = vcvt.f32.s32 %v2024_v51  ;;  %v2945_v38 = vpop.f32.mrf.mxu2  ;;  %v3154_v26 = vpop.f32.mrf.mxu3  ;;  %v2058_v51 = vcvt.f32.s32 %v6475_v32 }
 0x37f   :  { %v6794_v43 = vadd.f32 %v3154_v26, %v2945_v38  ;;  %v6796_v1 = vpop.xlane.xlu2 %2259 }
 0x380   :  { %v2028_v45 = vadd.s32 %v2027_v28, %v2025_v21  ;;  %vm2261_vm11 = vcmp.eq.f32.partialorder %v6439_v3, %v6796_v1  ;;  %v8314_v3 = vld [vmem:[#allocation14_spill] sm:$0xff]  ;;  %v2059_v38 = vshll.u32 %v2058_v51, 16 }
 0x381   :  { %3377 = vst.msk [vmem:[%s8060_s3 + $0x88] sm:$0xff] %vm178_vm0, %v6794_v43  ;;  %v2262_v56 = vsel %vm2261_vm11, %v2257_v22, inf  ;;  %v2271_v57 = vand.u32 65535, %v8314_v3 }
 0x382   :  { %3330 = vst.msk [vmem:[%s8059_s4 + $0x110] sm:$0xff] %vm3295_vm15, %v2028_v45  ;;  %2263 = vmin.xlane.f32.xlu0 %v2262_v56  ;;  %vm2561_vm12 = vcmp.eq.s32.totalorder %v4661_v10, %v2028_v45  ;;  %vm2562_vm13 = vcmp.eq.s32.totalorder %v4669_v17, %v2028_v45  ;;  %v1203_v45 = vpop.xlane.xlu1 %1202 }
 0x383   :  { %4142 = vmatmul.msk.f32.gmra.mxu2 %vm2561_vm12, %v8190_v12  ;;  %4206 = vmatmul.msk.f32.gmra.mxu3 %vm2562_vm13, %v8190_v12  ;;  %v2273_v55 = vcvt.s32.f32 %v2271_v57  ;;  %v8316_v57 = vld [vmem:[#allocation41_spill] sm:$0xff] }
 0x384   :  { %vm1331_vm3 = vcmp.le.f32.partialorder %v8316_v57, %v1200_v52 }
 0x385   :  { %v2040_v39 = vpop.xlane.xlu0 %2039 }
 0x386   :  { %v2041_v40 = vcvt.f32.s32 %v2040_v39  ;;  %v2948_v44 = vpop.f32.mrf.mxu2  ;;  %v3157_v27 = vpop.f32.mrf.mxu3  ;;  %v8317_v39 = vld [vmem:[#allocation40_spill] sm:$0xff] }
 0x387   :  { %v6815_v5 = vadd.f32 %v3157_v27, %v2948_v44  ;;  %v6817_v49 = vpop.xlane.xlu2 %2275  ;;  %vm1332_vm4 = vcmp.le.f32.partialorder %v8317_v39, %v1200_v52  ;;  %v2074_v27 = vcvt.f32.s32 %v6499_v50  ;;  %v1459_v52 = vsel %vm1331_vm3, %v4661_v10, 256 }
 0x388   :  { %v2044_v58 = vadd.s32 %v2043_v60, %v2041_v40  ;;  %vm2277_vm14 = vcmp.eq.f32.partialorder %v6463_v20, %v6817_v49  ;;  %v8315_v20 = vld [vmem:[#allocation33_spill] sm:$0xff]  ;;  %v8318_v40 = vld [vmem:[#allocation18_spill] sm:$0xff]  ;;  %v2303_v50 = vand.u32 65535, %v6497_v11  ;;  %v2090_v11 = vcvt.f32.s32 %v6523_v13 }
 0x389   :  { %3378 = vst.msk [vmem:[%s8060_s3 + $0x90] sm:$0xff] %vm178_vm0, %v6815_v5  ;;  %v2278_v37 = vsel %vm2277_vm14, %v2273_v55, inf  ;;  %v2287_v28 = vand.u32 65535, %v8315_v20  ;;  %v1460_v55 = vsel %vm1332_vm4, %v4669_v17, 256 }
 0x38a   :  { %3331 = vst.msk [vmem:[%s8059_s4 + $0x118] sm:$0xff] %vm3295_vm15, %v2044_v58  ;;  %2279 = vmin.xlane.f32.xlu0 %v2278_v37  ;;  %vm2563_vm1 = vcmp.eq.s32.totalorder %v4661_v10, %v2044_v58  ;;  %vm2564_vm2 = vcmp.eq.s32.totalorder %v4669_v17, %v2044_v58  ;;  %v2075_v37 = vshll.u32 %v2074_v27, 16  ;;  %vm2413_vm8 = vcmp.lt.s32.totalorder %v1459_v52, %v1460_v55  ;;  %v1206_v39 = vpop.xlane.xlu1 %1205 }
 0x38b   :  { %4143 = vmatmul.msk.f32.gmra.mxu2 %vm2563_vm1, %v8190_v12  ;;  %4207 = vmatmul.msk.f32.gmra.mxu3 %vm2564_vm2, %v8190_v12  ;;  %v2289_v3 = vcvt.s32.f32 %v2287_v28  ;;  %v6870_v57 = vsel %vm2413_vm8, %v1459_v52, %v1460_v55  ;;  %v2091_v27 = vshll.u32 %v2090_v11, 16  ;;  %v8321_v52 = vld [vmem:[#allocation9_spill] sm:$0xff]  ;;  %v8322_v55 = vld [vmem:[#allocation10_spill] sm:$0xff] }
 0x38c   :  { %v2416_v13 = vshra.s32 %v6870_v57, 16  ;;  %vm1335_vm1 = vcmp.le.f32.partialorder %v8321_v52, %v1206_v39  ;;  %vm1336_vm2 = vcmp.le.f32.partialorder %v8322_v55, %v1206_v39  ;;  %v2106_v39 = vcvt.f32.s32 %v6547_v7 }
 0x38d   :  { %v2056_v21 = vpop.xlane.xlu0 %2055  ;;  %v2335_v7 = vand.u32 65535, %v6545_v6 }
 0x38e   :  { %v2057_v26 = vcvt.f32.s32 %v2056_v21  ;;  %v2951_v32 = vpop.f32.mrf.mxu2  ;;  %v3160_v22 = vpop.f32.mrf.mxu3  ;;  %v8319_v21 = vld [vmem:[#allocation44_spill] sm:$0xff] }
 0x38f   :  { %v6836_v56 = vadd.f32 %v3160_v22, %v2951_v32  ;;  %v6838_v25 = vpop.xlane.xlu2 %2291  ;;  %vm1333_vm9 = vcmp.le.f32.partialorder %v8319_v21, %v1203_v45  ;;  %v2305_v22 = vcvt.s32.f32 %v2303_v50 }
 0x390   :  { %v2060_v60 = vadd.s32 %v2059_v38, %v2057_v26  ;;  %vm2293_vm5 = vcmp.eq.f32.partialorder %v8318_v40, %v6838_v25  ;;  %v8320_v38 = vld [vmem:[#allocation43_spill] sm:$0xff] }
 0x391   :  { %3379 = vst.msk [vmem:[%s8060_s3 + $0x98] sm:$0xff] %vm178_vm0, %v6836_v56  ;;  %v2294_v44 = vsel %vm2293_vm5, %v2289_v3, inf  ;;  %vm1334_vm10 = vcmp.le.f32.partialorder %v8320_v38, %v1203_v45  ;;  %v6899_v38 = vcvt.s32.f32 %v2416_v13 }
 0x392   :  { %3332 = vst.msk [vmem:[%s8059_s4 + $0x120] sm:$0xff] %vm3295_vm15, %v2060_v60  ;;  %2295 = vmin.xlane.f32.xlu0 %v2294_v44  ;;  %vm2565_vm6 = vcmp.eq.s32.totalorder %v4661_v10, %v2060_v60  ;;  %vm2566_vm7 = vcmp.eq.s32.totalorder %v4669_v17, %v2060_v60  ;;  %v1461_v60 = vsel %vm1333_vm9, %v4661_v10, 256  ;;  %v1462_v40 = vsel %vm1334_vm10, %v4669_v17, 256 }
 0x393   :  { %4144 = vmatmul.msk.f32.gmra.mxu2 %vm2565_vm6, %v8190_v12  ;;  %4208 = vmatmul.msk.f32.gmra.mxu3 %vm2566_vm7, %v8190_v12  ;;  %vm2429_vm14 = vcmp.lt.s32.totalorder %v1461_v60, %v1462_v40 }
 0x394   :  { %v6895_v21 = vsel %vm2429_vm14, %v1461_v60, %v1462_v40  ;;  %v2107_v40 = vshll.u32 %v2106_v39, 16 }
 0x395   :  { %v2072_v58 = vpop.xlane.xlu0 %2071 }
 0x396   :  { %v2073_v51 = vcvt.f32.s32 %v2072_v58  ;;  %v2954_v20 = vpop.f32.mrf.mxu2  ;;  %v3163_v28 = vpop.f32.mrf.mxu3 }
 0x397   :  { %v6863_v26 = vadd.f32 %v3163_v28, %v2954_v20  ;;  %v6865_v32 = vpop.xlane.xlu2 %2307 }
 0x398   :  { %v2076_v3 = vadd.s32 %v2075_v37, %v2073_v51  ;;  %vm2309_vm11 = vcmp.eq.f32.partialorder %v6511_v35, %v6865_v32  ;;  %v2319_v35 = vand.u32 65535, %v6521_v53 }
 0x399   :  { %3380 = vst.msk [vmem:[%s8060_s3 + $0xa0] sm:$0xff] %vm178_vm0, %v6863_v26  ;;  %v2310_v45 = vsel %vm2309_vm11, %v2305_v22, inf  ;;  %v1463_v22 = vsel %vm1335_vm1, %v4661_v10, 256 }
 0x39a   :  { %3333 = vst.msk [vmem:[%s8059_s4 + $0x128] sm:$0xff] %vm3295_vm15, %v2076_v3  ;;  %2311 = vmin.xlane.f32.xlu0 %v2310_v45  ;;  %vm2567_vm12 = vcmp.eq.s32.totalorder %v4661_v10, %v2076_v3  ;;  %vm2568_vm13 = vcmp.eq.s32.totalorder %v4669_v17, %v2076_v3  ;;  %v2321_v28 = vcvt.s32.f32 %v2319_v35  ;;  %v1464_v3 = vsel %vm1336_vm2, %v4669_v17, 256 }
 0x39b   :  { %4145 = vmatmul.msk.f32.gmra.mxu2 %vm2567_vm12, %v8190_v12  ;;  %4209 = vmatmul.msk.f32.gmra.mxu3 %vm2568_vm13, %v8190_v12  ;;  %v2432_v45 = vshra.s32 %v6895_v21, 16  ;;  %vm2445_vm6 = vcmp.lt.s32.totalorder %v1463_v22, %v1464_v3 }
 0x39d   :  { %v2088_v44 = vpop.xlane.xlu0 %2087 }
 0x39e   :  { %v2089_v50 = vcvt.f32.s32 %v2088_v44  ;;  %v2957_v58 = vpop.f32.mrf.mxu2  ;;  %v3166_v37 = vpop.f32.mrf.mxu3 }
 0x39f   :  { %v6891_v51 = vadd.f32 %v3166_v37, %v2957_v58  ;;  %v6893_v20 = vpop.xlane.xlu2 %2323  ;;  %v2337_v58 = vcvt.s32.f32 %v2335_v7  ;;  %v8323_v37 = vld [vmem:[#allocation12_spill] sm:$0xff] }
 0x3a0   :  { %v2092_v53 = vadd.s32 %v2091_v27, %v2089_v50  ;;  %vm2325_vm3 = vcmp.eq.f32.partialorder %v6535_v0, %v6893_v20  ;;  %v1209_v0 = vpop.xlane.xlu1 %1208  ;;  %v6920_v27 = vsel %vm2445_vm6, %v1463_v22, %v1464_v3  ;;  %v6926_v50 = vcvt.s32.f32 %v2432_v45 }
 0x3a1   :  { %3381 = vst.msk [vmem:[%s8060_s3 + $0xa8] sm:$0xff] %vm178_vm0, %v6891_v51  ;;  %v2326_v11 = vsel %vm2325_vm3, %v2321_v28, inf  ;;  %vm1337_vm7 = vcmp.le.f32.partialorder %v8323_v37, %v1209_v0  ;;  %v8324_v28 = vld [vmem:[#allocation11_spill] sm:$0xff]  ;;  %v2122_v22 = vcvt.f32.s32 %v6573_v63  ;;  %v2351_v63 = vand.u32 65535, %v6569_v41  ;;  %v8325_v37 = vld [vmem:[#allocation13_spill] sm:$0xff] }
 0x3a2   :  { %3334 = vst.msk [vmem:[%s8059_s4 + $0x130] sm:$0xff] %vm3295_vm15, %v2092_v53  ;;  %2327 = vmin.xlane.f32.xlu2 %v2326_v11  ;;  %2419 = vmin.xlane.f32.xlu0 %v6899_v38  ;;  %vm2569_vm4 = vcmp.eq.s32.totalorder %v4661_v10, %v2092_v53  ;;  %vm2570_vm5 = vcmp.eq.s32.totalorder %v4669_v17, %v2092_v53  ;;  %v2448_v11 = vshra.s32 %v6920_v27, 16 }
 0x3a3   :  { %4146 = vmatmul.msk.f32.gmra.mxu2 %vm2569_vm4, %v8190_v12  ;;  %4210 = vmatmul.msk.f32.gmra.mxu3 %vm2570_vm5, %v8190_v12  ;;  %vm1338_vm8 = vcmp.le.f32.partialorder %v8324_v28, %v1209_v0  ;;  %v2123_v45 = vshll.u32 %v2122_v22, 16  ;;  %v8326_v28 = vld [vmem:[#allocation32_spill] sm:$0xff]  ;;  %v2138_v22 = vcvt.f32.s32 %v6604_v46  ;;  %v2367_v46 = vand.u32 65535, %v6600_v31 }
 0x3a4   :  { %v1466_v3 = vsel %vm1338_vm8, %v4669_v17, 256 }
 0x3a5   :  { %v2104_v60 = vpop.xlane.xlu0 %2103 }
 0x3a6   :  { %v2105_v35 = vcvt.f32.s32 %v2104_v60  ;;  %v2960_v13 = vpop.f32.mrf.mxu2  ;;  %v3169_v44 = vpop.f32.mrf.mxu3 }
 0x3a7   :  { %v6922_v52 = vadd.f32 %v3169_v44, %v2960_v13  ;;  %v6924_v55 = vpop.xlane.xlu2 %2339  ;;  %v2353_v44 = vcvt.s32.f32 %v2351_v63 }
 0x3a8   :  { %v2108_v6 = vadd.s32 %v2107_v40, %v2105_v35  ;;  %vm2341_vm9 = vcmp.eq.f32.partialorder %v6559_v15, %v6924_v55  ;;  %v1465_v15 = vsel %vm1337_vm7, %v4661_v10, 256  ;;  %v1212_v39 = vpop.xlane.xlu1 %1211 }
 0x3a9   :  { %3382 = vst.msk [vmem:[%s8060_s3 + $0xb0] sm:$0xff] %vm178_vm0, %v6922_v52  ;;  %v2342_v53 = vsel %vm2341_vm9, %v2337_v58, inf  ;;  %vm2461_vm12 = vcmp.lt.s32.totalorder %v1465_v15, %v1466_v3  ;;  %v6955_v58 = vcvt.s32.f32 %v2448_v11  ;;  %vm1339_vm13 = vcmp.le.f32.partialorder %v8325_v37, %v1212_v39 }
 0x3aa   :  { %3335 = vst.msk [vmem:[%s8059_s4 + $0x138] sm:$0xff] %vm3295_vm15, %v2108_v6  ;;  %2435 = vmin.xlane.f32.xlu2 %v6926_v50  ;;  %2343 = vmin.xlane.f32.xlu1 %v2342_v53  ;;  %vm2571_vm10 = vcmp.eq.s32.totalorder %v4661_v10, %v2108_v6  ;;  %vm2572_vm11 = vcmp.eq.s32.totalorder %v4669_v17, %v2108_v6  ;;  %v2139_v11 = vshll.u32 %v2138_v22, 16 }
 0x3ab   :  { %4147 = vmatmul.msk.f32.gmra.mxu2 %vm2571_vm10, %v8190_v12  ;;  %4211 = vmatmul.msk.f32.gmra.mxu3 %vm2572_vm11, %v8190_v12  ;;  %vm1340_vm14 = vcmp.le.f32.partialorder %v8326_v28, %v1212_v39  ;;  %v6961_v6 = vsel %vm2461_vm12, %v1465_v15, %v1466_v3 }
 0x3ac   :  { %v1468_v15 = vsel %vm1340_vm14, %v4669_v17, 256  ;;  %v2464_v3 = vshra.s32 %v6961_v6, 16 }
 0x3ad   :  { %v2120_v0 = vpop.xlane.xlu0 %2119 }
 0x3ae   :  { %v2121_v7 = vcvt.f32.s32 %v2120_v0  ;;  %v2963_v60 = vpop.f32.mrf.mxu2  ;;  %v3172_v40 = vpop.f32.mrf.mxu3  ;;  %v6988_v37 = vcvt.s32.f32 %v2464_v3 }
 0x3af   :  { %v6951_v35 = vadd.f32 %v3172_v40, %v2963_v60  ;;  %v6953_v13 = vpop.xlane.xlu2 %2355  ;;  %v2369_v40 = vcvt.s32.f32 %v2367_v46 }
 0x3b0   :  { %v2124_v41 = vadd.s32 %v2123_v45, %v2121_v7  ;;  %vm2357_vm1 = vcmp.eq.f32.partialorder %v6590_v54, %v6953_v13  ;;  %v1467_v54 = vsel %vm1339_vm13, %v4661_v10, 256 }
 0x3b1   :  { %3383 = vst.msk [vmem:[%s8060_s3 + $0xb8] sm:$0xff] %vm178_vm0, %v6951_v35  ;;  %v2358_v53 = vsel %vm2357_vm1, %v2353_v44, inf  ;;  %vm2477_vm4 = vcmp.lt.s32.totalorder %v1467_v54, %v1468_v15 }
 0x3b2   :  { %3336 = vst.msk [vmem:[%s8059_s4 + $0x140] sm:$0xff] %vm3295_vm15, %v2124_v41  ;;  %2359 = vmin.xlane.f32.xlu0 %v2358_v53  ;;  %2451 = vmin.xlane.f32.xlu1 %v6955_v58  ;;  %vm2573_vm2 = vcmp.eq.s32.totalorder %v4661_v10, %v2124_v41  ;;  %vm2574_vm3 = vcmp.eq.s32.totalorder %v4669_v17, %v2124_v41  ;;  %v2154_v41 = vcvt.f32.s32 %v6635_v61 }
 0x3b3   :  { %4148 = vmatmul.msk.f32.gmra.mxu2 %vm2573_vm2, %v8190_v12  ;;  %4212 = vmatmul.msk.f32.gmra.mxu3 %vm2574_vm3, %v8190_v12  ;;  %v6990_v31 = vsel %vm2477_vm4, %v1467_v54, %v1468_v15 }
 0x3b4   :  { %v2480_v61 = vshra.s32 %v6990_v31, 16  ;;  %v2155_v22 = vshll.u32 %v2154_v41, 16 }
 0x3b5   :  { %v2136_v63 = vpop.xlane.xlu0 %2135 }
 0x3b6   :  { %v2137_v39 = vcvt.f32.s32 %v2136_v63  ;;  %v2966_v0 = vpop.f32.mrf.mxu2  ;;  %v3175_v45 = vpop.f32.mrf.mxu3 }
 0x3b7   :  { %v6982_v7 = vadd.f32 %v3175_v45, %v2966_v0  ;;  %v6984_v60 = vpop.xlane.xlu2 %2371  ;;  %v7015_v0 = vcvt.s32.f32 %v2480_v61  ;;  %v2170_v45 = vcvt.f32.s32 %v6666_v33 }
 0x3b8   :  { %v2140_v44 = vadd.s32 %v2139_v11, %v2137_v39  ;;  %vm2373_vm5 = vcmp.eq.f32.partialorder %v6621_v23, %v6984_v60  ;;  %v2383_v23 = vand.u32 65535, %v6631_v9 }
 0x3b9   :  { %3384 = vst.msk [vmem:[%s8060_s3 + $0xc0] sm:$0xff] %vm178_vm0, %v6982_v7  ;;  %v2374_v28 = vsel %vm2373_vm5, %v2369_v40, inf  ;;  %v2171_v33 = vshll.u32 %v2170_v45, 16  ;;  %v2202_v45 = vcvt.f32.s32 %v6712_v48 }
 0x3ba   :  { %3337 = vst.msk [vmem:[%s8059_s4 + $0x148] sm:$0xff] %vm3295_vm15, %v2140_v44  ;;  %2375 = vmin.xlane.f32.xlu2 %v2374_v28  ;;  %2467 = vmin.xlane.f32.xlu0 %v6988_v37  ;;  %vm2575_vm6 = vcmp.eq.s32.totalorder %v4661_v10, %v2140_v44  ;;  %vm2576_vm7 = vcmp.eq.s32.totalorder %v4669_v17, %v2140_v44  ;;  %v2385_v11 = vcvt.s32.f32 %v2383_v23 }
 0x3bb   :  { %4149 = vmatmul.msk.f32.gmra.mxu2 %vm2575_vm6, %v8190_v12  ;;  %4213 = vmatmul.msk.f32.gmra.mxu3 %vm2576_vm7, %v8190_v12 }
 0x3bd   :  { %v2152_v53 = vpop.xlane.xlu0 %2151 }
 0x3be   :  { %v2153_v54 = vcvt.f32.s32 %v2152_v53  ;;  %v2969_v15 = vpop.f32.mrf.mxu2  ;;  %v3178_v46 = vpop.f32.mrf.mxu3 }
 0x3bf   :  { %v7009_v3 = vadd.f32 %v3178_v46, %v2969_v15  ;;  %v7011_v63 = vpop.xlane.xlu2 %2387 }
 0x3c0   :  { %v2156_v39 = vadd.s32 %v2155_v22, %v2153_v54  ;;  %vm2389_vm8 = vcmp.eq.f32.partialorder %v6652_v42, %v7011_v63  ;;  %v2399_v42 = vand.u32 65535, %v6662_v18  ;;  %v2186_v54 = vcvt.f32.s32 %v6691_v29 }
 0x3c1   :  { %3385 = vst.msk [vmem:[%s8060_s3 + $0xc8] sm:$0xff] %vm178_vm0, %v7009_v3  ;;  %v2390_v9 = vsel %vm2389_vm8, %v2385_v11, inf }
 0x3c2   :  { %3338 = vst.msk [vmem:[%s8059_s4 + $0x150] sm:$0xff] %vm3295_vm15, %v2156_v39  ;;  %2391 = vmin.xlane.f32.xlu1 %v2390_v9  ;;  %2483 = vmin.xlane.f32.xlu2 %v7015_v0  ;;  %vm2577_vm9 = vcmp.eq.s32.totalorder %v4661_v10, %v2156_v39  ;;  %vm2578_vm10 = vcmp.eq.s32.totalorder %v4669_v17, %v2156_v39  ;;  %v2401_v53 = vcvt.s32.f32 %v2399_v42  ;;  %v2187_v15 = vshll.u32 %v2186_v54, 16 }
 0x3c3   :  { %4150 = vmatmul.msk.f32.gmra.mxu2 %vm2577_vm9, %v8190_v12  ;;  %4214 = vmatmul.msk.f32.gmra.mxu3 %vm2578_vm10, %v8190_v12 }
 0x3c5   :  { %v2168_v40 = vpop.xlane.xlu0 %2167 }
 0x3c6   :  { %v2169_v44 = vcvt.f32.s32 %v2168_v40  ;;  %v2972_v28 = vpop.f32.mrf.mxu2  ;;  %v3181_v41 = vpop.f32.mrf.mxu3  ;;  %v2203_v40 = vshll.u32 %v2202_v45, 16 }
 0x3c7   :  { %v7033_v23 = vadd.f32 %v3181_v41, %v2972_v28  ;;  %v7035_v61 = vpop.xlane.xlu1 %2403 }
 0x3c8   :  { %v2172_v22 = vadd.s32 %v2171_v33, %v2169_v44  ;;  %vm2405_vm11 = vcmp.eq.f32.partialorder %v6683_v4, %v7035_v61 }
 0x3c9   :  { %3386 = vst.msk [vmem:[%s8060_s3 + $0xd0] sm:$0xff] %vm178_vm0, %v7033_v23  ;;  %v2406_v18 = vsel %vm2405_vm11, %v2401_v53, inf  ;;  %v2218_v53 = vcvt.f32.s32 %v6733_v59 }
 0x3ca   :  { %3339 = vst.msk [vmem:[%s8059_s4 + $0x158] sm:$0xff] %vm3295_vm15, %v2172_v22  ;;  %2407 = vmin.xlane.f32.xlu0 %v2406_v18  ;;  %vm2579_vm12 = vcmp.eq.s32.totalorder %v4661_v10, %v2172_v22  ;;  %vm2580_vm13 = vcmp.eq.s32.totalorder %v4669_v17, %v2172_v22 }
 0x3cb   :  { %4151 = vmatmul.msk.f32.gmra.mxu2 %vm2579_vm12, %v8190_v12  ;;  %4215 = vmatmul.msk.f32.gmra.mxu3 %vm2580_vm13, %v8190_v12  ;;  %v2219_v18 = vshll.u32 %v2218_v53, 16 }
 0x3cd   :  { %v2184_v4 = vpop.xlane.xlu0 %2183 }
 0x3ce   :  { %v2185_v46 = vcvt.f32.s32 %v2184_v4  ;;  %v2975_v11 = vpop.f32.mrf.mxu2  ;;  %v3184_v39 = vpop.f32.mrf.mxu3 }
 0x3cf   :  { %v7053_v29 = vadd.f32 %v3184_v39, %v2975_v11  ;;  %v2234_v11 = vcvt.f32.s32 %v6754_v8 }
 0x3d0   :  { %v2188_v9 = vadd.s32 %v2187_v15, %v2185_v46 }
 0x3d1   :  { %3387 = vst.msk [vmem:[%s8060_s3 + $0xd8] sm:$0xff] %vm178_vm0, %v7053_v29 }
 0x3d2   :  { %3340 = vst.msk [vmem:[%s8059_s4 + $0x160] sm:$0xff] %vm3295_vm15, %v2188_v9  ;;  %vm2581_vm14 = vcmp.eq.s32.totalorder %v4661_v10, %v2188_v9  ;;  %vm2582_vm1 = vcmp.eq.s32.totalorder %v4669_v17, %v2188_v9  ;;  %v2235_v9 = vshll.u32 %v2234_v11, 16 }
 0x3d3   :  { %4152 = vmatmul.msk.f32.gmra.mxu2 %vm2581_vm14, %v8190_v12  ;;  %4216 = vmatmul.msk.f32.gmra.mxu3 %vm2582_vm1, %v8190_v12 }
 0x3d5   :  { %v2200_v42 = vpop.xlane.xlu0 %2199 }
 0x3d6   :  { %v2201_v33 = vcvt.f32.s32 %v2200_v42  ;;  %v2978_v44 = vpop.f32.mrf.mxu2  ;;  %v3187_v28 = vpop.f32.mrf.mxu3 }
 0x3d7   :  { %v7069_v41 = vadd.f32 %v3187_v28, %v2978_v44  ;;  %v2250_v44 = vcvt.f32.s32 %v6775_v24 }
 0x3d8   :  { %v2204_v48 = vadd.s32 %v2203_v40, %v2201_v33 }
 0x3d9   :  { %3388 = vst.msk [vmem:[%s8060_s3 + $0xe0] sm:$0xff] %vm178_vm0, %v7069_v41 }
 0x3da   :  { %3341 = vst.msk [vmem:[%s8059_s4 + $0x168] sm:$0xff] %vm3295_vm15, %v2204_v48  ;;  %vm2583_vm2 = vcmp.eq.s32.totalorder %v4661_v10, %v2204_v48  ;;  %vm2584_vm3 = vcmp.eq.s32.totalorder %v4669_v17, %v2204_v48  ;;  %v2251_v48 = vshll.u32 %v2250_v44, 16 }
 0x3db   :  { %4153 = vmatmul.msk.f32.gmra.mxu2 %vm2583_vm2, %v8190_v12  ;;  %4217 = vmatmul.msk.f32.gmra.mxu3 %vm2584_vm3, %v8190_v12 }
 0x3dd   :  { %v2216_v22 = vpop.xlane.xlu0 %2215 }
 0x3de   :  { %v2217_v54 = vcvt.f32.s32 %v2216_v22  ;;  %v2981_v4 = vpop.f32.mrf.mxu2  ;;  %v3190_v15 = vpop.f32.mrf.mxu3 }
 0x3df   :  { %v7085_v46 = vadd.f32 %v3190_v15, %v2981_v4  ;;  %v2266_v4 = vcvt.f32.s32 %v6796_v1 }
 0x3e0   :  { %v2220_v59 = vadd.s32 %v2219_v18, %v2217_v54 }
 0x3e1   :  { %3389 = vst.msk [vmem:[%s8060_s3 + $0xe8] sm:$0xff] %vm178_vm0, %v7085_v46 }
 0x3e2   :  { %3342 = vst.msk [vmem:[%s8059_s4 + $0x170] sm:$0xff] %vm3295_vm15, %v2220_v59  ;;  %vm2585_vm4 = vcmp.eq.s32.totalorder %v4661_v10, %v2220_v59  ;;  %vm2586_vm5 = vcmp.eq.s32.totalorder %v4669_v17, %v2220_v59  ;;  %v2267_v59 = vshll.u32 %v2266_v4, 16 }
 0x3e3   :  { %4154 = vmatmul.msk.f32.gmra.mxu2 %vm2585_vm4, %v8190_v12  ;;  %4218 = vmatmul.msk.f32.gmra.mxu3 %vm2586_vm5, %v8190_v12 }
 0x3e5   :  { %v2232_v39 = vpop.xlane.xlu0 %2231 }
 0x3e6   :  { %v2233_v45 = vcvt.f32.s32 %v2232_v39  ;;  %v2984_v42 = vpop.f32.mrf.mxu2  ;;  %v3193_v40 = vpop.f32.mrf.mxu3 }
 0x3e7   :  { %v7101_v33 = vadd.f32 %v3193_v40, %v2984_v42  ;;  %v2282_v42 = vcvt.f32.s32 %v6817_v49 }
 0x3e8   :  { %v2236_v8 = vadd.s32 %v2235_v9, %v2233_v45 }
 0x3e9   :  { %3390 = vst.msk [vmem:[%s8060_s3 + $0xf0] sm:$0xff] %vm178_vm0, %v7101_v33 }
 0x3ea   :  { %3343 = vst.msk [vmem:[%s8059_s4 + $0x178] sm:$0xff] %vm3295_vm15, %v2236_v8  ;;  %vm2587_vm6 = vcmp.eq.s32.totalorder %v4661_v10, %v2236_v8  ;;  %vm2588_vm7 = vcmp.eq.s32.totalorder %v4669_v17, %v2236_v8  ;;  %v2283_v8 = vshll.u32 %v2282_v42, 16 }
 0x3eb   :  { %4155 = vmatmul.msk.f32.gmra.mxu2 %vm2587_vm6, %v8190_v12  ;;  %4219 = vmatmul.msk.f32.gmra.mxu3 %vm2588_vm7, %v8190_v12 }
 0x3ed   :  { %v2248_v28 = vpop.xlane.xlu0 %2247 }
 0x3ee   :  { %v2249_v53 = vcvt.f32.s32 %v2248_v28  ;;  %v2987_v22 = vpop.f32.mrf.mxu2  ;;  %v3196_v18 = vpop.f32.mrf.mxu3 }
 0x3ef   :  { %v7117_v54 = vadd.f32 %v3196_v18, %v2987_v22  ;;  %v2298_v22 = vcvt.f32.s32 %v6838_v25 }
 0x3f0   :  { %v2252_v24 = vadd.s32 %v2251_v48, %v2249_v53 }
 0x3f1   :  { %3391 = vst.msk [vmem:[%s8060_s3 + $0xf8] sm:$0xff] %vm178_vm0, %v7117_v54 }
 0x3f2   :  { %3344 = vst.msk [vmem:[%s8059_s4 + $0x180] sm:$0xff] %vm3295_vm15, %v2252_v24  ;;  %vm2589_vm8 = vcmp.eq.s32.totalorder %v4661_v10, %v2252_v24  ;;  %vm2590_vm9 = vcmp.eq.s32.totalorder %v4669_v17, %v2252_v24  ;;  %v2299_v24 = vshll.u32 %v2298_v22, 16 }
 0x3f3   :  { %4156 = vmatmul.msk.f32.gmra.mxu2 %vm2589_vm8, %v8190_v12  ;;  %4220 = vmatmul.msk.f32.gmra.mxu3 %vm2590_vm9, %v8190_v12 }
 0x3f5   :  { %v2264_v15 = vpop.xlane.xlu0 %2263 }
 0x3f6   :  { %v2265_v11 = vcvt.f32.s32 %v2264_v15  ;;  %v2990_v39 = vpop.f32.mrf.mxu2  ;;  %v3199_v9 = vpop.f32.mrf.mxu3 }
 0x3f7   :  { %v7133_v45 = vadd.f32 %v3199_v9, %v2990_v39  ;;  %v2314_v39 = vcvt.f32.s32 %v6865_v32 }
 0x3f8   :  { %v2268_v1 = vadd.s32 %v2267_v59, %v2265_v11 }
 0x3f9   :  { %3392 = vst.msk [vmem:[%s8060_s3 + $0x100] sm:$0xff] %vm178_vm0, %v7133_v45 }
 0x3fa   :  { %3345 = vst.msk [vmem:[%s8059_s4 + $0x188] sm:$0xff] %vm3295_vm15, %v2268_v1  ;;  %vm2591_vm10 = vcmp.eq.s32.totalorder %v4661_v10, %v2268_v1  ;;  %vm2592_vm11 = vcmp.eq.s32.totalorder %v4669_v17, %v2268_v1  ;;  %v2315_v1 = vshll.u32 %v2314_v39, 16  ;;  %v2431_v39 = vand.u32 65535, %v6895_v21 }
 0x3fb   :  { %4157 = vmatmul.msk.f32.gmra.mxu2 %vm2591_vm10, %v8190_v12  ;;  %4221 = vmatmul.msk.f32.gmra.mxu3 %vm2592_vm11, %v8190_v12 }
 0x3fd   :  { %v2280_v40 = vpop.xlane.xlu0 %2279 }
 0x3fe   :  { %v2281_v44 = vcvt.f32.s32 %v2280_v40  ;;  %v2993_v28 = vpop.f32.mrf.mxu2  ;;  %v3202_v48 = vpop.f32.mrf.mxu3 }
 0x3ff   :  { %v7149_v53 = vadd.f32 %v3202_v48, %v2993_v28  ;;  %v2415_v28 = vand.u32 65535, %v6870_v57  ;;  %v2330_v48 = vcvt.f32.s32 %v6893_v20 }
 0x400   :  { %v2284_v49 = vadd.s32 %v2283_v8, %v2281_v44 }
 0x401   :  { %3393 = vst.msk [vmem:[%s8060_s3 + $0x108] sm:$0xff] %vm178_vm0, %v7149_v53  ;;  %v2331_v57 = vshll.u32 %v2330_v48, 16 }
 0x402   :  { %3346 = vst.msk [vmem:[%s8059_s4 + $0x190] sm:$0xff] %vm3295_vm15, %v2284_v49  ;;  %vm2593_vm12 = vcmp.eq.s32.totalorder %v4661_v10, %v2284_v49  ;;  %vm2594_vm13 = vcmp.eq.s32.totalorder %v4669_v17, %v2284_v49 }
 0x403   :  { %4158 = vmatmul.msk.f32.gmra.mxu2 %vm2593_vm12, %v8190_v12  ;;  %4222 = vmatmul.msk.f32.gmra.mxu3 %vm2594_vm13, %v8190_v12 }
 0x405   :  { %v2296_v18 = vpop.xlane.xlu0 %2295 }
 0x406   :  { %v2297_v4 = vcvt.f32.s32 %v2296_v18  ;;  %v2996_v15 = vpop.f32.mrf.mxu2  ;;  %v3205_v59 = vpop.f32.mrf.mxu3  ;;  %v2417_v18 = vcvt.s32.f32 %v2415_v28 }
 0x407   :  { %v7165_v11 = vadd.f32 %v3205_v59, %v2996_v15 }
 0x408   :  { %v2300_v25 = vadd.s32 %v2299_v24, %v2297_v4 }
 0x409   :  { %3394 = vst.msk [vmem:[%s8060_s3 + $0x110] sm:$0xff] %vm178_vm0, %v7165_v11 }
 0x40a   :  { %3347 = vst.msk [vmem:[%s8059_s4 + $0x198] sm:$0xff] %vm3295_vm15, %v2300_v25  ;;  %vm2595_vm14 = vcmp.eq.s32.totalorder %v4661_v10, %v2300_v25  ;;  %vm2596_vm1 = vcmp.eq.s32.totalorder %v4669_v17, %v2300_v25 }
 0x40b   :  { %4159 = vmatmul.msk.f32.gmra.mxu2 %vm2595_vm14, %v8190_v12  ;;  %4223 = vmatmul.msk.f32.gmra.mxu3 %vm2596_vm1, %v8190_v12 }
 0x40d   :  { %v2312_v9 = vpop.xlane.xlu0 %2311 }
 0x40e   :  { %v2313_v42 = vcvt.f32.s32 %v2312_v9  ;;  %v2999_v40 = vpop.f32.mrf.mxu2  ;;  %v3208_v8 = vpop.f32.mrf.mxu3  ;;  %v2346_v9 = vcvt.f32.s32 %v6924_v55 }
 0x40f   :  { %v7181_v44 = vadd.f32 %v3208_v8, %v2999_v40 }
 0x410   :  { %v2316_v32 = vadd.s32 %v2315_v1, %v2313_v42  ;;  %v2433_v42 = vcvt.s32.f32 %v2431_v39  ;;  %v2347_v21 = vshll.u32 %v2346_v9, 16 }
 0x411   :  { %3395 = vst.msk [vmem:[%s8060_s3 + $0x118] sm:$0xff] %vm178_vm0, %v7181_v44 }
 0x412   :  { %3348 = vst.msk [vmem:[%s8059_s4 + $0x1a0] sm:$0xff] %vm3295_vm15, %v2316_v32  ;;  %vm2597_vm2 = vcmp.eq.s32.totalorder %v4661_v10, %v2316_v32  ;;  %vm2598_vm3 = vcmp.eq.s32.totalorder %v4669_v17, %v2316_v32 }
 0x413   :  { %4160 = vmatmul.msk.f32.gmra.mxu2 %vm2597_vm2, %v8190_v12  ;;  %4224 = vmatmul.msk.f32.gmra.mxu3 %vm2598_vm3, %v8190_v12 }
 0x415   :  { %v2328_v49 = vpop.xlane.xlu2 %2327  ;;  %v7198_v22 = vpop.xlane.xlu0 %2419 }
 0x416   :  { %v2329_v24 = vcvt.f32.s32 %v2328_v49  ;;  %vm2421_vm4 = vcmp.eq.f32.partialorder %v6899_v38, %v7198_v22  ;;  %v3002_v20 = vpop.f32.mrf.mxu2  ;;  %v3211_v4 = vpop.f32.mrf.mxu3  ;;  %v2447_v49 = vand.u32 65535, %v6920_v27 }
 0x417   :  { %v7202_v15 = vadd.f32 %v3211_v4, %v3002_v20  ;;  %v2422_v59 = vsel %vm2421_vm4, %v2417_v18, inf  ;;  %v2362_v18 = vcvt.f32.s32 %v6953_v13 }
 0x418   :  { %v2332_v25 = vadd.s32 %v2331_v57, %v2329_v24  ;;  %2423 = vmin.xlane.f32.xlu1 %v2422_v59  ;;  %v2449_v24 = vcvt.s32.f32 %v2447_v49  ;;  %v4237_v59 = vld [vmem:[%s8057_s0] sm:$0xff] }
 0x419   :  { %3396 = vst.msk [vmem:[%s8060_s3 + $0x120] sm:$0xff] %vm178_vm0, %v7202_v15  ;;  %v2363_v27 = vshll.u32 %v2362_v18, 16  ;;  %v4238_v18 = vld [vmem:[%s8057_s0 + $0x8] sm:$0xff] }
 0x41a   :  { %3349 = vst.msk [vmem:[%s8059_s4 + $0x1a8] sm:$0xff] %vm3295_vm15, %v2332_v25  ;;  %vm2599_vm5 = vcmp.eq.s32.totalorder %v4661_v10, %v2332_v25  ;;  %vm2600_vm6 = vcmp.eq.s32.totalorder %v4669_v17, %v2332_v25  ;;  %v8327_v25 = vld [vmem:[#allocation3_spill] sm:$0xff] }
 0x41b   :  { %4161 = vmatmul.msk.f32.gmra.mxu2 %vm2599_vm5, %v8190_v12  ;;  %4225 = vmatmul.msk.f32.gmra.mxu3 %vm2600_vm6, %v8190_v12  ;;  %v3424_v39 = vsub.f32 %v8327_v25, %v4237_v59  ;;  %v8329_v59 = vld [vmem:[#allocation39_spill] sm:$0xff] }
 0x41d   :  { %v7219_v38 = vpop.xlane.xlu2 %2435  ;;  %v2344_v1 = vpop.xlane.xlu1 %2343 }
 0x41e   :  { %vm2437_vm7 = vcmp.eq.f32.partialorder %v6926_v50, %v7219_v38  ;;  %v2345_v55 = vcvt.f32.s32 %v2344_v1  ;;  %v3005_v40 = vpop.f32.mrf.mxu2  ;;  %v3214_v8 = vpop.f32.mrf.mxu3 }
 0x41f   :  { %v7223_v32 = vadd.f32 %v3214_v8, %v3005_v40  ;;  %v2438_v28 = vsel %vm2437_vm7, %v2433_v42, inf }
 0x420   :  { %v2348_v48 = vadd.s32 %v2347_v21, %v2345_v55  ;;  %2439 = vmin.xlane.f32.xlu2 %v2438_v28  ;;  %v2378_v21 = vcvt.f32.s32 %v6984_v60  ;;  %v3488_v55 = vmul.f32 %v3424_v39, %v3424_v39  ;;  %v2479_v39 = vand.u32 65535, %v6990_v31 }
 0x421   :  { %3397 = vst.msk [vmem:[%s8060_s3 + $0x128] sm:$0xff] %vm178_vm0, %v7223_v32 }
 0x422   :  { %3350 = vst.msk [vmem:[%s8059_s4 + $0x1b0] sm:$0xff] %vm3295_vm15, %v2348_v48  ;;  %vm2601_vm8 = vcmp.eq.s32.totalorder %v4661_v10, %v2348_v48  ;;  %vm2602_vm9 = vcmp.eq.s32.totalorder %v4669_v17, %v2348_v48  ;;  %v2379_v28 = vshll.u32 %v2378_v21, 16 }
 0x423   :  { %4162 = vmatmul.msk.f32.gmra.mxu2 %vm2601_vm8, %v8190_v12  ;;  %4226 = vmatmul.msk.f32.gmra.mxu3 %vm2602_vm9, %v8190_v12 }
 0x425   :  { %v2360_v50 = vpop.xlane.xlu0 %2359  ;;  %v7240_v57 = vpop.xlane.xlu1 %2451 }
 0x426   :  { %v2361_v20 = vcvt.f32.s32 %v2360_v50  ;;  %vm2453_vm10 = vcmp.eq.f32.partialorder %v6955_v58, %v7240_v57  ;;  %v3008_v13 = vpop.f32.mrf.mxu2  ;;  %v3217_v4 = vpop.f32.mrf.mxu3  ;;  %v2463_v58 = vand.u32 65535, %v6961_v6  ;;  %v8328_v50 = vld [vmem:[#allocation30_spill] sm:$0xff] }
 0x427   :  { %v7248_v9 = vadd.f32 %v3217_v4, %v3008_v13  ;;  %v2454_v1 = vsel %vm2453_vm10, %v2449_v24, inf  ;;  %v3425_v24 = vsub.f32 %v8328_v50, %v4238_v18  ;;  %v3552_v13 = vsel %vm178_vm0, %v3488_v55, 0.0  ;;  %v4239_v4 = vld [vmem:[%s8057_s0 + $0x18] sm:$0xff]  ;;  %v4241_v18 = vld [vmem:[%s8057_s0 + $0x20] sm:$0xff]  ;;  %v8331_v50 = vld [vmem:[#allocation8_spill] sm:$0xff] }
 0x428   :  { %v2364_v42 = vadd.s32 %v2363_v27, %v2361_v20  ;;  %2455 = vmin.xlane.f32.xlu0 %v2454_v1  ;;  %v2465_v6 = vcvt.s32.f32 %v2463_v58  ;;  %v3427_v25 = vsub.f32 %v8329_v59, %v4239_v4  ;;  %v2394_v1 = vcvt.f32.s32 %v7011_v63  ;;  %v4240_v63 = vld [vmem:[%s8057_s0 + $0x10] sm:$0xff] }
 0x429   :  { %3398 = vst.msk [vmem:[%s8060_s3 + $0x130] sm:$0xff] %vm178_vm0, %v7248_v9  ;;  %v2481_v55 = vcvt.s32.f32 %v2479_v39  ;;  %v4242_v59 = vld [vmem:[%s8057_s0 + $0x30] sm:$0xff] }
 0x42a   :  { %3351 = vst.msk [vmem:[%s8059_s4 + $0x1b8] sm:$0xff] %vm3295_vm15, %v2364_v42  ;;  %vm2603_vm11 = vcmp.eq.s32.totalorder %v4661_v10, %v2364_v42  ;;  %vm2604_vm12 = vcmp.eq.s32.totalorder %v4669_v17, %v2364_v42  ;;  %v3489_v42 = vmul.f32 %v3425_v24, %v3425_v24  ;;  %v3491_v58 = vmul.f32 %v3427_v25, %v3427_v25  ;;  %v8332_v25 = vld [vmem:[#allocation45_spill] sm:$0xff] }
 0x42b   :  { %4163 = vmatmul.msk.f32.gmra.mxu2 %vm2603_vm11, %v8190_v12  ;;  %4227 = vmatmul.msk.f32.gmra.mxu3 %vm2604_vm12, %v8190_v12  ;;  %v3428_v24 = vsub.f32 %v8331_v50, %v4241_v18  ;;  %v8334_v50 = vld [vmem:[#allocation31_spill] sm:$0xff] }
 0x42c   :  { %v3561_v39 = vsel %vm178_vm0, %v3491_v58, 0.0 }
 0x42d   :  { %v2376_v40 = vpop.xlane.xlu2 %2375  ;;  %v7265_v8 = vpop.xlane.xlu0 %2467  ;;  %v3492_v58 = vmul.f32 %v3428_v24, %v3428_v24 }
 0x42e   :  { %v2377_v60 = vcvt.f32.s32 %v2376_v40  ;;  %vm2469_vm13 = vcmp.eq.f32.partialorder %v6988_v37, %v7265_v8  ;;  %v3011_v48 = vpop.f32.mrf.mxu2  ;;  %v3220_v49 = vpop.f32.mrf.mxu3  ;;  %v8330_v40 = vld [vmem:[#allocation6_spill] sm:$0xff] }
 0x42f   :  { %v7273_v27 = vadd.f32 %v3220_v49, %v3011_v48  ;;  %v2470_v20 = vsel %vm2469_vm13, %v2465_v6, inf  ;;  %v3426_v6 = vsub.f32 %v8330_v40, %v4240_v63 }
 0x430   :  { %v2380_v37 = vadd.s32 %v2379_v28, %v2377_v60  ;;  %2471 = vmin.xlane.f32.xlu1 %v2470_v20  ;;  %3553 = vadd.xlane.f32.xlu0 %v3552_v13  ;;  %v2395_v28 = vshll.u32 %v2394_v1, 16  ;;  %v3555_v13 = vsel %vm178_vm0, %v3489_v42, 0.0  ;;  %v2410_v1 = vcvt.f32.s32 %v7035_v61 }
 0x431   :  { %3399 = vst.msk [vmem:[%s8060_s3 + $0x138] sm:$0xff] %vm178_vm0, %v7273_v27  ;;  %v3490_v42 = vmul.f32 %v3426_v6, %v3426_v6  ;;  %v4244_v6 = vld [vmem:[%s8057_s0 + $0x38] sm:$0xff] }
 0x432   :  { %3352 = vst.msk [vmem:[%s8059_s4 + $0x1c0] sm:$0xff] %vm3295_vm15, %v2380_v37  ;;  %vm2605_vm14 = vcmp.eq.s32.totalorder %v4661_v10, %v2380_v37  ;;  %vm2606_vm1 = vcmp.eq.s32.totalorder %v4669_v17, %v2380_v37  ;;  %v2411_v63 = vshll.u32 %v2410_v1, 16  ;;  %v3431_v24 = vsub.f32 %v8334_v50, %v4244_v6 }
 0x433   :  { %4164 = vmatmul.msk.f32.gmra.mxu2 %vm2605_vm14, %v8190_v12  ;;  %4228 = vmatmul.msk.f32.gmra.mxu3 %vm2606_vm1, %v8190_v12 }
 0x435   :  { %v7295_v21 = vpop.xlane.xlu2 %2483  ;;  %v2392_v31 = vpop.xlane.xlu1 %2391 }
 0x436   :  { %vm2485_vm2 = vcmp.eq.f32.partialorder %v7015_v0, %v7295_v21  ;;  %v2393_v60 = vcvt.f32.s32 %v2392_v31  ;;  %v3014_v48 = vpop.f32.mrf.mxu2  ;;  %v3223_v49 = vpop.f32.mrf.mxu3  ;;  %v3430_v0 = vsub.f32 %v8332_v25, %v4242_v59  ;;  %v4245_v59 = vld [vmem:[%s8057_s0 + $0x48] sm:$0xff] }
 0x437   :  { %v7307_v20 = vadd.f32 %v3223_v49, %v3014_v48  ;;  %v2486_v4 = vsel %vm2485_vm2, %v2481_v55, inf  ;;  %v4243_v48 = vld [vmem:[%s8057_s0 + $0x28] sm:$0xff]  ;;  %v8333_v49 = vld [vmem:[#allocation42_spill] sm:$0xff]  ;;  %v3433_v25 = vsub.f32 %v6602_v62, %v4245_v59  ;;  %v3495_v62 = vmul.f32 %v3431_v24, %v3431_v24 }
 0x438   :  { %v2396_v37 = vadd.s32 %v2395_v28, %v2393_v60  ;;  %3556 = vadd.xlane.f32.xlu1 %v3555_v13  ;;  %2487 = vmin.xlane.f32.xlu2 %v2486_v4  ;;  %v3494_v31 = vmul.f32 %v3430_v0, %v3430_v0  ;;  %v3558_v60 = vsel %vm178_vm0, %v3490_v42, 0.0  ;;  %v3429_v18 = vsub.f32 %v8333_v49, %v4243_v48  ;;  %v4246_v42 = vld [vmem:[%s8057_s0 + $0x40] sm:$0xff] }
 0x439   :  { %3400 = vst.msk [vmem:[%s8060_s3 + $0x140] sm:$0xff] %vm178_vm0, %v7307_v20  ;;  %3562 = vadd.xlane.f32.xlu0 %v3561_v39  ;;  %v3564_v4 = vsel %vm178_vm0, %v3492_v58, 0.0  ;;  %v3497_v1 = vmul.f32 %v3433_v25, %v3433_v25  ;;  %v3432_v58 = vsub.f32 %v6571_v47, %v4246_v42  ;;  %v4248_v48 = vld [vmem:[%s8057_s0 + $0x60] sm:$0xff]  ;;  %v4250_v25 = vld [vmem:[%s8057_s0 + $0x68] sm:$0xff] }
 0x43a   :  { %3353 = vst.msk [vmem:[%s8059_s4 + $0x1c8] sm:$0xff] %vm3295_vm15, %v2396_v37  ;;  %vm2607_vm3 = vcmp.eq.s32.totalorder %v4661_v10, %v2396_v37  ;;  %vm2608_vm4 = vcmp.eq.s32.totalorder %v4669_v17, %v2396_v37  ;;  %v3570_v37 = vsel %vm178_vm0, %v3494_v31, 0.0  ;;  %v3493_v39 = vmul.f32 %v3429_v18, %v3429_v18 }
 0x43b   :  { %4165 = vmatmul.msk.f32.gmra.mxu2 %vm2607_vm3, %v8190_v12  ;;  %4229 = vmatmul.msk.f32.gmra.mxu3 %vm2608_vm4, %v8190_v12  ;;  %v3436_v47 = vsub.f32 %v6689_v14, %v4248_v48  ;;  %v3579_v49 = vsel %vm178_vm0, %v3497_v1, 0.0  ;;  %v4249_v14 = vld [vmem:[%s8057_s0 + $0x58] sm:$0xff] }
 0x43c   :  { %v3435_v59 = vsub.f32 %v6664_v2, %v4249_v14 }
 0x43d   :  { %v2408_v55 = vpop.xlane.xlu0 %2407  ;;  %v3500_v6 = vmul.f32 %v3436_v47, %v3436_v47 }
 0x43e   :  { %v2409_v40 = vcvt.f32.s32 %v2408_v55  ;;  %v3017_v61 = vpop.f32.mrf.mxu2  ;;  %v3226_v28 = vpop.f32.mrf.mxu3  ;;  %v3499_v42 = vmul.f32 %v3435_v59, %v3435_v59  ;;  %v4256_v59 = vld [vmem:[%s8057_s0 + $0x98] sm:$0xff] }
 0x43f   :  { %v7338_v13 = vadd.f32 %v3226_v28, %v3017_v61  ;;  %v3573_v28 = vsel %vm178_vm0, %v3495_v62, 0.0  ;;  %v3588_v2 = vsel %vm178_vm0, %v3500_v6, 0.0 }
 0x440   :  { %v2412_v0 = vadd.s32 %v2411_v63, %v2409_v40  ;;  %3565 = vadd.xlane.f32.xlu1 %v3564_v4  ;;  %3559 = vadd.xlane.f32.xlu2 %v3558_v60  ;;  %v4247_v63 = vld [vmem:[%s8057_s0 + $0x50] sm:$0xff]  ;;  %v3567_v60 = vsel %vm178_vm0, %v3493_v39, 0.0  ;;  %v4251_v39 = vld [vmem:[%s8057_s0 + $0x78] sm:$0xff]  ;;  %v3585_v47 = vsel %vm178_vm0, %v3499_v42, 0.0  ;;  %v4258_v42 = vld [vmem:[%s8057_s0 + $0xa0] sm:$0xff] }
 0x441   :  { %3401 = vst.msk [vmem:[%s8060_s3 + $0x148] sm:$0xff] %vm178_vm0, %v7338_v13  ;;  %3571 = vadd.xlane.f32.xlu0 %v3570_v37  ;;  %v3434_v40 = vsub.f32 %v6633_v16, %v4247_v63  ;;  %v3496_v16 = vmul.f32 %v3432_v58, %v3432_v58  ;;  %v3439_v1 = vsub.f32 %v6752_v30, %v4251_v39  ;;  %v4257_v39 = vld [vmem:[%s8057_s0 + $0xa8] sm:$0xff] }
 0x442   :  { %3354 = vst.msk [vmem:[%s8059_s4 + $0x1d0] sm:$0xff] %vm3295_vm15, %v2412_v0  ;;  %vm2609_vm5 = vcmp.eq.s32.totalorder %v4661_v10, %v2412_v0  ;;  %vm2610_vm6 = vcmp.eq.s32.totalorder %v4669_v17, %v2412_v0  ;;  %v3437_v0 = vsub.f32 %v6710_v34, %v4250_v25  ;;  %v3443_v25 = vsub.f32 %v6836_v56, %v4256_v59 }
 0x443   :  { %4166 = vmatmul.msk.f32.gmra.mxu2 %vm2609_vm5, %v8190_v12  ;;  %4230 = vmatmul.msk.f32.gmra.mxu3 %vm2610_vm6, %v8190_v12  ;;  %v3498_v18 = vmul.f32 %v3434_v40, %v3434_v40  ;;  %v3576_v4 = vsel %vm178_vm0, %v3496_v16, 0.0  ;;  %v3503_v58 = vmul.f32 %v3439_v1, %v3439_v1  ;;  %v4253_v40 = vld [vmem:[%s8057_s0 + $0x80] sm:$0xff]  ;;  %v3445_v1 = vsub.f32 %v6891_v51, %v4257_v39  ;;  %v4264_v39 = vld [vmem:[%s8057_s0 + $0xd0] sm:$0xff] }
 0x444   :  { %v3501_v34 = vmul.f32 %v3437_v0, %v3437_v0  ;;  %v3507_v56 = vmul.f32 %v3443_v25, %v3443_v25  ;;  %v3444_v51 = vsub.f32 %v6863_v26, %v4258_v42 }
 0x445   :  { %v3582_v62 = vsel %vm178_vm0, %v3498_v18, 0.0  ;;  %v3597_v16 = vsel %vm178_vm0, %v3503_v58, 0.0 }
 0x446   :  { %v3020_v31 = vpop.f32.mrf.mxu2  ;;  %v3229_v55 = vpop.f32.mrf.mxu3  ;;  %v3591_v48 = vsel %vm178_vm0, %v3501_v34, 0.0  ;;  %v3509_v34 = vmul.f32 %v3445_v1, %v3445_v1 }
 0x447   :  { %v7367_v61 = vadd.f32 %v3229_v55, %v3020_v31  ;;  %v4252_v31 = vld [vmem:[%s8057_s0 + $0x70] sm:$0xff] }
 0x448   :  { %3574 = vadd.xlane.f32.xlu1 %v3573_v28  ;;  %3568 = vadd.xlane.f32.xlu2 %v3567_v60  ;;  %v3438_v30 = vsub.f32 %v6731_v19, %v4252_v31  ;;  %v3440_v28 = vsub.f32 %v6773_v36, %v4253_v40  ;;  %v3609_v40 = vsel %vm178_vm0, %v3507_v56, 0.0  ;;  %v4265_v56 = vld [vmem:[%s8057_s0 + $0xe0] sm:$0xff] }
 0x449   :  { %3402 = vst.msk [vmem:[%s8060_s3 + $0x150] sm:$0xff] %vm178_vm0, %v7367_v61  ;;  %3580 = vadd.xlane.f32.xlu0 %v3579_v49  ;;  %v4254_v49 = vld [vmem:[%s8057_s0 + $0x90] sm:$0xff] }
 0x44a   :  { %v3442_v19 = vsub.f32 %v6815_v5, %v4254_v49  ;;  %v3502_v36 = vmul.f32 %v3438_v30, %v3438_v30  ;;  %v3504_v18 = vmul.f32 %v3440_v28, %v3440_v28  ;;  %v4255_v5 = vld [vmem:[%s8057_s0 + $0x88] sm:$0xff]  ;;  %v4259_v30 = vld [vmem:[%s8057_s0 + $0xb0] sm:$0xff] }
 0x44b   :  { %v3441_v14 = vsub.f32 %v6794_v43, %v4255_v5 }
 0x44c   :  { %v3506_v6 = vmul.f32 %v3442_v19, %v3442_v19 }
 0x44e   :  { %v3023_v50 = vpop.f32.mrf.mxu2  ;;  %v3232_v24 = vpop.f32.mrf.mxu3  ;;  %v3606_v43 = vsel %vm178_vm0, %v3506_v6, 0.0 }
 0x44f   :  { %v7390_v37 = vadd.f32 %v3232_v24, %v3023_v50 }
 0x450   :  { %3583 = vadd.xlane.f32.xlu1 %v3582_v62  ;;  %3577 = vadd.xlane.f32.xlu2 %v3576_v4  ;;  %v3594_v4 = vsel %vm178_vm0, %v3502_v36, 0.0  ;;  %v3600_v62 = vsel %vm178_vm0, %v3504_v18, 0.0 }
 0x451   :  { %3403 = vst.msk [vmem:[%s8060_s3 + $0x158] sm:$0xff] %vm178_vm0, %v7390_v37  ;;  %3589 = vadd.xlane.f32.xlu0 %v3588_v2  ;;  %v3505_v2 = vmul.f32 %v3441_v14, %v3441_v14  ;;  %v4263_v14 = vld [vmem:[%s8057_s0 + $0xd8] sm:$0xff] }
 0x452   :  { %v3451_v59 = vsub.f32 %v7053_v29, %v4263_v14  ;;  %v3450_v29 = vsub.f32 %v7033_v23, %v4264_v39 }
 0x453   :  { %v3603_v28 = vsel %vm178_vm0, %v3505_v2, 0.0  ;;  %v3452_v2 = vsub.f32 %v7069_v41, %v4265_v56 }
 0x454   :  { %v3514_v41 = vmul.f32 %v3450_v29, %v3450_v29 }
 0x456   :  { %v3026_v55 = vpop.f32.mrf.mxu2  ;;  %v3235_v63 = vpop.f32.mrf.mxu3 }
 0x457   :  { %v7411_v60 = vadd.f32 %v3235_v63, %v3026_v55  ;;  %v3446_v55 = vsub.f32 %v6922_v52, %v4259_v30  ;;  %v3508_v52 = vmul.f32 %v3444_v51, %v3444_v51  ;;  %v3516_v30 = vmul.f32 %v3452_v2, %v3452_v2 }
 0x458   :  { %3592 = vadd.xlane.f32.xlu1 %v3591_v48  ;;  %3586 = vadd.xlane.f32.xlu2 %v3585_v47  ;;  %v4260_v48 = vld [vmem:[%s8057_s0 + $0xc0] sm:$0xff]  ;;  %v3615_v47 = vsel %vm178_vm0, %v3509_v34, 0.0 }
 0x459   :  { %3404 = vst.msk [vmem:[%s8060_s3 + $0x160] sm:$0xff] %vm178_vm0, %v7411_v60  ;;  %3598 = vadd.xlane.f32.xlu0 %v3597_v16  ;;  %v3448_v26 = vsub.f32 %v6982_v7, %v4260_v48  ;;  %v3510_v49 = vmul.f32 %v3446_v55, %v3446_v55  ;;  %v3612_v18 = vsel %vm178_vm0, %v3508_v52, 0.0  ;;  %v4261_v7 = vld [vmem:[%s8057_s0 + $0xb8] sm:$0xff]  ;;  %v3630_v48 = vsel %vm178_vm0, %v3514_v41, 0.0 }
 0x45a   :  { %v3447_v6 = vsub.f32 %v6951_v35, %v4261_v7  ;;  %v2442_v41 = vcvt.f32.s32 %v7219_v38 }
 0x45b   :  { %v3512_v19 = vmul.f32 %v3448_v26, %v3448_v26  ;;  %v3618_v5 = vsel %vm178_vm0, %v3510_v49, 0.0 }
 0x45c   :  { %v3511_v25 = vmul.f32 %v3447_v6, %v3447_v6  ;;  %v4270_v6 = vld [vmem:[%s8057_s0 + $0x100] sm:$0xff] }
 0x45d   :  { %v3624_v35 = vsel %vm178_vm0, %v3512_v19, 0.0  ;;  %v3636_v19 = vsel %vm178_vm0, %v3516_v30, 0.0  ;;  %v4274_v30 = vld [vmem:[%s8057_s0 + $0x128] sm:$0xff] }
 0x45e   :  { %v3029_v50 = vpop.f32.mrf.mxu2  ;;  %v3238_v24 = vpop.f32.mrf.mxu3  ;;  %v3621_v51 = vsel %vm178_vm0, %v3511_v25, 0.0 }
 0x45f   :  { %v7434_v0 = vadd.f32 %v3238_v24, %v3029_v50  ;;  %v4262_v50 = vld [vmem:[%s8057_s0 + $0xc8] sm:$0xff] }
 0x460   :  { %3601 = vadd.xlane.f32.xlu1 %v3600_v62  ;;  %3595 = vadd.xlane.f32.xlu2 %v3594_v4  ;;  %v3449_v24 = vsub.f32 %v7009_v3, %v4262_v50  ;;  %v3515_v62 = vmul.f32 %v3451_v59, %v3451_v59  ;;  %v4271_v50 = vld [vmem:[%s8057_s0 + $0x110] sm:$0xff]  ;;  %v4272_v59 = vld [vmem:[%s8057_s0 + $0x120] sm:$0xff] }
 0x461   :  { %3405 = vst.msk [vmem:[%s8060_s3 + $0x168] sm:$0xff] %vm178_vm0, %v7434_v0  ;;  %3607 = vadd.xlane.f32.xlu0 %v3606_v43 }
 0x462   :  { %v3513_v3 = vmul.f32 %v3449_v24, %v3449_v24  ;;  %v3458_v24 = vsub.f32 %v7165_v11, %v4271_v50 }
 0x464   :  { %v3627_v42 = vsel %vm178_vm0, %v3513_v3, 0.0 }
 0x466   :  { %v3032_v58 = vpop.f32.mrf.mxu2  ;;  %v3241_v31 = vpop.f32.mrf.mxu3 }
 0x467   :  { %v7455_v63 = vadd.f32 %v3241_v31, %v3032_v58  ;;  %v4266_v58 = vld [vmem:[%s8057_s0 + $0xf0] sm:$0xff]  ;;  %v3633_v31 = vsel %vm178_vm0, %v3515_v62, 0.0  ;;  %v2426_v62 = vcvt.f32.s32 %v7198_v22  ;;  %v4273_v22 = vld [vmem:[%s8057_s0 + $0x118] sm:$0xff] }
 0x468   :  { %3610 = vadd.xlane.f32.xlu1 %v3609_v40  ;;  %3604 = vadd.xlane.f32.xlu2 %v3603_v28  ;;  %v3454_v23 = vsub.f32 %v7101_v33, %v4266_v58  ;;  %v4267_v33 = vld [vmem:[%s8057_s0 + $0xe8] sm:$0xff]  ;;  %v3459_v2 = vsub.f32 %v7181_v44, %v4273_v22  ;;  %v4275_v44 = vld [vmem:[%s8057_s0 + $0x138] sm:$0xff] }
 0x469   :  { %3406 = vst.msk [vmem:[%s8060_s3 + $0x170] sm:$0xff] %vm178_vm0, %v7455_v63  ;;  %3616 = vadd.xlane.f32.xlu0 %v3615_v47  ;;  %v3453_v26 = vsub.f32 %v7085_v46, %v4267_v33  ;;  %v4268_v47 = vld [vmem:[%s8057_s0 + $0xf8] sm:$0xff]  ;;  %v2443_v33 = vshll.u32 %v2442_v41, 16  ;;  %v4282_v41 = vld [vmem:[%s8057_s0 + $0x160] sm:$0xff] }
 0x46a   :  { %v3518_v55 = vmul.f32 %v3454_v23, %v3454_v23  ;;  %v3455_v52 = vsub.f32 %v7117_v54, %v4268_v47 }
 0x46c   :  { %v3642_v46 = vsel %vm178_vm0, %v3518_v55, 0.0  ;;  %v3519_v54 = vmul.f32 %v3455_v52, %v3455_v52  ;;  %v3461_v55 = vsub.f32 %v7223_v32, %v4274_v30  ;;  %v4276_v52 = vld [vmem:[%s8057_s0 + $0x130] sm:$0xff]  ;;  %v3468_v30 = vsub.f32 %v7411_v60, %v4282_v41 }
 0x46e   :  { %v3035_v16 = vpop.f32.mrf.mxu2  ;;  %v3244_v36 = vpop.f32.mrf.mxu3  ;;  %v3645_v25 = vsel %vm178_vm0, %v3519_v54, 0.0  ;;  %v3525_v32 = vmul.f32 %v3461_v55, %v3461_v55  ;;  %v4283_v55 = vld [vmem:[%s8057_s0 + $0x170] sm:$0xff] }
 0x46f   :  { %v7478_v4 = vadd.f32 %v3244_v36, %v3035_v16  ;;  %v4269_v16 = vld [vmem:[%s8057_s0 + $0x108] sm:$0xff] }
 0x470   :  { %3619 = vadd.xlane.f32.xlu1 %v3618_v5  ;;  %3613 = vadd.xlane.f32.xlu2 %v3612_v18  ;;  %v3457_v36 = vsub.f32 %v7149_v53, %v4269_v16  ;;  %v3517_v18 = vmul.f32 %v3453_v26, %v3453_v26  ;;  %v3456_v53 = vsub.f32 %v7133_v45, %v4270_v6  ;;  %v4277_v16 = vld [vmem:[%s8057_s0 + $0x140] sm:$0xff]  ;;  %v3663_v50 = vsel %vm178_vm0, %v3525_v32, 0.0 }
 0x471   :  { %3407 = vst.msk [vmem:[%s8060_s3 + $0x178] sm:$0xff] %vm178_vm0, %v7478_v4  ;;  %3625 = vadd.xlane.f32.xlu0 %v3624_v35  ;;  %v3460_v35 = vsub.f32 %v7202_v15, %v4272_v59  ;;  %v3522_v15 = vmul.f32 %v3458_v24, %v3458_v24  ;;  %v2458_v24 = vcvt.f32.s32 %v7240_v57  ;;  %v4284_v32 = vld [vmem:[%s8057_s0 + $0x180] sm:$0xff] }
 0x472   :  { %v3521_v7 = vmul.f32 %v3457_v36, %v3457_v36  ;;  %v3639_v45 = vsel %vm178_vm0, %v3517_v18, 0.0  ;;  %v3520_v39 = vmul.f32 %v3456_v53, %v3456_v53  ;;  %v3464_v36 = vsub.f32 %v7307_v20, %v4277_v16 }
 0x473   :  { %v3654_v23 = vsel %vm178_vm0, %v3522_v15, 0.0  ;;  %v2459_v59 = vshll.u32 %v2458_v24, 16  ;;  %v4285_v24 = vld [vmem:[%s8057_s0 + $0x178] sm:$0xff] }
 0x474   :  { %v3651_v11 = vsel %vm178_vm0, %v3521_v7, 0.0  ;;  %v4278_v7 = vld [vmem:[%s8057_s0 + $0x150] sm:$0xff]  ;;  %v3528_v57 = vmul.f32 %v3464_v36, %v3464_v36 }
 0x475   :  { %v3466_v6 = vsub.f32 %v7367_v61, %v4278_v7 }
 0x476   :  { %v3038_v1 = vpop.f32.mrf.mxu2  ;;  %v3247_v43 = vpop.f32.mrf.mxu3  ;;  %v3672_v15 = vsel %vm178_vm0, %v3528_v57, 0.0  ;;  %v4286_v57 = vld [vmem:[%s8057_s0 + $0x188] sm:$0xff] }
 0x477   :  { %v7499_v34 = vadd.f32 %v3247_v43, %v3038_v1  ;;  %v3524_v1 = vmul.f32 %v3460_v35, %v3460_v35  ;;  %v2427_v43 = vshll.u32 %v2426_v62, 16 }
 0x478   :  { %3628 = vadd.xlane.f32.xlu1 %v3627_v42  ;;  %3622 = vadd.xlane.f32.xlu2 %v3621_v51 }
 0x479   :  { %3408 = vst.msk [vmem:[%s8060_s3 + $0x180] sm:$0xff] %vm178_vm0, %v7499_v34  ;;  %3634 = vadd.xlane.f32.xlu0 %v3633_v31  ;;  %v3648_v31 = vsel %vm178_vm0, %v3520_v39, 0.0 }
 0x47e   :  { %v3041_v40 = vpop.f32.mrf.mxu2  ;;  %v3250_v28 = vpop.f32.mrf.mxu3 }
 0x47f   :  { %v7522_v49 = vadd.f32 %v3250_v28, %v3041_v40  ;;  %v3660_v28 = vsel %vm178_vm0, %v3524_v1, 0.0 }
 0x480   :  { %3637 = vadd.xlane.f32.xlu1 %v3636_v19  ;;  %3631 = vadd.xlane.f32.xlu2 %v3630_v48  ;;  %v3463_v48 = vsub.f32 %v7273_v27, %v4275_v44  ;;  %v3523_v27 = vmul.f32 %v3459_v2, %v3459_v2  ;;  %v3462_v19 = vsub.f32 %v7248_v9, %v4276_v52  ;;  %v4281_v2 = vld [vmem:[%s8057_s0 + $0x168] sm:$0xff] }
 0x481   :  { %3409 = vst.msk [vmem:[%s8060_s3 + $0x188] sm:$0xff] %vm178_vm0, %v7522_v49  ;;  %3643 = vadd.xlane.f32.xlu0 %v3642_v46 }
 0x482   :  { %v3527_v47 = vmul.f32 %v3463_v48, %v3463_v48  ;;  %v3657_v9 = vsel %vm178_vm0, %v3523_v27, 0.0  ;;  %v3526_v61 = vmul.f32 %v3462_v19, %v3462_v19  ;;  %v3472_v27 = vsub.f32 %v7499_v34, %v4284_v32 }
 0x484   :  { %v3669_v20 = vsel %vm178_vm0, %v3527_v47, 0.0  ;;  %v3666_v39 = vsel %vm178_vm0, %v3526_v61, 0.0  ;;  %v2490_v47 = vcvt.f32.s32 %v7295_v21  ;;  %v3532_v21 = vmul.f32 %v3468_v30, %v3468_v30  ;;  %v4292_v30 = vld [vmem:[%s8057_s0 + $0x1b8] sm:$0xff] }
 0x485   :  { %v3536_v52 = vmul.f32 %v3472_v27, %v3472_v27  ;;  %v3473_v61 = vsub.f32 %v7522_v49, %v4286_v57 }
 0x486   :  { %v3044_v5 = vpop.f32.mrf.mxu2  ;;  %v3253_v14 = vpop.f32.mrf.mxu3  ;;  %v2491_v36 = vshll.u32 %v2490_v47, 16 }
 0x487   :  { %v7547_v3 = vadd.f32 %v3253_v14, %v3044_v5  ;;  %v3530_v5 = vmul.f32 %v3466_v6, %v3466_v6  ;;  %v3537_v49 = vmul.f32 %v3473_v61, %v3473_v61 }
 0x488   :  { %3646 = vadd.xlane.f32.xlu1 %v3645_v25  ;;  %3640 = vadd.xlane.f32.xlu2 %v3639_v45  ;;  %v2474_v25 = vcvt.f32.s32 %v7265_v8 }
 0x489   :  { %3410 = vst.msk [vmem:[%s8060_s3 + $0x190] sm:$0xff] %vm178_vm0, %v7547_v3  ;;  %3652 = vadd.xlane.f32.xlu0 %v3651_v11  ;;  %v3678_v22 = vsel %vm178_vm0, %v3530_v5, 0.0 }
 0x48b   :  { %v2424_v29 = vpop.xlane.xlu1 %2423 }
 0x48c   :  { %v2425_v56 = vcvt.f32.s32 %v2424_v29  ;;  %v4279_v29 = vld [vmem:[%s8057_s0 + $0x148] sm:$0xff] }
 0x48d   :  { %v3465_v1 = vsub.f32 %v7338_v13, %v4279_v29 }
 0x48e   :  { %v2428_v42 = vadd.s32 %v2427_v43, %v2425_v56  ;;  %v3047_v51 = vpop.f32.mrf.mxu2  ;;  %v3256_v58 = vpop.f32.mrf.mxu3  ;;  %v4280_v43 = vld [vmem:[%s8057_s0 + $0x158] sm:$0xff] }
 0x48f   :  { %v7569_v40 = vadd.f32 %v3256_v58, %v3047_v51  ;;  %v3467_v56 = vsub.f32 %v7390_v37, %v4280_v43  ;;  %v3529_v13 = vmul.f32 %v3465_v1, %v3465_v1  ;;  %v2475_v58 = vshll.u32 %v2474_v25, 16 }
 0x490   :  { %3355 = vst.msk [vmem:[%s8059_s4 + $0x1d8] sm:$0xff] %vm3295_vm15, %v2428_v42  ;;  %3655 = vadd.xlane.f32.xlu1 %v3654_v23  ;;  %3649 = vadd.xlane.f32.xlu2 %v3648_v31  ;;  %vm2611_vm7 = vcmp.eq.s32.totalorder %v4661_v10, %v2428_v42  ;;  %vm2612_vm8 = vcmp.eq.s32.totalorder %v4669_v17, %v2428_v42  ;;  %v3699_v1 = vsel %vm178_vm0, %v3537_v49, 0.0 }
 0x491   :  { %3411 = vst.msk [vmem:[%s8060_s3 + $0x198] sm:$0xff] %vm178_vm0, %v7569_v40  ;;  %3661 = vadd.xlane.f32.xlu0 %v3660_v28  ;;  %4167 = vmatmul.msk.f32.gmra.mxu2 %vm2611_vm7, %v8190_v12  ;;  %v3469_v42 = vsub.f32 %v7434_v0, %v4281_v2  ;;  %v3531_v37 = vmul.f32 %v3467_v56, %v3467_v56  ;;  %v3675_v60 = vsel %vm178_vm0, %v3529_v13, 0.0 }
 0x492   :  { %4231 = vmatmul.msk.f32.gmra.mxu3 %vm2612_vm8, %v8190_v12  ;;  %v3470_v28 = vsub.f32 %v7455_v63, %v4283_v55 }
 0x493   :  { %v2440_v38 = vpop.xlane.xlu2 %2439  ;;  %v3533_v23 = vmul.f32 %v3469_v42, %v3469_v42 }
 0x494   :  { %v2441_v26 = vcvt.f32.s32 %v2440_v38  ;;  %v3534_v34 = vmul.f32 %v3470_v28, %v3470_v28 }
 0x495   :  { %v3687_v63 = vsel %vm178_vm0, %v3533_v23, 0.0 }
 0x496   :  { %v2444_v46 = vadd.s32 %v2443_v33, %v2441_v26  ;;  %v3050_v54 = vpop.f32.mrf.mxu2  ;;  %v3259_v18 = vpop.f32.mrf.mxu3  ;;  %v3681_v26 = vsel %vm178_vm0, %v3531_v37, 0.0 }
 0x497   :  { %v7601_v53 = vadd.f32 %v3259_v18, %v3050_v54 }
 0x498   :  { %3356 = vst.msk [vmem:[%s8059_s4 + $0x1e0] sm:$0xff] %vm3295_vm15, %v2444_v46  ;;  %3664 = vadd.xlane.f32.xlu1 %v3663_v50  ;;  %3658 = vadd.xlane.f32.xlu2 %v3657_v9  ;;  %vm2613_vm9 = vcmp.eq.s32.totalorder %v4661_v10, %v2444_v46  ;;  %vm2614_vm10 = vcmp.eq.s32.totalorder %v4669_v17, %v2444_v46  ;;  %v3690_v50 = vsel %vm178_vm0, %v3534_v34, 0.0  ;;  %v3684_v9 = vsel %vm178_vm0, %v3532_v21, 0.0  ;;  %v4294_v34 = vld [vmem:[%s8057_s0 + $0x1c0] sm:$0xff] }
 0x499   :  { %3412 = vst.msk [vmem:[%s8060_s3 + $0x1a0] sm:$0xff] %vm178_vm0, %v7601_v53  ;;  %3670 = vadd.xlane.f32.xlu0 %v3669_v20  ;;  %4168 = vmatmul.msk.f32.gmra.mxu2 %vm2613_vm9, %v8190_v12  ;;  %v3471_v20 = vsub.f32 %v7478_v4, %v4285_v24 }
 0x49a   :  { %4232 = vmatmul.msk.f32.gmra.mxu3 %vm2614_vm10, %v8190_v12 }
 0x49b   :  { %v2456_v14 = vpop.xlane.xlu0 %2455  ;;  %v3535_v4 = vmul.f32 %v3471_v20, %v3471_v20 }
 0x49c   :  { %v2457_v35 = vcvt.f32.s32 %v2456_v14  ;;  %v3696_v14 = vsel %vm178_vm0, %v3536_v52, 0.0 }
 0x49d   :  { %v3693_v43 = vsel %vm178_vm0, %v3535_v4, 0.0 }
 0x49e   :  { %v2460_v45 = vadd.s32 %v2459_v59, %v2457_v35  ;;  %v3053_v62 = vpop.f32.mrf.mxu2  ;;  %v3262_v11 = vpop.f32.mrf.mxu3  ;;  %v4287_v59 = vld [vmem:[%s8057_s0 + $0x198] sm:$0xff] }
 0x49f   :  { %v7631_v8 = vadd.f32 %v3262_v11, %v3053_v62  ;;  %v3475_v35 = vsub.f32 %v7569_v40, %v4287_v59 }
 0x4a0   :  { %3357 = vst.msk [vmem:[%s8059_s4 + $0x1e8] sm:$0xff] %vm3295_vm15, %v2460_v45  ;;  %3673 = vadd.xlane.f32.xlu1 %v3672_v15  ;;  %3667 = vadd.xlane.f32.xlu2 %v3666_v39  ;;  %vm2615_vm11 = vcmp.eq.s32.totalorder %v4661_v10, %v2460_v45  ;;  %vm2616_vm12 = vcmp.eq.s32.totalorder %v4669_v17, %v2460_v45  ;;  %v4289_v15 = vld [vmem:[%s8057_s0 + $0x1a0] sm:$0xff] }
 0x4a1   :  { %3413 = vst.msk [vmem:[%s8060_s3 + $0x1a8] sm:$0xff] %vm178_vm0, %v7631_v8  ;;  %3679 = vadd.xlane.f32.xlu0 %v3678_v22  ;;  %4169 = vmatmul.msk.f32.gmra.mxu2 %vm2615_vm11, %v8190_v12  ;;  %v3539_v45 = vmul.f32 %v3475_v35, %v3475_v35  ;;  %v3476_v39 = vsub.f32 %v7601_v53, %v4289_v15 }
 0x4a2   :  { %4233 = vmatmul.msk.f32.gmra.mxu3 %vm2616_vm12, %v8190_v12 }
 0x4a3   :  { %v3554_v0 = vpop.xlane.xlu0 %3553  ;;  %v2472_v51 = vpop.xlane.xlu1 %2471  ;;  %v3705_v22 = vsel %vm178_vm0, %v3539_v45, 0.0  ;;  %v3540_v2 = vmul.f32 %v3476_v39, %v3476_v39 }
 0x4a4   :  { %3744 = vst.msk [vmem:[%s8061_s5] sm:$0xff] %vm3295_vm15, %v3554_v0  ;;  %v2473_v31 = vcvt.f32.s32 %v2472_v51 }
 0x4a6   :  { %v2476_v44 = vadd.s32 %v2475_v58, %v2473_v31  ;;  %v3056_v48 = vpop.f32.mrf.mxu2  ;;  %v3265_v38 = vpop.f32.mrf.mxu3  ;;  %v4291_v31 = vld [vmem:[%s8057_s0 + $0x1a8] sm:$0xff] }
 0x4a7   :  { %v7667_v33 = vadd.f32 %v3265_v38, %v3056_v48  ;;  %v3477_v41 = vsub.f32 %v7631_v8, %v4291_v31  ;;  %v4293_v8 = vld [vmem:[%s8057_s0 + $0x1c8] sm:$0xff] }
 0x4a8   :  { %3358 = vst.msk [vmem:[%s8059_s4 + $0x1f0] sm:$0xff] %vm3295_vm15, %v2476_v44  ;;  %3682 = vadd.xlane.f32.xlu1 %v3681_v26  ;;  %3676 = vadd.xlane.f32.xlu2 %v3675_v60  ;;  %vm2617_vm13 = vcmp.eq.s32.totalorder %v4661_v10, %v2476_v44  ;;  %vm2618_vm14 = vcmp.eq.s32.totalorder %v4669_v17, %v2476_v44  ;;  %v3708_v44 = vsel %vm178_vm0, %v3540_v2, 0.0 }
 0x4a9   :  { %3414 = vst.msk [vmem:[%s8060_s3 + $0x1b0] sm:$0xff] %vm178_vm0, %v7667_v33  ;;  %3688 = vadd.xlane.f32.xlu0 %v3687_v63  ;;  %4170 = vmatmul.msk.f32.gmra.mxu2 %vm2617_vm13, %v8190_v12  ;;  %v3541_v32 = vmul.f32 %v3477_v41, %v3477_v41 }
 0x4aa   :  { %4234 = vmatmul.msk.f32.gmra.mxu3 %vm2618_vm14, %v8190_v12 }
 0x4ab   :  { %v2488_v19 = vpop.xlane.xlu2 %2487  ;;  %v3557_v16 = vpop.xlane.xlu1 %3556 }
 0x4ac   :  { %v2489_v46 = vcvt.f32.s32 %v2488_v19  ;;  %v3563_v54 = vpop.xlane.xlu0 %3562  ;;  %3745 = vst.msk [vmem:[%s8061_s5 + $0x8] sm:$0xff] %vm3295_vm15, %v3557_v16  ;;  %v3711_v16 = vsel %vm178_vm0, %v3541_v32, 0.0 }
 0x4ad   :  { %3747 = vst.msk [vmem:[%s8061_s5 + $0x18] sm:$0xff] %vm3295_vm15, %v3563_v54  ;;  %v4295_v54 = vld [vmem:[%s8057_s0 + $0x1d0] sm:$0xff] }
 0x4ae   :  { %v2492_v18 = vadd.s32 %v2491_v36, %v2489_v46  ;;  %v3059_v7 = vpop.f32.mrf.mxu2  ;;  %v3268_v6 = vpop.f32.mrf.mxu3 }
 0x4af   :  { %v3269_v5 = vadd.f32 %v3268_v6, %v3059_v7 }
 0x4b0   :  { %3359 = vst.msk [vmem:[%s8059_s4 + $0x1f8] sm:$0xff] %vm3295_vm15, %v2492_v18  ;;  %3691 = vadd.xlane.f32.xlu1 %v3690_v50  ;;  %3685 = vadd.xlane.f32.xlu2 %v3684_v9  ;;  %vm2619_vm1 = vcmp.eq.s32.totalorder %v4661_v10, %v2492_v18  ;;  %vm2620_vm2 = vcmp.eq.s32.totalorder %v4669_v17, %v2492_v18  ;;  %v4288_v17 = vld [vmem:[%s8057_s0 + $0x190] sm:$0xff] }
 0x4b1   :  { %3415 = vst.msk [vmem:[%s8060_s3 + $0x1b8] sm:$0xff] %vm178_vm0, %v3269_v5  ;;  %3697 = vadd.xlane.f32.xlu0 %v3696_v14  ;;  %4171 = vmatmul.msk.f32.gmra.mxu2 %vm2619_vm1, %v8190_v12  ;;  %v3479_v55 = vsub.f32 %v3269_v5, %v4292_v30 }
 0x4b2   :  { %4235 = vmatmul.msk.f32.gmra.mxu3 %vm2620_vm2, %v8190_v12  ;;  %v3474_v12 = vsub.f32 %v7547_v3, %v4288_v17  ;;  %v4290_v3 = vld [vmem:[%s8057_s0 + $0x1b0] sm:$0xff] }
 0x4b3   :  { %v3560_v40 = vpop.xlane.xlu2 %3559  ;;  %v3566_v25 = vpop.xlane.xlu1 %3565  ;;  %v3478_v56 = vsub.f32 %v7667_v33, %v4290_v3  ;;  %v3543_v27 = vmul.f32 %v3479_v55, %v3479_v55 }
 0x4b4   :  { %3746 = vst.msk [vmem:[%s8061_s5 + $0x10] sm:$0xff] %vm3295_vm15, %v3560_v40  ;;  %v3572_v10 = vpop.xlane.xlu0 %3571  ;;  %v3538_v53 = vmul.f32 %v3474_v12, %v3474_v12 }
 0x4b5   :  { %3750 = vst.msk [vmem:[%s8061_s5 + $0x30] sm:$0xff] %vm3295_vm15, %v3572_v10  ;;  %v3542_v37 = vmul.f32 %v3478_v56, %v3478_v56  ;;  %v3717_v36 = vsel %vm178_vm0, %v3543_v27, 0.0 }
 0x4b6   :  { %3748 = vst.msk [vmem:[%s8061_s5 + $0x20] sm:$0xff] %vm3295_vm15, %v3566_v25  ;;  %v3062_v62 = vpop.f32.mrf.mxu2  ;;  %v3271_v11 = vpop.f32.mrf.mxu3  ;;  %v3702_v23 = vsel %vm178_vm0, %v3538_v53, 0.0 }
 0x4b7   :  { %v3272_v29 = vadd.f32 %v3271_v11, %v3062_v62  ;;  %v3714_v48 = vsel %vm178_vm0, %v3542_v37, 0.0 }
 0x4b8   :  { %3700 = vadd.xlane.f32.xlu1 %v3699_v1  ;;  %3694 = vadd.xlane.f32.xlu2 %v3693_v43 }
 0x4b9   :  { %3416 = vst.msk [vmem:[%s8060_s3 + $0x1c0] sm:$0xff] %vm178_vm0, %v3272_v29  ;;  %3706 = vadd.xlane.f32.xlu0 %v3705_v22  ;;  %v3480_v52 = vsub.f32 %v3272_v29, %v4294_v34 }
 0x4bb   :  { %v3569_v42 = vpop.xlane.xlu2 %3568  ;;  %v3575_v13 = vpop.xlane.xlu1 %3574  ;;  %v3544_v7 = vmul.f32 %v3480_v52, %v3480_v52  ;;  %v4298_v52 = vld [vmem:[%s8057_s0 + $0x1e8] sm:$0xff] }
 0x4bc   :  { %3749 = vst.msk [vmem:[%s8061_s5 + $0x28] sm:$0xff] %vm3295_vm15, %v3569_v42  ;;  %v3581_v0 = vpop.xlane.xlu0 %3580 }
 0x4bd   :  { %3753 = vst.msk [vmem:[%s8061_s5 + $0x48] sm:$0xff] %vm3295_vm15, %v3581_v0  ;;  %v3720_v20 = vsel %vm178_vm0, %v3544_v7, 0.0 }
 0x4be   :  { %3751 = vst.msk [vmem:[%s8061_s5 + $0x38] sm:$0xff] %vm3295_vm15, %v3575_v13  ;;  %v3065_v51 = vpop.f32.mrf.mxu2  ;;  %v3274_v58 = vpop.f32.mrf.mxu3 }
 0x4bf   :  { %v3275_v28 = vadd.f32 %v3274_v58, %v3065_v51  ;;  %v4296_v58 = vld [vmem:[%s8057_s0 + $0x1d8] sm:$0xff] }
 0x4c0   :  { %3709 = vadd.xlane.f32.xlu1 %v3708_v44  ;;  %3703 = vadd.xlane.f32.xlu2 %v3702_v23 }
 0x4c1   :  { %3417 = vst.msk [vmem:[%s8060_s3 + $0x1c8] sm:$0xff] %vm178_vm0, %v3275_v28  ;;  %v3481_v38 = vsub.f32 %v3275_v28, %v4293_v8  ;;  %3715 = vadd.xlane.f32.xlu0 %v3714_v48 }
 0x4c3   :  { %v3578_v33 = vpop.xlane.xlu2 %3577  ;;  %v3584_v26 = vpop.xlane.xlu1 %3583  ;;  %v3545_v60 = vmul.f32 %v3481_v38, %v3481_v38  ;;  %v4297_v38 = vld [vmem:[%s8057_s0 + $0x1e0] sm:$0xff] }
 0x4c4   :  { %3752 = vst.msk [vmem:[%s8061_s5 + $0x40] sm:$0xff] %vm3295_vm15, %v3578_v33  ;;  %v3590_v47 = vpop.xlane.xlu0 %3589 }
 0x4c5   :  { %3756 = vst.msk [vmem:[%s8061_s5 + $0x60] sm:$0xff] %vm3295_vm15, %v3590_v47  ;;  %v3723_v46 = vsel %vm178_vm0, %v3545_v60, 0.0 }
 0x4c6   :  { %3754 = vst.msk [vmem:[%s8061_s5 + $0x50] sm:$0xff] %vm3295_vm15, %v3584_v26  ;;  %v3068_v63 = vpop.f32.mrf.mxu2  ;;  %v3277_v21 = vpop.f32.mrf.mxu3 }
 0x4c7   :  { %v3278_v19 = vadd.f32 %v3277_v21, %v3068_v63 }
 0x4c8   :  { %3712 = vadd.xlane.f32.xlu2 %v3711_v16  ;;  %3718 = vadd.xlane.f32.xlu1 %v3717_v36 }
 0x4c9   :  { %3418 = vst.msk [vmem:[%s8060_s3 + $0x1d0] sm:$0xff] %vm178_vm0, %v3278_v19  ;;  %v3482_v18 = vsub.f32 %v3278_v19, %v4295_v54  ;;  %3724 = vadd.xlane.f32.xlu0 %v3723_v46 }
 0x4cb   :  { %v3546_v6 = vmul.f32 %v3482_v18, %v3482_v18  ;;  %v3587_v50 = vpop.xlane.xlu2 %3586  ;;  %v3593_v9 = vpop.xlane.xlu1 %3592 }
 0x4cc   :  { %3755 = vst.msk [vmem:[%s8061_s5 + $0x58] sm:$0xff] %vm3295_vm15, %v3587_v50  ;;  %v3599_v24 = vpop.xlane.xlu0 %3598 }
 0x4cd   :  { %3759 = vst.msk [vmem:[%s8061_s5 + $0x78] sm:$0xff] %vm3295_vm15, %v3599_v24  ;;  %v3726_v57 = vsel %vm178_vm0, %v3546_v6, 0.0 }
 0x4ce   :  { %3757 = vst.msk [vmem:[%s8061_s5 + $0x68] sm:$0xff] %vm3295_vm15, %v3593_v9  ;;  %v4299_v9 = vld [vmem:[%s8057_s0 + $0x1f0] sm:$0xff] }
 0x4d0   :  { %3721 = vadd.xlane.f32.xlu2 %v3720_v20  ;;  %3727 = vadd.xlane.f32.xlu1 %v3726_v57 }
 0x4d3   :  { %v3596_v61 = vpop.xlane.xlu2 %3595  ;;  %v3602_v5 = vpop.xlane.xlu1 %3601 }
 0x4d4   :  { %3758 = vst.msk [vmem:[%s8061_s5 + $0x70] sm:$0xff] %vm3295_vm15, %v3596_v61  ;;  %v3608_v14 = vpop.xlane.xlu0 %3607 }
 0x4d5   :  { %3762 = vst.msk [vmem:[%s8061_s5 + $0x90] sm:$0xff] %vm3295_vm15, %v3608_v14 }
 0x4d6   :  { %3760 = vst.msk [vmem:[%s8061_s5 + $0x80] sm:$0xff] %vm3295_vm15, %v3602_v5 }
 0x4db   :  { %v3605_v59 = vpop.xlane.xlu2 %3604  ;;  %v3611_v35 = vpop.xlane.xlu1 %3610 }
 0x4dc   :  { %3761 = vst.msk [vmem:[%s8061_s5 + $0x88] sm:$0xff] %vm3295_vm15, %v3605_v59  ;;  %v3617_v4 = vpop.xlane.xlu0 %3616 }
 0x4dd   :  { %3765 = vst.msk [vmem:[%s8061_s5 + $0xa8] sm:$0xff] %vm3295_vm15, %v3617_v4 }
 0x4de   :  { %3763 = vst.msk [vmem:[%s8061_s5 + $0x98] sm:$0xff] %vm3295_vm15, %v3611_v35 }
 0x4e3   :  { %v3614_v49 = vpop.xlane.xlu2 %3613  ;;  %v3620_v40 = vpop.xlane.xlu1 %3619 }
 0x4e4   :  { %3764 = vst.msk [vmem:[%s8061_s5 + $0xa0] sm:$0xff] %vm3295_vm15, %v3614_v49  ;;  %v3626_v25 = vpop.xlane.xlu0 %3625  ;;  %v4300_v49 = vld [vmem:[%s8057_s0 + $0x1f8] sm:$0xff] }
 0x4e5   :  { %3768 = vst.msk [vmem:[%s8061_s5 + $0xc0] sm:$0xff] %vm3295_vm15, %v3626_v25 }
 0x4e6   :  { %3766 = vst.msk [vmem:[%s8061_s5 + $0xb0] sm:$0xff] %vm3295_vm15, %v3620_v40 }
 0x4eb   :  { %v3623_v45 = vpop.xlane.xlu2 %3622  ;;  %v3629_v10 = vpop.xlane.xlu1 %3628 }
 0x4ec   :  { %3767 = vst.msk [vmem:[%s8061_s5 + $0xb8] sm:$0xff] %vm3295_vm15, %v3623_v45  ;;  %v3635_v17 = vpop.xlane.xlu0 %3634 }
 0x4ed   :  { %3771 = vst.msk [vmem:[%s8061_s5 + $0xd8] sm:$0xff] %vm3295_vm15, %v3635_v17 }
 0x4ee   :  { %3769 = vst.msk [vmem:[%s8061_s5 + $0xc8] sm:$0xff] %vm3295_vm15, %v3629_v10 }
 0x4f3   :  { %v3632_v12 = vpop.xlane.xlu2 %3631  ;;  %v3638_v62 = vpop.xlane.xlu1 %3637 }
 0x4f4   :  { %3770 = vst.msk [vmem:[%s8061_s5 + $0xd0] sm:$0xff] %vm3295_vm15, %v3632_v12  ;;  %v3644_v11 = vpop.xlane.xlu0 %3643 }
 0x4f5   :  { %3774 = vst.msk [vmem:[%s8061_s5 + $0xf0] sm:$0xff] %vm3295_vm15, %v3644_v11 }
 0x4f6   :  { %3772 = vst.msk [vmem:[%s8061_s5 + $0xe0] sm:$0xff] %vm3295_vm15, %v3638_v62 }
 0x4fb   :  { %v3641_v15 = vpop.xlane.xlu2 %3640  ;;  %v3647_v39 = vpop.xlane.xlu1 %3646 }
 0x4fc   :  { %3773 = vst.msk [vmem:[%s8061_s5 + $0xe8] sm:$0xff] %vm3295_vm15, %v3641_v15  ;;  %v3653_v29 = vpop.xlane.xlu0 %3652 }
 0x4fd   :  { %3777 = vst.msk [vmem:[%s8061_s5 + $0x108] sm:$0xff] %vm3295_vm15, %v3653_v29 }
 0x4fe   :  { %3775 = vst.msk [vmem:[%s8061_s5 + $0xf8] sm:$0xff] %vm3295_vm15, %v3647_v39 }
 0x503   :  { %v3650_v1 = vpop.xlane.xlu2 %3649  ;;  %v3656_v43 = vpop.xlane.xlu1 %3655 }
 0x504   :  { %3776 = vst.msk [vmem:[%s8061_s5 + $0x100] sm:$0xff] %vm3295_vm15, %v3650_v1  ;;  %v3662_v3 = vpop.xlane.xlu0 %3661 }
 0x505   :  { %3780 = vst.msk [vmem:[%s8061_s5 + $0x120] sm:$0xff] %vm3295_vm15, %v3662_v3 }
 0x506   :  { %3778 = vst.msk [vmem:[%s8061_s5 + $0x110] sm:$0xff] %vm3295_vm15, %v3656_v43 }
 0x50b   :  { %v3659_v56 = vpop.xlane.xlu2 %3658  ;;  %v3665_v22 = vpop.xlane.xlu1 %3664 }
 0x50c   :  { %3779 = vst.msk [vmem:[%s8061_s5 + $0x118] sm:$0xff] %vm3295_vm15, %v3659_v56  ;;  %v3671_v53 = vpop.xlane.xlu0 %3670 }
 0x50d   :  { %3783 = vst.msk [vmem:[%s8061_s5 + $0x138] sm:$0xff] %vm3295_vm15, %v3671_v53 }
 0x50e   :  { %3781 = vst.msk [vmem:[%s8061_s5 + $0x128] sm:$0xff] %vm3295_vm15, %v3665_v22 }
 0x513   :  { %v3668_v2 = vpop.xlane.xlu2 %3667  ;;  %v3674_v42 = vpop.xlane.xlu1 %3673 }
 0x514   :  { %3782 = vst.msk [vmem:[%s8061_s5 + $0x130] sm:$0xff] %vm3295_vm15, %v3668_v2  ;;  %v3680_v13 = vpop.xlane.xlu0 %3679  ;;  %v3071_v37 = vpop.f32.mrf.mxu2 }
 0x515   :  { %3786 = vst.msk [vmem:[%s8061_s5 + $0x150] sm:$0xff] %vm3295_vm15, %v3680_v13  ;;  %v3280_v0 = vpop.f32.mrf.mxu3 }
 0x516   :  { %3784 = vst.msk [vmem:[%s8061_s5 + $0x140] sm:$0xff] %vm3295_vm15, %v3674_v42  ;;  %v3281_v51 = vadd.f32 %v3280_v0, %v3071_v37 }
 0x518   :  { %3419 = vst.msk [vmem:[%s8060_s3 + $0x1d8] sm:$0xff] %vm178_vm0, %v3281_v51  ;;  %v3483_v23 = vsub.f32 %v3281_v51, %v4296_v58 }
 0x51a   :  { %v3547_v31 = vmul.f32 %v3483_v23, %v3483_v23 }
 0x51b   :  { %v3677_v41 = vpop.xlane.xlu2 %3676  ;;  %v3683_v30 = vpop.xlane.xlu1 %3682 }
 0x51c   :  { %3785 = vst.msk [vmem:[%s8061_s5 + $0x148] sm:$0xff] %vm3295_vm15, %v3677_v41  ;;  %v3689_v55 = vpop.xlane.xlu0 %3688  ;;  %v3729_v28 = vsel %vm178_vm0, %v3547_v31, 0.0  ;;  %v3074_v44 = vpop.f32.mrf.mxu2 }
 0x51d   :  { %3789 = vst.msk [vmem:[%s8061_s5 + $0x168] sm:$0xff] %vm3295_vm15, %v3689_v55  ;;  %v3283_v48 = vpop.f32.mrf.mxu3  ;;  %3730 = vadd.xlane.f32.xlu2 %v3729_v28 }
 0x51e   :  { %3787 = vst.msk [vmem:[%s8061_s5 + $0x158] sm:$0xff] %vm3295_vm15, %v3683_v30  ;;  %v3284_v8 = vadd.f32 %v3283_v48, %v3074_v44 }
 0x520   :  { %3420 = vst.msk [vmem:[%s8060_s3 + $0x1e0] sm:$0xff] %vm178_vm0, %v3284_v8  ;;  %v3484_v32 = vsub.f32 %v3284_v8, %v4297_v38 }
 0x522   :  { %v3548_v27 = vmul.f32 %v3484_v32, %v3484_v32 }
 0x523   :  { %v3686_v33 = vpop.xlane.xlu2 %3685  ;;  %v3692_v26 = vpop.xlane.xlu1 %3691 }
 0x524   :  { %3788 = vst.msk [vmem:[%s8061_s5 + $0x160] sm:$0xff] %vm3295_vm15, %v3686_v33  ;;  %v3698_v60 = vpop.xlane.xlu0 %3697  ;;  %v3732_v47 = vsel %vm178_vm0, %v3548_v27, 0.0  ;;  %v3077_v63 = vpop.f32.mrf.mxu2 }
 0x525   :  { %3792 = vst.msk [vmem:[%s8061_s5 + $0x180] sm:$0xff] %vm3295_vm15, %v3698_v60  ;;  %v3286_v21 = vpop.f32.mrf.mxu3  ;;  %3733 = vadd.xlane.f32.xlu0 %v3732_v47 }
 0x526   :  { %3790 = vst.msk [vmem:[%s8061_s5 + $0x170] sm:$0xff] %vm3295_vm15, %v3692_v26  ;;  %v3287_v34 = vadd.f32 %v3286_v21, %v3077_v63 }
 0x528   :  { %3421 = vst.msk [vmem:[%s8060_s3 + $0x1e8] sm:$0xff] %vm178_vm0, %v3287_v34  ;;  %v3485_v19 = vsub.f32 %v3287_v34, %v4298_v52 }
 0x52a   :  { %v3549_v16 = vmul.f32 %v3485_v19, %v3485_v19 }
 0x52b   :  { %v3695_v36 = vpop.xlane.xlu2 %3694  ;;  %v3701_v46 = vpop.xlane.xlu1 %3700 }
 0x52c   :  { %3791 = vst.msk [vmem:[%s8061_s5 + $0x178] sm:$0xff] %vm3295_vm15, %v3695_v36  ;;  %v3707_v54 = vpop.xlane.xlu0 %3706  ;;  %v3735_v18 = vsel %vm178_vm0, %v3549_v16, 0.0  ;;  %v3080_v7 = vpop.f32.mrf.mxu2 }
 0x52d   :  { %3795 = vst.msk [vmem:[%s8061_s5 + $0x198] sm:$0xff] %vm3295_vm15, %v3707_v54  ;;  %3736 = vadd.xlane.f32.xlu1 %v3735_v18  ;;  %v3289_v6 = vpop.f32.mrf.mxu3 }
 0x52e   :  { %3793 = vst.msk [vmem:[%s8061_s5 + $0x188] sm:$0xff] %vm3295_vm15, %v3701_v46  ;;  %v3290_v50 = vadd.f32 %v3289_v6, %v3080_v7 }
 0x530   :  { %3422 = vst.msk [vmem:[%s8060_s3 + $0x1f0] sm:$0xff] %vm178_vm0, %v3290_v50  ;;  %v3486_v24 = vsub.f32 %v3290_v50, %v4299_v9 }
 0x532   :  { %v3550_v20 = vmul.f32 %v3486_v24, %v3486_v24 }
 0x533   :  { %v3704_v57 = vpop.xlane.xlu2 %3703  ;;  %v3710_v61 = vpop.xlane.xlu1 %3709 }
 0x534   :  { %3794 = vst.msk [vmem:[%s8061_s5 + $0x190] sm:$0xff] %vm3295_vm15, %v3704_v57  ;;  %v3716_v5 = vpop.xlane.xlu0 %3715  ;;  %v3738_v14 = vsel %vm178_vm0, %v3550_v20, 0.0  ;;  %v3083_v59 = vpop.f32.mrf.mxu2 }
 0x535   :  { %3798 = vst.msk [vmem:[%s8061_s5 + $0x1b0] sm:$0xff] %vm3295_vm15, %v3716_v5  ;;  %v3292_v35 = vpop.f32.mrf.mxu3  ;;  %3739 = vadd.xlane.f32.xlu2 %v3738_v14 }
 0x536   :  { %3796 = vst.msk [vmem:[%s8061_s5 + $0x1a0] sm:$0xff] %vm3295_vm15, %v3710_v61  ;;  %v3293_v4 = vadd.f32 %v3292_v35, %v3083_v59 }
 0x538   :  { %3423 = vst.msk [vmem:[%s8060_s3 + $0x1f8] sm:$0xff] %vm178_vm0, %v3293_v4  ;;  %v3487_v40 = vsub.f32 %v3293_v4, %v4300_v49 }
 0x53a   :  { %v3551_v25 = vmul.f32 %v3487_v40, %v3487_v40 }
 0x53b   :  { %v3713_v45 = vpop.xlane.xlu2 %3712  ;;  %v3719_v10 = vpop.xlane.xlu1 %3718 }
 0x53c   :  { %3797 = vst.msk [vmem:[%s8061_s5 + $0x1a8] sm:$0xff] %vm3295_vm15, %v3713_v45  ;;  %v3725_v17 = vpop.xlane.xlu0 %3724  ;;  %v3741_v12 = vsel %vm178_vm0, %v3551_v25, 0.0 }
 0x53d   :  { %3801 = vst.msk [vmem:[%s8061_s5 + $0x1c8] sm:$0xff] %vm3295_vm15, %v3725_v17  ;;  %3742 = vadd.xlane.f32.xlu0 %v3741_v12 }
 0x53e   :  { %3799 = vst.msk [vmem:[%s8061_s5 + $0x1b8] sm:$0xff] %vm3295_vm15, %v3719_v10 }
 0x543   :  { %v3722_v62 = vpop.xlane.xlu2 %3721  ;;  %v3728_v11 = vpop.xlane.xlu1 %3727 }
 0x544   :  { %3800 = vst.msk [vmem:[%s8061_s5 + $0x1c0] sm:$0xff] %vm3295_vm15, %v3722_v62 }
 0x545   :  { %3802 = vst.msk [vmem:[%s8061_s5 + $0x1d0] sm:$0xff] %vm3295_vm15, %v3728_v11 }
 0x590   :  { %v3731_v15 = vpop.xlane.xlu2 %3730 }
 0x591   :  { %3803 = vst.msk [vmem:[%s8061_s5 + $0x1d8] sm:$0xff] %vm3295_vm15, %v3731_v15 }
 0x598   :  { %v3734_v39 = vpop.xlane.xlu0 %3733 }
 0x599   :  { %3804 = vst.msk [vmem:[%s8061_s5 + $0x1e0] sm:$0xff] %vm3295_vm15, %v3734_v39 }
 0x5a0   :  { %v3737_v29 = vpop.xlane.xlu1 %3736 }
 0x5a1   :  { %3805 = vst.msk [vmem:[%s8061_s5 + $0x1e8] sm:$0xff] %vm3295_vm15, %v3737_v29 }
 0x5a8   :  { %v3740_v1 = vpop.xlane.xlu2 %3739 }
 0x5a9   :  { %3806 = vst.msk [vmem:[%s8061_s5 + $0x1f0] sm:$0xff] %vm3295_vm15, %v3740_v1 }
 0x5b0   :  { %v3743_v43 = vpop.xlane.xlu0 %3742 }
 0x5b1   :  { %3807 = vst.msk [vmem:[%s8061_s5 + $0x1f8] sm:$0xff] %vm3295_vm15, %v3743_v43 }

</bundles_post_ra>
